<compile_context>
chip_gen: v7x
topology: tpu7x:2x2x1
jax: 0.10.0
libtpu: 0.0.40
codegen_flags: <defaults>
</compile_context>

<pallas_src>
import functools
import math

import jax
import jax.numpy as jnp
from jax.experimental import pallas as pl
from jax.experimental.pallas import tpu as pltpu

N_STACK = 3
LN_EPS = 1e-5
LANE = 128


def _round_up(v, m):
    return (v + m - 1) // m * m


def multihead_kernel(d_real,
                     x_ref,
                     qkvw_ref, qb_ref, vb_ref,   # fused Q/K/V projection
                     g1_ref, b1_ref,             # SelfAttention LayerNorm
                     ww_ref, wb_ref,             # MultiHead.w Linear
                     g2_ref, b2_ref,             # MultiHead LayerNorm
                     o_ref):
    n, dp = x_ref.shape
    pad_f = jnp.float32(dp - d_real)
    inv_d = jnp.float32(1.0 / d_real)

    x = x_ref[...].astype(jnp.float32)
    qkvw = qkvw_ref[...]                # bf16 [dp, 3*dp], 1/sqrt(d) in Q cols
    ww = ww_ref[...]                    # bf16 [dp, dp]

    # Row-vector params stay [1, dp]; the VPU broadcasts at the use sites
    # (no materialized (n, dp) slabs held live across the unrolled layers).
    qb = qb_ref[...]
    vb = vb_ref[...]
    wb = wb_ref[...]
    g1 = g1_ref[...]
    b1 = b1_ref[...]
    g2 = g2_ref[...]
    b2 = b2_ref[...]

    def layernorm(h, g, b):
        # Padded feature columns of h are exactly 0 (weights / biases / gammas
        # are zero-padded), so the mean over dp equals the mean over d_real;
        # the variance only needs a pad*mu^2 correction. Padded output
        # columns stay 0 because gamma/beta are 0 there.
        mu = jnp.sum(h, axis=-1, keepdims=True) * inv_d
        diff = h - mu
        var = (jnp.sum(diff * diff, axis=-1, keepdims=True)
               - pad_f * mu * mu) * inv_d
        return diff * jax.lax.rsqrt(var + LN_EPS) * g + b

    out = x
    # n_stack = 3 is small and static -> unrolled Python loop.
    for _ in range(N_STACK):
        # ---- SelfAttention: fused QKV projection (one wide bf16 matmul) ----
        qkv = jnp.dot(out.astype(jnp.bfloat16), qkvw,
                      preferred_element_type=jnp.float32)
        # K bias dropped (cancels after the key-axis softmax); 1/sqrt(d) is
        # already folded into the Q weight columns and Q bias.
        q = qkv[:, :dp] + qb
        k = qkv[:, dp:2 * dp]
        v = qkv[:, 2 * dp:] + vb

        # scores = q @ k^T without materializing a transpose of k.
        s = jax.lax.dot_general(
            q.astype(jnp.bfloat16), k.astype(jnp.bfloat16),
            dimension_numbers=(((1,), (1,)), ((), ())),
            preferred_element_type=jnp.float32)

        # softmax over the key axis (dim=1 of the square [N, N] score matrix)
        s = s - jnp.max(s, axis=-1, keepdims=True)
        p = jnp.exp(s)
        p = p * pl.reciprocal(jnp.sum(p, axis=-1, keepdims=True), approx=True)

        attn = jnp.dot(p.astype(jnp.bfloat16), v.astype(jnp.bfloat16),
                       preferred_element_type=jnp.float32)
        attn = layernorm(attn + out, g1, b1)       # residual + self.bn

        # ---- MultiHead projection + residual with the original x ----
        h = jnp.dot(attn.astype(jnp.bfloat16), ww,
                    preferred_element_type=jnp.float32) + wb
        out = layernorm(h + x, g2, b2)             # self.layer_norm

    o_ref[...] = out.astype(o_ref.dtype)


def prepare_params(params, d):
    """One-time padding / packing / casting of the MultiHead weights.

    Hoisted out of the per-call path (the review's biggest immediate win):
    the returned dict is cached across calls, so multihead_forward only pads x.
    """
    dp = _round_up(d, LANE)
    pad = dp - d
    inv_sqrt_d = 1.0 / math.sqrt(d)

    def pad_vec(b):          # [1, d] -> [1, dp]
        return jnp.pad(b, ((0, 0), (0, pad)))

    def pad_mat(w):          # [d, d] -> [dp, dp]
        return jnp.pad(w, ((0, pad), (0, pad)))

    # 1/sqrt(d) baked into the Q projection (Q only feeds the score matmul).
    qkvw = jnp.concatenate(
        [pad_mat(params["qw"] * inv_sqrt_d),
         pad_mat(params["kw"]),
         pad_mat(params["vw"])],
        axis=1).astype(jnp.bfloat16)                       # [dp, 3*dp] bf16

    return dict(
        qkvw=qkvw,
        qb=pad_vec(params["qb"] * inv_sqrt_d).astype(jnp.float32),
        vb=pad_vec(params["vb"]).astype(jnp.float32),
        ww=pad_mat(params["ww"]).astype(jnp.bfloat16),
        wb=pad_vec(params["wb"]).astype(jnp.float32),
        g1=pad_vec(params["g1"]), b1=pad_vec(params["b1"]),
        g2=pad_vec(params["g2"]), b2=pad_vec(params["b2"]),
        d=d, dp=dp,
    )


def _vmem_limit_bytes(n, dp):
    # Live set: QKV slab (n x 3dp f32), score matrix (n x n f32), a handful of
    # n x dp f32 activations/temporaries (x, out, attn, h, diff, ...),
    # bf16 weights, and the row-vector params.
    est = (4 * n * 3 * dp                      # qkv slab
           + 4 * n * n                         # scores
           + 4 * n * dp * 8                    # activations / temporaries
           + 2 * (3 * dp * dp + dp * dp)       # bf16 weights
           + 4 * 10 * dp)                      # row vectors
    try:
        cap = pltpu.get_tpu_info().vmem_capacity_bytes
    except Exception:                          # pragma: no cover
        cap = 64 * 1024 * 1024                 # conservative: v7x per-TC VMEM
    return int(min(max(2 * est, 16 * 1024 * 1024), int(0.75 * cap)))


@functools.partial(jax.jit, static_argnums=(2, 3))
def _multihead_forward_impl(x, weights, d, dp):
    (qkvw, qb, vb, g1, b1, ww, wb, g2, b2) = weights
    n = x.shape[0]
    x_p = jnp.pad(x, ((0, 0), (0, dp - d)))    # only per-call prep that remains

    args = (x_p, qkvw, qb, vb, g1, b1, ww, wb, g2, b2)
    vmem = pl.BlockSpec(memory_space=pltpu.MemorySpace.VMEM)
    out = pl.pallas_call(
        functools.partial(multihead_kernel, d),
        out_shape=jax.ShapeDtypeStruct((n, dp), x.dtype),
        in_specs=[vmem] * len(args),
        out_specs=vmem,
        compiler_params=pltpu.CompilerParams(
            vmem_limit_bytes=_vmem_limit_bytes(n, dp)),
    )(*args)
    return out[:, :d]


def multihead_forward(x, prep):
    weights = (prep["qkvw"], prep["qb"], prep["vb"], prep["g1"], prep["b1"],
               prep["ww"], prep["wb"], prep["g2"], prep["b2"])
    return _multihead_forward_impl(x, weights, prep["d"], prep["dp"])


def multihead_reference(x, params):
    """Pure-JAX reference mirroring the kernel's bf16-matmul / f32-accum mix."""
    d = x.shape[-1]
    xf = x.astype(jnp.float32)
    bf = lambda a: a.astype(jnp.bfloat16)

    def mm(a, b):
        return jnp.dot(bf(a), bf(b), preferred_element_type=jnp.float32)

    def layernorm(h, g, b):
        mu = jnp.mean(h, axis=-1, keepdims=True)
        var = jnp.mean((h - mu) ** 2, axis=-1, keepdims=True)
        return (h - mu) * jax.lax.rsqrt(var + LN_EPS) * g + b

    inv_sqrt_d = 1.0 / math.sqrt(d)
    out = xf
    for _ in range(N_STACK):
        q = mm(out, params["qw"]) + params["qb"]
        k = mm(out, params["kw"]) + params["kb"]
        v = mm(out, params["vw"]) + params["vb"]
        s = jnp.dot(bf(q), bf(k).T, preferred_element_type=jnp.float32) * inv_sqrt_d
        p = jax.nn.softmax(s, axis=1)
        attn = layernorm(mm(p, v) + out, params["g1"], params["b1"])
        h = mm(attn, params["ww"]) + params["wb"]
        out = layernorm(h + xf, params["g2"], params["b2"])
    return out.astype(x.dtype)


def init_params(key, d):
    ks = jax.random.split(key, 4)
    scale = 1.0 / math.sqrt(d)

    def lin(k):
        w = jax.random.uniform(k, (d, d), jnp.float32, -scale, scale)
        b = jax.random.uniform(jax.random.fold_in(k, 1), (1, d),
                               jnp.float32, -scale, scale)
        return w, b

    qw, qb = lin(ks[0])
    kw, kb = lin(ks[1])
    vw, vb = lin(ks[2])
    ww, wb = lin(ks[3])
    return dict(
        qw=qw, qb=qb, kw=kw, kb=kb, vw=vw, vb=vb,
        g1=jnp.ones((1, d), jnp.float32), b1=jnp.zeros((1, d), jnp.float32),
        ww=ww, wb=wb,
        g2=jnp.ones((1, d), jnp.float32), b2=jnp.zeros((1, d), jnp.float32),
    )


if __name__ == "__main__":
    # vect_dim = n_hidden = 300 (module default); padded to 384 inside
    # prepare_params.  seq kept small.
    SEQ, DIM = 8, 300
    key = jax.random.PRNGKey(0)
    kx, kp = jax.random.split(key)
    x = jax.random.normal(kx, (SEQ, DIM), jnp.float32)
    params = init_params(kp, DIM)

    prep = prepare_params(params, DIM)          # cached; not per-call work
    out = jax.block_until_ready(multihead_forward(x, prep))
    ref = multihead_reference(x, params)

    assert out.shape == (SEQ, DIM)
    err = float(jnp.max(jnp.abs(out - ref)))
    assert err < 3e-2, f"max abs err vs reference: {err}"
    print("KERNEL_OK")
</pallas_src>

<mosaic_0001>
module attributes {stable_mosaic.version = 11 : i64} {
  func.func @multihead_kernel(%arg0: memref<8x384xf32, #tpu.memory_space<vmem>>, %arg1: memref<384x1152xbf16, #tpu.memory_space<vmem>>, %arg2: memref<1x384xf32, #tpu.memory_space<vmem>>, %arg3: memref<1x384xf32, #tpu.memory_space<vmem>>, %arg4: memref<1x384xf32, #tpu.memory_space<vmem>>, %arg5: memref<1x384xf32, #tpu.memory_space<vmem>>, %arg6: memref<384x384xbf16, #tpu.memory_space<vmem>>, %arg7: memref<1x384xf32, #tpu.memory_space<vmem>>, %arg8: memref<1x384xf32, #tpu.memory_space<vmem>>, %arg9: memref<1x384xf32, #tpu.memory_space<vmem>>, %arg10: memref<8x384xf32, #tpu.memory_space<vmem>>) attributes {dimension_semantics = [], scalar_prefetch = 0 : i64, scratch_operands = 0 : i64, tpu.core_type = #tpu.core_type<tc>} {
    %c0 = arith.constant 0 : index
    %c0_0 = arith.constant 0 : index
    %0 = vector.load %arg0[%c0, %c0_0] : memref<8x384xf32, #tpu.memory_space<vmem>>, vector<8x384xf32>
    %c0_1 = arith.constant 0 : index
    %c0_2 = arith.constant 0 : index
    %1 = vector.load %arg1[%c0_1, %c0_2] : memref<384x1152xbf16, #tpu.memory_space<vmem>>, vector<384x1152xbf16>
    %c0_3 = arith.constant 0 : index
    %c0_4 = arith.constant 0 : index
    %2 = vector.load %arg6[%c0_3, %c0_4] : memref<384x384xbf16, #tpu.memory_space<vmem>>, vector<384x384xbf16>
    %c0_5 = arith.constant 0 : index
    %c0_6 = arith.constant 0 : index
    %3 = vector.load %arg2[%c0_5, %c0_6] : memref<1x384xf32, #tpu.memory_space<vmem>>, vector<1x384xf32>
    %c0_7 = arith.constant 0 : index
    %c0_8 = arith.constant 0 : index
    %4 = vector.load %arg3[%c0_7, %c0_8] : memref<1x384xf32, #tpu.memory_space<vmem>>, vector<1x384xf32>
    %c0_9 = arith.constant 0 : index
    %c0_10 = arith.constant 0 : index
    %5 = vector.load %arg7[%c0_9, %c0_10] : memref<1x384xf32, #tpu.memory_space<vmem>>, vector<1x384xf32>
    %c0_11 = arith.constant 0 : index
    %c0_12 = arith.constant 0 : index
    %6 = vector.load %arg4[%c0_11, %c0_12] : memref<1x384xf32, #tpu.memory_space<vmem>>, vector<1x384xf32>
    %c0_13 = arith.constant 0 : index
    %c0_14 = arith.constant 0 : index
    %7 = vector.load %arg5[%c0_13, %c0_14] : memref<1x384xf32, #tpu.memory_space<vmem>>, vector<1x384xf32>
    %c0_15 = arith.constant 0 : index
    %c0_16 = arith.constant 0 : index
    %8 = vector.load %arg8[%c0_15, %c0_16] : memref<1x384xf32, #tpu.memory_space<vmem>>, vector<1x384xf32>
    %c0_17 = arith.constant 0 : index
    %c0_18 = arith.constant 0 : index
    %9 = vector.load %arg9[%c0_17, %c0_18] : memref<1x384xf32, #tpu.memory_space<vmem>>, vector<1x384xf32>
    %10 = arith.truncf %0 : vector<8x384xf32> to vector<8x384xbf16>
    %cst = arith.constant dense<0.000000e+00> : vector<8x1152xf32>
    %11 = tpu.matmul %10, %1, %cst {dimension_numbers = #tpu.dot_dimension_numbers<[1], [0], [0], [1], [0, 0, 1, 1], [], []>} : vector<8x384xbf16>, vector<384x1152xbf16>, vector<8x1152xf32> -> vector<8x1152xf32>
    %12 = vector.extract_strided_slice %11 {offsets = [0, 0], sizes = [8, 384], strides = [1, 1]} : vector<8x1152xf32> to vector<8x384xf32>
    %13 = vector.broadcast %3 : vector<1x384xf32> to vector<8x384xf32>
    %14 = arith.addf %12, %13 : vector<8x384xf32>
    %15 = vector.extract_strided_slice %11 {offsets = [0, 384], sizes = [8, 384], strides = [1, 1]} : vector<8x1152xf32> to vector<8x384xf32>
    %16 = vector.extract_strided_slice %11 {offsets = [0, 768], sizes = [8, 384], strides = [1, 1]} : vector<8x1152xf32> to vector<8x384xf32>
    %17 = vector.broadcast %4 : vector<1x384xf32> to vector<8x384xf32>
    %18 = arith.addf %16, %17 : vector<8x384xf32>
    %19 = arith.truncf %14 : vector<8x384xf32> to vector<8x384xbf16>
    %20 = arith.truncf %15 : vector<8x384xf32> to vector<8x384xbf16>
    %cst_19 = arith.constant dense<0.000000e+00> : vector<8x8xf32>
    %21 = tpu.matmul %19, %20, %cst_19 {dimension_numbers = #tpu.dot_dimension_numbers<[1], [1], [0], [0], [0, 0, 1, 0], [], []>} : vector<8x384xbf16>, vector<8x384xbf16>, vector<8x8xf32> -> vector<8x8xf32>
    %cst_20 = arith.constant dense<0xFF800000> : vector<8xf32>
    %22 = vector.multi_reduction <maximumf>, %21, %cst_20 [1] : vector<8x8xf32> to vector<8xf32>
    %23 = vector.shape_cast %22 : vector<8xf32> to vector<8x1xf32>
    %24 = vector.broadcast %23 : vector<8x1xf32> to vector<8x8xf32>
    %25 = arith.subf %21, %24 : vector<8x8xf32>
    %26 = math.exp %25 : vector<8x8xf32>
    %cst_21 = arith.constant dense<0.000000e+00> : vector<8xf32>
    %27 = vector.multi_reduction <add>, %26, %cst_21 [1] : vector<8x8xf32> to vector<8xf32>
    %28 = vector.shape_cast %27 : vector<8xf32> to vector<8x1xf32>
    %29 = tpu.reciprocal %28 {approx = true} : vector<8x1xf32> -> vector<8x1xf32>
    %30 = vector.broadcast %29 : vector<8x1xf32> to vector<8x8xf32>
    %31 = arith.mulf %26, %30 : vector<8x8xf32>
    %32 = arith.truncf %31 : vector<8x8xf32> to vector<8x8xbf16>
    %33 = arith.truncf %18 : vector<8x384xf32> to vector<8x384xbf16>
    %cst_22 = arith.constant dense<0.000000e+00> : vector<8x384xf32>
    %34 = tpu.matmul %32, %33, %cst_22 {dimension_numbers = #tpu.dot_dimension_numbers<[1], [0], [0], [1], [0, 0, 1, 1], [], []>} : vector<8x8xbf16>, vector<8x384xbf16>, vector<8x384xf32> -> vector<8x384xf32>
    %35 = arith.addf %34, %0 : vector<8x384xf32>
    %cst_23 = arith.constant dense<0.000000e+00> : vector<8xf32>
    %36 = vector.multi_reduction <add>, %35, %cst_23 [1] : vector<8x384xf32> to vector<8xf32>
    %37 = vector.shape_cast %36 : vector<8xf32> to vector<8x1xf32>
    %cst_24 = arith.constant 0.00333333341 : f32
    %38 = vector.broadcast %cst_24 : f32 to vector<8x1xf32>
    %39 = arith.mulf %37, %38 : vector<8x1xf32>
    %40 = vector.broadcast %39 : vector<8x1xf32> to vector<8x384xf32>
    %41 = arith.subf %35, %40 : vector<8x384xf32>
    %42 = arith.mulf %41, %41 : vector<8x384xf32>
    %cst_25 = arith.constant dense<0.000000e+00> : vector<8xf32>
    %43 = vector.multi_reduction <add>, %42, %cst_25 [1] : vector<8x384xf32> to vector<8xf32>
    %44 = vector.shape_cast %43 : vector<8xf32> to vector<8x1xf32>
    %cst_26 = arith.constant 8.400000e+01 : f32
    %45 = vector.broadcast %cst_26 : f32 to vector<8x1xf32>
    %46 = arith.mulf %45, %39 : vector<8x1xf32>
    %47 = arith.mulf %46, %39 : vector<8x1xf32>
    %48 = arith.subf %44, %47 : vector<8x1xf32>
    %cst_27 = arith.constant 0.00333333341 : f32
    %49 = vector.broadcast %cst_27 : f32 to vector<8x1xf32>
    %50 = arith.mulf %48, %49 : vector<8x1xf32>
    %cst_28 = arith.constant 9.99999974E-6 : f32
    %51 = vector.broadcast %cst_28 : f32 to vector<8x1xf32>
    %52 = arith.addf %50, %51 : vector<8x1xf32>
    %53 = math.rsqrt %52 : vector<8x1xf32>
    %54 = vector.broadcast %53 : vector<8x1xf32> to vector<8x384xf32>
    %55 = arith.mulf %41, %54 : vector<8x384xf32>
    %56 = vector.broadcast %6 : vector<1x384xf32> to vector<8x384xf32>
    %57 = arith.mulf %55, %56 : vector<8x384xf32>
    %58 = vector.broadcast %7 : vector<1x384xf32> to vector<8x384xf32>
    %59 = arith.addf %57, %58 : vector<8x384xf32>
    %60 = arith.truncf %59 : vector<8x384xf32> to vector<8x384xbf16>
    %cst_29 = arith.constant dense<0.000000e+00> : vector<8x384xf32>
    %61 = tpu.matmul %60, %2, %cst_29 {dimension_numbers = #tpu.dot_dimension_numbers<[1], [0], [0], [1], [0, 0, 1, 1], [], []>} : vector<8x384xbf16>, vector<384x384xbf16>, vector<8x384xf32> -> vector<8x384xf32>
    %62 = vector.broadcast %5 : vector<1x384xf32> to vector<8x384xf32>
    %63 = arith.addf %61, %62 : vector<8x384xf32>
    %64 = arith.addf %63, %0 : vector<8x384xf32>
    %cst_30 = arith.constant dense<0.000000e+00> : vector<8xf32>
    %65 = vector.multi_reduction <add>, %64, %cst_30 [1] : vector<8x384xf32> to vector<8xf32>
    %66 = vector.shape_cast %65 : vector<8xf32> to vector<8x1xf32>
    %cst_31 = arith.constant 0.00333333341 : f32
    %67 = vector.broadcast %cst_31 : f32 to vector<8x1xf32>
    %68 = arith.mulf %66, %67 : vector<8x1xf32>
    %69 = vector.broadcast %68 : vector<8x1xf32> to vector<8x384xf32>
    %70 = arith.subf %64, %69 : vector<8x384xf32>
    %71 = arith.mulf %70, %70 : vector<8x384xf32>
    %cst_32 = arith.constant dense<0.000000e+00> : vector<8xf32>
    %72 = vector.multi_reduction <add>, %71, %cst_32 [1] : vector<8x384xf32> to vector<8xf32>
    %73 = vector.shape_cast %72 : vector<8xf32> to vector<8x1xf32>
    %cst_33 = arith.constant 8.400000e+01 : f32
    %74 = vector.broadcast %cst_33 : f32 to vector<8x1xf32>
    %75 = arith.mulf %74, %68 : vector<8x1xf32>
    %76 = arith.mulf %75, %68 : vector<8x1xf32>
    %77 = arith.subf %73, %76 : vector<8x1xf32>
    %cst_34 = arith.constant 0.00333333341 : f32
    %78 = vector.broadcast %cst_34 : f32 to vector<8x1xf32>
    %79 = arith.mulf %77, %78 : vector<8x1xf32>
    %cst_35 = arith.constant 9.99999974E-6 : f32
    %80 = vector.broadcast %cst_35 : f32 to vector<8x1xf32>
    %81 = arith.addf %79, %80 : vector<8x1xf32>
    %82 = math.rsqrt %81 : vector<8x1xf32>
    %83 = vector.broadcast %82 : vector<8x1xf32> to vector<8x384xf32>
    %84 = arith.mulf %70, %83 : vector<8x384xf32>
    %85 = vector.broadcast %8 : vector<1x384xf32> to vector<8x384xf32>
    %86 = arith.mulf %84, %85 : vector<8x384xf32>
    %87 = vector.broadcast %9 : vector<1x384xf32> to vector<8x384xf32>
    %88 = arith.addf %86, %87 : vector<8x384xf32>
    %89 = arith.truncf %88 : vector<8x384xf32> to vector<8x384xbf16>
    %cst_36 = arith.constant dense<0.000000e+00> : vector<8x1152xf32>
    %90 = tpu.matmul %89, %1, %cst_36 {dimension_numbers = #tpu.dot_dimension_numbers<[1], [0], [0], [1], [0, 0, 1, 1], [], []>} : vector<8x384xbf16>, vector<384x1152xbf16>, vector<8x1152xf32> -> vector<8x1152xf32>
    %91 = vector.extract_strided_slice %90 {offsets = [0, 0], sizes = [8, 384], strides = [1, 1]} : vector<8x1152xf32> to vector<8x384xf32>
    %92 = vector.broadcast %3 : vector<1x384xf32> to vector<8x384xf32>
    %93 = arith.addf %91, %92 : vector<8x384xf32>
    %94 = vector.extract_strided_slice %90 {offsets = [0, 384], sizes = [8, 384], strides = [1, 1]} : vector<8x1152xf32> to vector<8x384xf32>
    %95 = vector.extract_strided_slice %90 {offsets = [0, 768], sizes = [8, 384], strides = [1, 1]} : vector<8x1152xf32> to vector<8x384xf32>
    %96 = vector.broadcast %4 : vector<1x384xf32> to vector<8x384xf32>
    %97 = arith.addf %95, %96 : vector<8x384xf32>
    %98 = arith.truncf %93 : vector<8x384xf32> to vector<8x384xbf16>
    %99 = arith.truncf %94 : vector<8x384xf32> to vector<8x384xbf16>
    %cst_37 = arith.constant dense<0.000000e+00> : vector<8x8xf32>
    %100 = tpu.matmul %98, %99, %cst_37 {dimension_numbers = #tpu.dot_dimension_numbers<[1], [1], [0], [0], [0, 0, 1, 0], [], []>} : vector<8x384xbf16>, vector<8x384xbf16>, vector<8x8xf32> -> vector<8x8xf32>
    %cst_38 = arith.constant dense<0xFF800000> : vector<8xf32>
    %101 = vector.multi_reduction <maximumf>, %100, %cst_38 [1] : vector<8x8xf32> to vector<8xf32>
    %102 = vector.shape_cast %101 : vector<8xf32> to vector<8x1xf32>
    %103 = vector.broadcast %102 : vector<8x1xf32> to vector<8x8xf32>
    %104 = arith.subf %100, %103 : vector<8x8xf32>
    %105 = math.exp %104 : vector<8x8xf32>
    %cst_39 = arith.constant dense<0.000000e+00> : vector<8xf32>
    %106 = vector.multi_reduction <add>, %105, %cst_39 [1] : vector<8x8xf32> to vector<8xf32>
    %107 = vector.shape_cast %106 : vector<8xf32> to vector<8x1xf32>
    %108 = tpu.reciprocal %107 {approx = true} : vector<8x1xf32> -> vector<8x1xf32>
    %109 = vector.broadcast %108 : vector<8x1xf32> to vector<8x8xf32>
    %110 = arith.mulf %105, %109 : vector<8x8xf32>
    %111 = arith.truncf %110 : vector<8x8xf32> to vector<8x8xbf16>
    %112 = arith.truncf %97 : vector<8x384xf32> to vector<8x384xbf16>
    %cst_40 = arith.constant dense<0.000000e+00> : vector<8x384xf32>
    %113 = tpu.matmul %111, %112, %cst_40 {dimension_numbers = #tpu.dot_dimension_numbers<[1], [0], [0], [1], [0, 0, 1, 1], [], []>} : vector<8x8xbf16>, vector<8x384xbf16>, vector<8x384xf32> -> vector<8x384xf32>
    %114 = arith.addf %113, %88 : vector<8x384xf32>
    %cst_41 = arith.constant dense<0.000000e+00> : vector<8xf32>
    %115 = vector.multi_reduction <add>, %114, %cst_41 [1] : vector<8x384xf32> to vector<8xf32>
    %116 = vector.shape_cast %115 : vector<8xf32> to vector<8x1xf32>
    %cst_42 = arith.constant 0.00333333341 : f32
    %117 = vector.broadcast %cst_42 : f32 to vector<8x1xf32>
    %118 = arith.mulf %116, %117 : vector<8x1xf32>
    %119 = vector.broadcast %118 : vector<8x1xf32> to vector<8x384xf32>
    %120 = arith.subf %114, %119 : vector<8x384xf32>
    %121 = arith.mulf %120, %120 : vector<8x384xf32>
    %cst_43 = arith.constant dense<0.000000e+00> : vector<8xf32>
    %122 = vector.multi_reduction <add>, %121, %cst_43 [1] : vector<8x384xf32> to vector<8xf32>
    %123 = vector.shape_cast %122 : vector<8xf32> to vector<8x1xf32>
    %cst_44 = arith.constant 8.400000e+01 : f32
    %124 = vector.broadcast %cst_44 : f32 to vector<8x1xf32>
    %125 = arith.mulf %124, %118 : vector<8x1xf32>
    %126 = arith.mulf %125, %118 : vector<8x1xf32>
    %127 = arith.subf %123, %126 : vector<8x1xf32>
    %cst_45 = arith.constant 0.00333333341 : f32
    %128 = vector.broadcast %cst_45 : f32 to vector<8x1xf32>
    %129 = arith.mulf %127, %128 : vector<8x1xf32>
    %cst_46 = arith.constant 9.99999974E-6 : f32
    %130 = vector.broadcast %cst_46 : f32 to vector<8x1xf32>
    %131 = arith.addf %129, %130 : vector<8x1xf32>
    %132 = math.rsqrt %131 : vector<8x1xf32>
    %133 = vector.broadcast %132 : vector<8x1xf32> to vector<8x384xf32>
    %134 = arith.mulf %120, %133 : vector<8x384xf32>
    %135 = vector.broadcast %6 : vector<1x384xf32> to vector<8x384xf32>
    %136 = arith.mulf %134, %135 : vector<8x384xf32>
    %137 = vector.broadcast %7 : vector<1x384xf32> to vector<8x384xf32>
    %138 = arith.addf %136, %137 : vector<8x384xf32>
    %139 = arith.truncf %138 : vector<8x384xf32> to vector<8x384xbf16>
    %cst_47 = arith.constant dense<0.000000e+00> : vector<8x384xf32>
    %140 = tpu.matmul %139, %2, %cst_47 {dimension_numbers = #tpu.dot_dimension_numbers<[1], [0], [0], [1], [0, 0, 1, 1], [], []>} : vector<8x384xbf16>, vector<384x384xbf16>, vector<8x384xf32> -> vector<8x384xf32>
    %141 = vector.broadcast %5 : vector<1x384xf32> to vector<8x384xf32>
    %142 = arith.addf %140, %141 : vector<8x384xf32>
    %143 = arith.addf %142, %0 : vector<8x384xf32>
    %cst_48 = arith.constant dense<0.000000e+00> : vector<8xf32>
    %144 = vector.multi_reduction <add>, %143, %cst_48 [1] : vector<8x384xf32> to vector<8xf32>
    %145 = vector.shape_cast %144 : vector<8xf32> to vector<8x1xf32>
    %cst_49 = arith.constant 0.00333333341 : f32
    %146 = vector.broadcast %cst_49 : f32 to vector<8x1xf32>
    %147 = arith.mulf %145, %146 : vector<8x1xf32>
    %148 = vector.broadcast %147 : vector<8x1xf32> to vector<8x384xf32>
    %149 = arith.subf %143, %148 : vector<8x384xf32>
    %150 = arith.mulf %149, %149 : vector<8x384xf32>
    %cst_50 = arith.constant dense<0.000000e+00> : vector<8xf32>
    %151 = vector.multi_reduction <add>, %150, %cst_50 [1] : vector<8x384xf32> to vector<8xf32>
    %152 = vector.shape_cast %151 : vector<8xf32> to vector<8x1xf32>
    %cst_51 = arith.constant 8.400000e+01 : f32
    %153 = vector.broadcast %cst_51 : f32 to vector<8x1xf32>
    %154 = arith.mulf %153, %147 : vector<8x1xf32>
    %155 = arith.mulf %154, %147 : vector<8x1xf32>
    %156 = arith.subf %152, %155 : vector<8x1xf32>
    %cst_52 = arith.constant 0.00333333341 : f32
    %157 = vector.broadcast %cst_52 : f32 to vector<8x1xf32>
    %158 = arith.mulf %156, %157 : vector<8x1xf32>
    %cst_53 = arith.constant 9.99999974E-6 : f32
    %159 = vector.broadcast %cst_53 : f32 to vector<8x1xf32>
    %160 = arith.addf %158, %159 : vector<8x1xf32>
    %161 = math.rsqrt %160 : vector<8x1xf32>
    %162 = vector.broadcast %161 : vector<8x1xf32> to vector<8x384xf32>
    %163 = arith.mulf %149, %162 : vector<8x384xf32>
    %164 = vector.broadcast %8 : vector<1x384xf32> to vector<8x384xf32>
    %165 = arith.mulf %163, %164 : vector<8x384xf32>
    %166 = vector.broadcast %9 : vector<1x384xf32> to vector<8x384xf32>
    %167 = arith.addf %165, %166 : vector<8x384xf32>
    %168 = arith.truncf %167 : vector<8x384xf32> to vector<8x384xbf16>
    %cst_54 = arith.constant dense<0.000000e+00> : vector<8x1152xf32>
    %169 = tpu.matmul %168, %1, %cst_54 {dimension_numbers = #tpu.dot_dimension_numbers<[1], [0], [0], [1], [0, 0, 1, 1], [], []>} : vector<8x384xbf16>, vector<384x1152xbf16>, vector<8x1152xf32> -> vector<8x1152xf32>
    %170 = vector.extract_strided_slice %169 {offsets = [0, 0], sizes = [8, 384], strides = [1, 1]} : vector<8x1152xf32> to vector<8x384xf32>
    %171 = vector.broadcast %3 : vector<1x384xf32> to vector<8x384xf32>
    %172 = arith.addf %170, %171 : vector<8x384xf32>
    %173 = vector.extract_strided_slice %169 {offsets = [0, 384], sizes = [8, 384], strides = [1, 1]} : vector<8x1152xf32> to vector<8x384xf32>
    %174 = vector.extract_strided_slice %169 {offsets = [0, 768], sizes = [8, 384], strides = [1, 1]} : vector<8x1152xf32> to vector<8x384xf32>
    %175 = vector.broadcast %4 : vector<1x384xf32> to vector<8x384xf32>
    %176 = arith.addf %174, %175 : vector<8x384xf32>
    %177 = arith.truncf %172 : vector<8x384xf32> to vector<8x384xbf16>
    %178 = arith.truncf %173 : vector<8x384xf32> to vector<8x384xbf16>
    %cst_55 = arith.constant dense<0.000000e+00> : vector<8x8xf32>
    %179 = tpu.matmul %177, %178, %cst_55 {dimension_numbers = #tpu.dot_dimension_numbers<[1], [1], [0], [0], [0, 0, 1, 0], [], []>} : vector<8x384xbf16>, vector<8x384xbf16>, vector<8x8xf32> -> vector<8x8xf32>
    %cst_56 = arith.constant dense<0xFF800000> : vector<8xf32>
    %180 = vector.multi_reduction <maximumf>, %179, %cst_56 [1] : vector<8x8xf32> to vector<8xf32>
    %181 = vector.shape_cast %180 : vector<8xf32> to vector<8x1xf32>
    %182 = vector.broadcast %181 : vector<8x1xf32> to vector<8x8xf32>
    %183 = arith.subf %179, %182 : vector<8x8xf32>
    %184 = math.exp %183 : vector<8x8xf32>
    %cst_57 = arith.constant dense<0.000000e+00> : vector<8xf32>
    %185 = vector.multi_reduction <add>, %184, %cst_57 [1] : vector<8x8xf32> to vector<8xf32>
    %186 = vector.shape_cast %185 : vector<8xf32> to vector<8x1xf32>
    %187 = tpu.reciprocal %186 {approx = true} : vector<8x1xf32> -> vector<8x1xf32>
    %188 = vector.broadcast %187 : vector<8x1xf32> to vector<8x8xf32>
    %189 = arith.mulf %184, %188 : vector<8x8xf32>
    %190 = arith.truncf %189 : vector<8x8xf32> to vector<8x8xbf16>
    %191 = arith.truncf %176 : vector<8x384xf32> to vector<8x384xbf16>
    %cst_58 = arith.constant dense<0.000000e+00> : vector<8x384xf32>
    %192 = tpu.matmul %190, %191, %cst_58 {dimension_numbers = #tpu.dot_dimension_numbers<[1], [0], [0], [1], [0, 0, 1, 1], [], []>} : vector<8x8xbf16>, vector<8x384xbf16>, vector<8x384xf32> -> vector<8x384xf32>
    %193 = arith.addf %192, %167 : vector<8x384xf32>
    %cst_59 = arith.constant dense<0.000000e+00> : vector<8xf32>
    %194 = vector.multi_reduction <add>, %193, %cst_59 [1] : vector<8x384xf32> to vector<8xf32>
    %195 = vector.shape_cast %194 : vector<8xf32> to vector<8x1xf32>
    %cst_60 = arith.constant 0.00333333341 : f32
    %196 = vector.broadcast %cst_60 : f32 to vector<8x1xf32>
    %197 = arith.mulf %195, %196 : vector<8x1xf32>
    %198 = vector.broadcast %197 : vector<8x1xf32> to vector<8x384xf32>
    %199 = arith.subf %193, %198 : vector<8x384xf32>
    %200 = arith.mulf %199, %199 : vector<8x384xf32>
    %cst_61 = arith.constant dense<0.000000e+00> : vector<8xf32>
    %201 = vector.multi_reduction <add>, %200, %cst_61 [1] : vector<8x384xf32> to vector<8xf32>
    %202 = vector.shape_cast %201 : vector<8xf32> to vector<8x1xf32>
    %cst_62 = arith.constant 8.400000e+01 : f32
    %203 = vector.broadcast %cst_62 : f32 to vector<8x1xf32>
    %204 = arith.mulf %203, %197 : vector<8x1xf32>
    %205 = arith.mulf %204, %197 : vector<8x1xf32>
    %206 = arith.subf %202, %205 : vector<8x1xf32>
    %cst_63 = arith.constant 0.00333333341 : f32
    %207 = vector.broadcast %cst_63 : f32 to vector<8x1xf32>
    %208 = arith.mulf %206, %207 : vector<8x1xf32>
    %cst_64 = arith.constant 9.99999974E-6 : f32
    %209 = vector.broadcast %cst_64 : f32 to vector<8x1xf32>
    %210 = arith.addf %208, %209 : vector<8x1xf32>
    %211 = math.rsqrt %210 : vector<8x1xf32>
    %212 = vector.broadcast %211 : vector<8x1xf32> to vector<8x384xf32>
    %213 = arith.mulf %199, %212 : vector<8x384xf32>
    %214 = vector.broadcast %6 : vector<1x384xf32> to vector<8x384xf32>
    %215 = arith.mulf %213, %214 : vector<8x384xf32>
    %216 = vector.broadcast %7 : vector<1x384xf32> to vector<8x384xf32>
    %217 = arith.addf %215, %216 : vector<8x384xf32>
    %218 = arith.truncf %217 : vector<8x384xf32> to vector<8x384xbf16>
    %cst_65 = arith.constant dense<0.000000e+00> : vector<8x384xf32>
    %219 = tpu.matmul %218, %2, %cst_65 {dimension_numbers = #tpu.dot_dimension_numbers<[1], [0], [0], [1], [0, 0, 1, 1], [], []>} : vector<8x384xbf16>, vector<384x384xbf16>, vector<8x384xf32> -> vector<8x384xf32>
    %220 = vector.broadcast %5 : vector<1x384xf32> to vector<8x384xf32>
    %221 = arith.addf %219, %220 : vector<8x384xf32>
    %222 = arith.addf %221, %0 : vector<8x384xf32>
    %cst_66 = arith.constant dense<0.000000e+00> : vector<8xf32>
    %223 = vector.multi_reduction <add>, %222, %cst_66 [1] : vector<8x384xf32> to vector<8xf32>
    %224 = vector.shape_cast %223 : vector<8xf32> to vector<8x1xf32>
    %cst_67 = arith.constant 0.00333333341 : f32
    %225 = vector.broadcast %cst_67 : f32 to vector<8x1xf32>
    %226 = arith.mulf %224, %225 : vector<8x1xf32>
    %227 = vector.broadcast %226 : vector<8x1xf32> to vector<8x384xf32>
    %228 = arith.subf %222, %227 : vector<8x384xf32>
    %229 = arith.mulf %228, %228 : vector<8x384xf32>
    %cst_68 = arith.constant dense<0.000000e+00> : vector<8xf32>
    %230 = vector.multi_reduction <add>, %229, %cst_68 [1] : vector<8x384xf32> to vector<8xf32>
    %231 = vector.shape_cast %230 : vector<8xf32> to vector<8x1xf32>
    %cst_69 = arith.constant 8.400000e+01 : f32
    %232 = vector.broadcast %cst_69 : f32 to vector<8x1xf32>
    %233 = arith.mulf %232, %226 : vector<8x1xf32>
    %234 = arith.mulf %233, %226 : vector<8x1xf32>
    %235 = arith.subf %231, %234 : vector<8x1xf32>
    %cst_70 = arith.constant 0.00333333341 : f32
    %236 = vector.broadcast %cst_70 : f32 to vector<8x1xf32>
    %237 = arith.mulf %235, %236 : vector<8x1xf32>
    %cst_71 = arith.constant 9.99999974E-6 : f32
    %238 = vector.broadcast %cst_71 : f32 to vector<8x1xf32>
    %239 = arith.addf %237, %238 : vector<8x1xf32>
    %240 = math.rsqrt %239 : vector<8x1xf32>
    %241 = vector.broadcast %240 : vector<8x1xf32> to vector<8x384xf32>
    %242 = arith.mulf %228, %241 : vector<8x384xf32>
    %243 = vector.broadcast %8 : vector<1x384xf32> to vector<8x384xf32>
    %244 = arith.mulf %242, %243 : vector<8x384xf32>
    %245 = vector.broadcast %9 : vector<1x384xf32> to vector<8x384xf32>
    %246 = arith.addf %244, %245 : vector<8x384xf32>
    %c0_72 = arith.constant 0 : index
    %c0_73 = arith.constant 0 : index
    %247 = vector.load %arg10[%c0_72, %c0_73] : memref<8x384xf32, #tpu.memory_space<vmem>>, vector<8x384xf32>
    tpu.vector_store %arg10[%c0_72, %c0_73], %246 {strides = array<i32>} : memref<8x384xf32, #tpu.memory_space<vmem>>, vector<8x384xf32>,
    return
  }
}

</mosaic_0001>

<bundles_post_ra>
// kernel: _multihead_forward_impl.1
= control target key start
LH: loop header
LB: loop body
LE: loop exit
PB: predicated region body
PF: predicated region fallthrough
CT: control target
= control target key end

     0   :  { %15 = vsyncpa [#allocation3], 0  ;;  %s6950_s0 = inlined_call_operand.vmem [shape: f32[8,384], index: 0, kind: input, shape index: {}]   ;;  %s6951_s1 = inlined_call_operand.hbm [shape: bf16[384,1152], index: 1, kind: input, shape index: {}]   ;;  %s6952_s2 = inlined_call_operand.vmem [shape: f32[1,384], index: 2, kind: input, shape index: {}]   ;;  %s6953_s3 = inlined_call_operand.vmem [shape: f32[1,384], index: 3, kind: input, shape index: {}]   ;;  %s6954_s4 = inlined_call_operand.vmem [shape: f32[1,384], index: 4, kind: input, shape index: {}]   ;;  %s6955_s5 = inlined_call_operand.vmem [shape: f32[1,384], index: 5, kind: input, shape index: {}]   ;;  %s6956_s6 = inlined_call_operand.hbm [shape: bf16[384,384], index: 6, kind: input, shape index: {}]   ;;  %s6957_s7 = inlined_call_operand.vmem [shape: f32[1,384], index: 7, kind: input, shape index: {}]   ;;  %s6958_s8 = inlined_call_operand.vmem [shape: f32[1,384], index: 8, kind: input, shape index: {}]   ;;  %s6959_s9 = inlined_call_operand.vmem [shape: f32[1,384], index: 9, kind: input, shape index: {}]   ;;  %s6960_s10 = inlined_call_operand.hbm [shape: f32[8,384], index: 10, kind: output, shape index: {}]  }
   0x1   :  { %16 = vsyncpa [#allocation6], 0 }
   0x2   :  { %17 = vsyncpa [#allocation4], 0  ;;  %s6292_s13 = smov [#allocation2]   ;;  %s6220_s17 = scalar_lea.hbm %s6951_s1, 27648 }
   0x3   :  { %s25_s14 = sshll.u32 %s6292_s13, 4  ;;  %p6221_p0 = scmp.ne.s32.totalorder %s6951_s1, %s6220_s17  ;;  %s26_s14 = int_to_ptr.vmem [resolvable:$true] %s25_s14 }
   0x4   :  { %p6224_p1 = scmp.lt.u32.totalorder %s6220_s17, %s6951_s1 }
   0x6   :  { %p6226_p2 = pnand %p6224_p1, %p6221_p0 }
   0x8   :  { %6229 = shalt.err (!%p6226_p2)
}
   0x9   :  { %s6230_s22 = scalar_lea.vmem %s26_s14, 27648  ;;  %p6235_p4 = scmp.lt.s32.totalorder %s26_s14, %s26_s14 }
   0xa   :  { %p6231_p3 = scmp.ne.s32.totalorder %s26_s14, %s6230_s22  ;;  %p6236_p5 = scmp.lt.s32.totalorder %s6230_s22, %s6230_s22 }
   0xc   :  { %p6237_p6 = por %p6236_p5, %p6235_p4 }
   0xe   :  { %p6238_p7 = pnand %p6237_p6, %p6231_p3 }
  0x10   :  { %6241 = shalt.err (!%p6238_p7)
}
  0x11   :  { %s6293_s23 = smov 576   ;;  %s6294_s24 = smov 36  }
  0x12   :  { %31 = dma.hbm_to_vmem [thread:$0]  %s6951_s1, 27648, %s26_s14, [#allocation3], %s6293_s23, %s6293_s23, %s6294_s24  }
  0x13   :  { %s6295_s27 = smov [#allocation5]   ;;  %s6242_s11 = scalar_lea.hbm %s6956_s6, 9216 }
  0x14   :  { %s45_s28 = sshll.u32 %s6295_s27, 4  ;;  %p6243_p8 = scmp.ne.s32.totalorder %s6956_s6, %s6242_s11  ;;  %s46_s28 = int_to_ptr.vmem [resolvable:$true] %s45_s28 }
  0x15   :  { %p6246_p9 = scmp.lt.u32.totalorder %s6242_s11, %s6956_s6 }
  0x17   :  { %p6248_p10 = pnand %p6246_p9, %p6243_p8 }
  0x19   :  { %6251 = shalt.err (!%p6248_p10)
}
  0x1a   :  { %s6252_s17 = scalar_lea.vmem %s46_s28, 9216  ;;  %p6257_p12 = scmp.lt.s32.totalorder %s46_s28, %s46_s28 }
  0x1b   :  { %p6253_p11 = scmp.ne.s32.totalorder %s46_s28, %s6252_s17  ;;  %p6258_p13 = scmp.lt.s32.totalorder %s6252_s17, %s6252_s17 }
  0x1d   :  { %p6259_p0 = por %p6258_p13, %p6257_p12 }
  0x1f   :  { %p6260_p1 = pnand %p6259_p0, %p6253_p11 }
  0x21   :  { %6263 = shalt.err (!%p6260_p1)
}
  0x22   :  { %s6296_s1 = smov 192   ;;  %s6297_s14 = smov 12  }
  0x23   :  { %51 = dma.hbm_to_vmem [thread:$0]  %s6956_s6, 9216, %s46_s28, [#allocation6], %s6296_s1, %s6296_s1, %s6297_s14  }
  0x24   :  { %6286 = dma.done.wait [#allocation3], 27648  }
  0x25   :  { %6287 = vsyncadd [#allocation3], 4294939648 }
  0x26   :  { %6288 = dma.done.wait [#allocation6], 9216  }
  0x27   :  { %6289 = vsyncadd [#allocation6], 4294958080  ;;  %v6963_v0 = vmov 0   ;;  %v5234_v1 = vld [vmem:[#allocation2 + $0x4] ss:$36 sps:$4 sm:$0xff]   ;;  %v67_v33 = vld [vmem:[%s6950_s0 + $0x10] sm:$0xff] }
  0x28   :  { %1591 = vmatprep.mubr.bf16.mxu1 %v6963_v0  ;;  %v5236_v2 = vld [vmem:[#allocation2 + $0x484] ss:$36 sps:$4 sm:$0xff]   ;;  %1518 = vmatprep.subr.bf16.mxu0 %v5234_v1  ;;  %v5240_v5 = vld [vmem:[#allocation2 + $0x4c] ss:$36 sps:$4 sm:$0xff]   ;;  %v5246_v9 = vld [vmem:[#allocation2 + $0x94] ss:$36 sps:$4 sm:$0xff]   ;;  %v6385_v38 = vpack.c.bf16 %v67_v33, %v67_v33 }
  0x29   :  { %v5238_v3 = vld [vmem:[#allocation2] ss:$36 sps:$4 sm:$0xff]   ;;  %1559 = vmatprep.subr.bf16.mxu1 %v5236_v2  ;;  %v5242_v6 = vld [vmem:[#allocation2 + $0x4cc] ss:$36 sps:$4 sm:$0xff]   ;;  %v5248_v10 = vld [vmem:[#allocation2 + $0x514] ss:$36 sps:$4 sm:$0xff]  }
  0x2a   :  { %v5239_v4 = vld [vmem:[#allocation2 + $0x480] ss:$36 sps:$4 sm:$0xff]   ;;  %1519 = vmatpush1.bf16.msra.mxu0 %v5238_v3  ;;  %v5244_v7 = vld [vmem:[#allocation2 + $0x48] ss:$36 sps:$4 sm:$0xff]   ;;  %v5250_v11 = vld [vmem:[#allocation2 + $0x90] ss:$36 sps:$4 sm:$0xff]  }
  0x2b   :  { %1560 = vmatpush1.bf16.msra.mxu1 %v5239_v4  ;;  %1520 = vmatprep.subr.bf16.mxu0 %v5240_v5  ;;  %v5245_v8 = vld [vmem:[#allocation2 + $0x4c8] ss:$36 sps:$4 sm:$0xff]   ;;  %v5251_v12 = vld [vmem:[#allocation2 + $0x510] ss:$36 sps:$4 sm:$0xff]   ;;  %v5252_v13 = vld [vmem:[#allocation2 + $0xdc] ss:$36 sps:$4 sm:$0xff]  }
  0x2c   :  { %1561 = vmatprep.subr.bf16.mxu1 %v5242_v6  ;;  %v5254_v14 = vld [vmem:[#allocation2 + $0x55c] ss:$36 sps:$4 sm:$0xff]   ;;  %v5258_v17 = vld [vmem:[#allocation2 + $0x124] ss:$36 sps:$4 sm:$0xff]   ;;  %v5264_v21 = vld [vmem:[#allocation2 + $0x16c] ss:$36 sps:$4 sm:$0xff]  }
  0x2d   :  { %v5256_v15 = vld [vmem:[#allocation2 + $0xd8] ss:$36 sps:$4 sm:$0xff]   ;;  %v5260_v18 = vld [vmem:[#allocation2 + $0x5a4] ss:$36 sps:$4 sm:$0xff]   ;;  %v5266_v22 = vld [vmem:[#allocation2 + $0x5ec] ss:$36 sps:$4 sm:$0xff]  }
  0x2e   :  { %1521 = vmatpush1.bf16.msra.mxu0 %v5244_v7  ;;  %v5257_v16 = vld [vmem:[#allocation2 + $0x558] ss:$36 sps:$4 sm:$0xff]   ;;  %v5262_v19 = vld [vmem:[#allocation2 + $0x120] ss:$36 sps:$4 sm:$0xff]   ;;  %v5268_v23 = vld [vmem:[#allocation2 + $0x168] ss:$36 sps:$4 sm:$0xff]  }
  0x2f   :  { %1562 = vmatpush1.bf16.msra.mxu1 %v5245_v8  ;;  %1522 = vmatprep.subr.bf16.mxu0 %v5246_v9  ;;  %v5263_v20 = vld [vmem:[#allocation2 + $0x5a0] ss:$36 sps:$4 sm:$0xff]   ;;  %v5269_v24 = vld [vmem:[#allocation2 + $0x5e8] ss:$36 sps:$4 sm:$0xff]   ;;  %v5270_v25 = vld [vmem:[#allocation2 + $0x1b4] ss:$36 sps:$4 sm:$0xff]  }
  0x30   :  { %1563 = vmatprep.subr.bf16.mxu1 %v5248_v10  ;;  %v5272_v26 = vld [vmem:[#allocation2 + $0x634] ss:$36 sps:$4 sm:$0xff]   ;;  %v5276_v29 = vld [vmem:[#allocation2 + $0x1fc] ss:$36 sps:$4 sm:$0xff]   ;;  %v5282_v34 = vld [vmem:[#allocation2 + $0x244] ss:$36 sps:$4 sm:$0xff]  }
  0x31   :  { %v5274_v27 = vld [vmem:[#allocation2 + $0x1b0] ss:$36 sps:$4 sm:$0xff]   ;;  %v5278_v30 = vld [vmem:[#allocation2 + $0x67c] ss:$36 sps:$4 sm:$0xff]   ;;  %v5284_v36 = vld [vmem:[#allocation2 + $0x8] ss:$36 sps:$4 sm:$0xff]  }
  0x32   :  { %1523 = vmatpush1.bf16.msra.mxu0 %v5250_v11  ;;  %v5275_v28 = vld [vmem:[#allocation2 + $0x630] ss:$36 sps:$4 sm:$0xff]   ;;  %v5280_v31 = vld [vmem:[#allocation2 + $0x1f8] ss:$36 sps:$4 sm:$0xff]   ;;  %v5287_v37 = vld [vmem:[#allocation2 + $0x240] ss:$36 sps:$4 sm:$0xff]  }
  0x33   :  { %1564 = vmatpush1.bf16.msra.mxu1 %v5251_v12  ;;  %1524 = vmatprep.subr.bf16.mxu0 %v5252_v13  ;;  %v5281_v32 = vld [vmem:[#allocation2 + $0x678] ss:$36 sps:$4 sm:$0xff]   ;;  %v5286_v35 = vld [vmem:[#allocation2 + $0xc] ss:$36 sps:$4 sm:$0xff]   ;;  %v5304_v48 = vld [vmem:[#allocation2 + $0xe4] ss:$36 sps:$4 sm:$0xff]  }
  0x34   :  { %1565 = vmatprep.subr.bf16.mxu1 %v5254_v14  ;;  %v5288_v39 = vld [vmem:[#allocation2 + $0x28c] ss:$36 sps:$4 sm:$0xff]   ;;  %v5292_v40 = vld [vmem:[#allocation2 + $0x54] ss:$36 sps:$4 sm:$0xff]   ;;  %v5298_v44 = vld [vmem:[#allocation2 + $0x9c] ss:$36 sps:$4 sm:$0xff]  }
  0x35   :  { %v5290_v41 = vld [vmem:[#allocation2 + $0x50] ss:$36 sps:$4 sm:$0xff]   ;;  %v5293_v42 = vld [vmem:[#allocation2 + $0x288] ss:$36 sps:$4 sm:$0xff]   ;;  %v5296_v45 = vld [vmem:[#allocation2 + $0x98] ss:$36 sps:$4 sm:$0xff]  }
  0x36   :  { %1525 = vmatpush1.bf16.msra.mxu0 %v5256_v15  ;;  %v5294_v43 = vld [vmem:[#allocation2 + $0x2d4] ss:$36 sps:$4 sm:$0xff]   ;;  %v5300_v47 = vld [vmem:[#allocation2 + $0x31c] ss:$36 sps:$4 sm:$0xff]   ;;  %v66_v50 = vld [vmem:[%s6950_s0 + $0x8] sm:$0xff]  ;;  %vm6300_vm0 = vmmov 0  }
  0x37   :  { %1566 = vmatpush1.bf16.msra.mxu1 %v5257_v16  ;;  %1526 = vmatprep.subr.bf16.mxu0 %v5258_v17  ;;  %v5299_v46 = vld [vmem:[#allocation2 + $0x2d0] ss:$36 sps:$4 sm:$0xff]   ;;  %v5302_v49 = vld [vmem:[#allocation2 + $0xe0] ss:$36 sps:$4 sm:$0xff]   ;;  %v5305_v51 = vld [vmem:[#allocation2 + $0x318] ss:$36 sps:$4 sm:$0xff]   ;;  %v6391_v53 = vpack.c.bf16 %v66_v50, %v66_v50 }
  0x38   :  { %1567 = vmatprep.subr.bf16.mxu1 %v5260_v18  ;;  %v5306_v52 = vld [vmem:[#allocation2 + $0x364] ss:$36 sps:$4 sm:$0xff]   ;;  %v5310_v54 = vld [vmem:[#allocation2 + $0x12c] ss:$36 sps:$4 sm:$0xff]   ;;  %v5316_v58 = vld [vmem:[#allocation2 + $0x174] ss:$36 sps:$4 sm:$0xff]  }
  0x39   :  { %1550 = vmatprep.mubr.bf16.mxu0 %v6391_v53  ;;  %v5308_v55 = vld [vmem:[#allocation2 + $0x128] ss:$36 sps:$4 sm:$0xff]   ;;  %v5311_v56 = vld [vmem:[#allocation2 + $0x360] ss:$36 sps:$4 sm:$0xff]   ;;  %v5314_v59 = vld [vmem:[#allocation2 + $0x170] ss:$36 sps:$4 sm:$0xff]  }
  0x3a   :  { %1527 = vmatpush1.bf16.msra.mxu0 %v5262_v19  ;;  %v5312_v57 = vld [vmem:[#allocation2 + $0x3ac] ss:$36 sps:$4 sm:$0xff]   ;;  %v5318_v61 = vld [vmem:[#allocation2 + $0x3f4] ss:$36 sps:$4 sm:$0xff]   ;;  %v5322_v62 = vld [vmem:[#allocation2 + $0x1bc] ss:$36 sps:$4 sm:$0xff]  }
  0x3b   :  { %1568 = vmatpush1.bf16.msra.mxu1 %v5263_v20  ;;  %1528 = vmatprep.subr.bf16.mxu0 %v5264_v21  ;;  %v5317_v60 = vld [vmem:[#allocation2 + $0x3a8] ss:$36 sps:$4 sm:$0xff]   ;;  %v5320_v63 = vld [vmem:[#allocation2 + $0x1b8] ss:$36 sps:$4 sm:$0xff]   ;;  %v5323_v1 = vld [vmem:[#allocation2 + $0x3f0] ss:$36 sps:$4 sm:$0xff]  }
  0x3c   :  { %1569 = vmatprep.subr.bf16.mxu1 %v5266_v22  ;;  %v5324_v2 = vld [vmem:[#allocation2 + $0x43c] ss:$36 sps:$4 sm:$0xff]   ;;  %v5328_v3 = vld [vmem:[#allocation2 + $0x204] ss:$36 sps:$4 sm:$0xff]   ;;  %v5332_v7 = vld [vmem:[#allocation2 + $0x24c] ss:$36 sps:$4 sm:$0xff]  }
  0x3d   :  { %v5326_v4 = vld [vmem:[#allocation2 + $0x200] ss:$36 sps:$4 sm:$0xff]   ;;  %v5329_v5 = vld [vmem:[#allocation2 + $0x438] ss:$36 sps:$4 sm:$0xff]   ;;  %v5335_v8 = vld [vmem:[#allocation2 + $0x48c] ss:$36 sps:$4 sm:$0xff]  }
  0x3e   :  { %1529 = vmatpush1.bf16.msra.mxu0 %v5268_v23  ;;  %v65_v6 = vld [vmem:[%s6950_s0] sm:$0xff]  ;;  %v5330_v10 = vld [vmem:[#allocation2 + $0x248] ss:$36 sps:$4 sm:$0xff]   ;;  %v5338_v12 = vld [vmem:[#allocation2 + $0x294] ss:$36 sps:$4 sm:$0xff]   ;;  %vm2069_vm1 = vcmask 1043456  }
  0x3f   :  { %1570 = vmatpush1.bf16.msra.mxu1 %v5269_v24  ;;  %1530 = vmatprep.subr.bf16.mxu0 %v5270_v25  ;;  %v6398_v9 = vpack.c.bf16 %v65_v6, %v65_v6  ;;  %v5333_v11 = vld [vmem:[#allocation2 + $0x488] ss:$36 sps:$4 sm:$0xff]   ;;  %v5341_v13 = vld [vmem:[#allocation2 + $0x4d4] ss:$36 sps:$4 sm:$0xff]   ;;  %v5344_v16 = vld [vmem:[#allocation2 + $0x2dc] ss:$36 sps:$4 sm:$0xff]  }
  0x40   :  { %1571 = vmatprep.subr.bf16.mxu1 %v5272_v26  ;;  %v5336_v14 = vld [vmem:[#allocation2 + $0x290] ss:$36 sps:$4 sm:$0xff]   ;;  %v5347_v17 = vld [vmem:[#allocation2 + $0x51c] ss:$36 sps:$4 sm:$0xff]   ;;  %v5350_v20 = vld [vmem:[#allocation2 + $0x324] ss:$36 sps:$4 sm:$0xff]  }
  0x41   :  { %v5339_v15 = vld [vmem:[#allocation2 + $0x4d0] ss:$36 sps:$4 sm:$0xff]   ;;  %v5342_v18 = vld [vmem:[#allocation2 + $0x2d8] ss:$36 sps:$4 sm:$0xff]   ;;  %v5353_v21 = vld [vmem:[#allocation2 + $0x564] ss:$36 sps:$4 sm:$0xff]  }
  0x42   :  { %1531 = vmatpush1.bf16.msra.mxu0 %v5274_v27  ;;  %v5345_v19 = vld [vmem:[#allocation2 + $0x518] ss:$36 sps:$4 sm:$0xff]   ;;  %v5348_v22 = vld [vmem:[#allocation2 + $0x320] ss:$36 sps:$4 sm:$0xff]   ;;  %v5356_v24 = vld [vmem:[#allocation2 + $0x36c] ss:$36 sps:$4 sm:$0xff]  }
  0x43   :  { %1572 = vmatpush1.bf16.msra.mxu1 %v5275_v28  ;;  %1532 = vmatprep.subr.bf16.mxu0 %v5276_v29  ;;  %v5351_v23 = vld [vmem:[#allocation2 + $0x560] ss:$36 sps:$4 sm:$0xff]   ;;  %v5359_v25 = vld [vmem:[#allocation2 + $0x5ac] ss:$36 sps:$4 sm:$0xff]   ;;  %v5362_v28 = vld [vmem:[#allocation2 + $0x3b4] ss:$36 sps:$4 sm:$0xff]  }
  0x44   :  { %1573 = vmatprep.subr.bf16.mxu1 %v5278_v30  ;;  %v5354_v26 = vld [vmem:[#allocation2 + $0x368] ss:$36 sps:$4 sm:$0xff]   ;;  %v5365_v29 = vld [vmem:[#allocation2 + $0x5f4] ss:$36 sps:$4 sm:$0xff]   ;;  %v5371_v33 = vld [vmem:[#allocation2 + $0x63c] ss:$36 sps:$4 sm:$0xff]  }
  0x45   :  { %v5357_v27 = vld [vmem:[#allocation2 + $0x5a8] ss:$36 sps:$4 sm:$0xff]   ;;  %v5360_v30 = vld [vmem:[#allocation2 + $0x3b0] ss:$36 sps:$4 sm:$0xff]   ;;  %vm2050_vm2 = vcmask 64512  }
  0x46   :  { %1533 = vmatpush1.bf16.msra.mxu0 %v5280_v31  ;;  %v5363_v31 = vld [vmem:[#allocation2 + $0x5f0] ss:$36 sps:$4 sm:$0xff]  }
  0x47   :  { %1574 = vmatpush1.bf16.msra.mxu1 %v5281_v32  ;;  %1534 = vmatprep.subr.bf16.mxu0 %v5282_v34  ;;  %v5368_v32 = vld [vmem:[#allocation2 + $0x3fc] ss:$36 sps:$4 sm:$0xff]   ;;  %v5437_v50 = vld [vmem:[#allocation2 + $0xac] ss:$36 sps:$4 sm:$0xff]  }
  0x48   :  { %1600 = vmatprep.subr.bf16.mxu1 %v5286_v35  ;;  %v5366_v34 = vld [vmem:[#allocation2 + $0x3f8] ss:$36 sps:$4 sm:$0xff]   ;;  %v5401_v6 = vld [vmem:[#allocation2 + $0x20c] ss:$36 sps:$4 sm:$0xff]  }
  0x49   :  { %v5369_v35 = vld [vmem:[#allocation2 + $0x638] ss:$36 sps:$4 sm:$0xff]  }
  0x4a   :  { %1592 = vmatmul.mubr.bf16.vlgmr.msra.gmra.mrb[0].mxu1 %v6385_v38  ;;  %1535 = vmatpush1.bf16.msra.mxu0 %v5287_v37  ;;  %v5377_v37 = vld [vmem:[#allocation2 + $0x684] ss:$36 sps:$4 sm:$0xff]  }
  0x4b   :  { %1601 = vmatpush1.bf16.msra.mxu1 %v5284_v36  ;;  %1536 = vmatprep.subr.bf16.mxu0 %v5288_v39  ;;  %v5374_v36 = vld [vmem:[#allocation2 + $0x444] ss:$36 sps:$4 sm:$0xff]  }
  0x4c   :  { %1602 = vmatprep.subr.bf16.mxu1 %v5292_v40  ;;  %1632 = vmatprep.mubr.bf16.mxu1 %v6391_v53  ;;  %v5372_v39 = vld [vmem:[#allocation2 + $0x440] ss:$36 sps:$4 sm:$0xff]  }
  0x4d   :  { %v5375_v40 = vld [vmem:[#allocation2 + $0x680] ss:$36 sps:$4 sm:$0xff]  }
  0x4e   :  { %1537 = vmatpush1.bf16.msra.mxu0 %v5293_v42  ;;  %v5425_v42 = vld [vmem:[#allocation2 + $0x1c] ss:$36 sps:$4 sm:$0xff]  }
  0x4f   :  { %1603 = vmatpush1.bf16.msra.mxu1 %v5290_v41  ;;  %1538 = vmatprep.subr.bf16.mxu0 %v5294_v43  ;;  %v5380_v41 = vld [vmem:[#allocation2 + $0x14] ss:$36 sps:$4 sm:$0xff]  }
  0x50   :  { %1604 = vmatprep.subr.bf16.mxu1 %v5298_v44  ;;  %v5378_v43 = vld [vmem:[#allocation2 + $0x10] ss:$36 sps:$4 sm:$0xff]   ;;  %v5383_v44 = vld [vmem:[#allocation2 + $0x5c] ss:$36 sps:$4 sm:$0xff]  }
  0x52   :  { %1539 = vmatpush1.bf16.msra.mxu0 %v5299_v46  ;;  %v5431_v46 = vld [vmem:[#allocation2 + $0x64] ss:$36 sps:$4 sm:$0xff]  }
  0x53   :  { %1605 = vmatpush1.bf16.msra.mxu1 %v5296_v45  ;;  %1540 = vmatprep.subr.bf16.mxu0 %v5300_v47  ;;  %v5423_v45 = vld [vmem:[#allocation2 + $0x18] ss:$36 sps:$4 sm:$0xff]  }
  0x54   :  { %1606 = vmatprep.subr.bf16.mxu1 %v5304_v48  ;;  %v5381_v47 = vld [vmem:[#allocation2 + $0x58] ss:$36 sps:$4 sm:$0xff]   ;;  %v5386_v48 = vld [vmem:[#allocation2 + $0xa4] ss:$36 sps:$4 sm:$0xff]  }
  0x56   :  { %1541 = vmatpush1.bf16.msra.mxu0 %v5305_v51  ;;  %v5384_v51 = vld [vmem:[#allocation2 + $0xa0] ss:$36 sps:$4 sm:$0xff]  }
  0x57   :  { %1607 = vmatpush1.bf16.msra.mxu1 %v5302_v49  ;;  %1542 = vmatprep.subr.bf16.mxu0 %v5306_v52  ;;  %v5429_v49 = vld [vmem:[#allocation2 + $0x60] ss:$36 sps:$4 sm:$0xff]   ;;  %v5389_v52 = vld [vmem:[#allocation2 + $0xec] ss:$36 sps:$4 sm:$0xff]  }
  0x58   :  { %1608 = vmatprep.subr.bf16.mxu1 %v5310_v54  ;;  %v5435_v54 = vld [vmem:[#allocation2 + $0xa8] ss:$36 sps:$4 sm:$0xff]  }
  0x5a   :  { %1543 = vmatpush1.bf16.msra.mxu0 %v5311_v56  ;;  %v5387_v56 = vld [vmem:[#allocation2 + $0xe8] ss:$36 sps:$4 sm:$0xff]  }
  0x5b   :  { %1609 = vmatpush1.bf16.msra.mxu1 %v5308_v55  ;;  %1544 = vmatprep.subr.bf16.mxu0 %v5312_v57  ;;  %v5443_v55 = vld [vmem:[#allocation2 + $0xf4] ss:$36 sps:$4 sm:$0xff]  }
  0x5c   :  { %1610 = vmatprep.subr.bf16.mxu1 %v5316_v58  ;;  %v5392_v57 = vld [vmem:[#allocation2 + $0x134] ss:$36 sps:$4 sm:$0xff]  }
  0x5d   :  { %v5441_v58 = vld [vmem:[#allocation2 + $0xf0] ss:$36 sps:$4 sm:$0xff]  }
  0x5e   :  { %1545 = vmatpush1.bf16.msra.mxu0 %v5317_v60  ;;  %v5390_v60 = vld [vmem:[#allocation2 + $0x130] ss:$36 sps:$4 sm:$0xff]  }
  0x5f   :  { %1611 = vmatpush1.bf16.msra.mxu1 %v5314_v59  ;;  %1546 = vmatprep.subr.bf16.mxu0 %v5318_v61  ;;  %v5449_v59 = vld [vmem:[#allocation2 + $0x13c] ss:$36 sps:$4 sm:$0xff]  }
  0x60   :  { %1612 = vmatprep.subr.bf16.mxu1 %v5322_v62  ;;  %v5395_v61 = vld [vmem:[#allocation2 + $0x17c] ss:$36 sps:$4 sm:$0xff]  }
  0x61   :  { %v5447_v62 = vld [vmem:[#allocation2 + $0x138] ss:$36 sps:$4 sm:$0xff]  }
  0x62   :  { %1547 = vmatpush1.bf16.msra.mxu0 %v5323_v1  ;;  %v5393_v1 = vld [vmem:[#allocation2 + $0x178] ss:$36 sps:$4 sm:$0xff]  }
  0x63   :  { %1613 = vmatpush1.bf16.msra.mxu1 %v5320_v63  ;;  %1548 = vmatprep.subr.bf16.mxu0 %v5324_v2  ;;  %v5455_v63 = vld [vmem:[#allocation2 + $0x184] ss:$36 sps:$4 sm:$0xff]  }
  0x64   :  { %1614 = vmatprep.subr.bf16.mxu1 %v5328_v3  ;;  %v5398_v2 = vld [vmem:[#allocation2 + $0x1c4] ss:$36 sps:$4 sm:$0xff]  }
  0x65   :  { %v5453_v3 = vld [vmem:[#allocation2 + $0x180] ss:$36 sps:$4 sm:$0xff]  }
  0x66   :  { %1549 = vmatpush1.bf16.msra.mxu0 %v5329_v5  ;;  %v5396_v5 = vld [vmem:[#allocation2 + $0x1c0] ss:$36 sps:$4 sm:$0xff]  }
  0x67   :  { %1615 = vmatpush1.bf16.msra.mxu1 %v5326_v4  ;;  %1641 = vmatprep.subr.bf16.mxu0 %v5335_v8  ;;  %v5461_v4 = vld [vmem:[#allocation2 + $0x1cc] ss:$36 sps:$4 sm:$0xff]   ;;  %v5467_v8 = vld [vmem:[#allocation2 + $0x214] ss:$36 sps:$4 sm:$0xff]  }
  0x68   :  { %1616 = vmatprep.subr.bf16.mxu1 %v5332_v7  ;;  %v5459_v7 = vld [vmem:[#allocation2 + $0x1c8] ss:$36 sps:$4 sm:$0xff]  }
  0x69   :  { %1551 = vmatmul.mubr.bf16.vlgmr.msra.gmra.mrb[0].mxu0 %v6398_v9 }
  0x6a   :  { %1642 = vmatpush1.bf16.msra.mxu0 %v5333_v11  ;;  %1673 = vmatprep.mubr.bf16.mxu0 %v6963_v0  ;;  %v5404_v11 = vld [vmem:[#allocation2 + $0x254] ss:$36 sps:$4 sm:$0xff]  }
  0x6b   :  { %1617 = vmatpush1.bf16.msra.mxu1 %v5330_v10  ;;  %1643 = vmatprep.subr.bf16.mxu0 %v5341_v13  ;;  %v5399_v10 = vld [vmem:[#allocation2 + $0x208] ss:$36 sps:$4 sm:$0xff]   ;;  %v5473_v13 = vld [vmem:[#allocation2 + $0x25c] ss:$36 sps:$4 sm:$0xff]  }
  0x6c   :  { %1618 = vmatprep.subr.bf16.mxu1 %v5338_v12  ;;  %v5465_v12 = vld [vmem:[#allocation2 + $0x210] ss:$36 sps:$4 sm:$0xff]  }
  0x6e   :  { %1644 = vmatpush1.bf16.msra.mxu0 %v5339_v15  ;;  %v5407_v15 = vld [vmem:[#allocation2 + $0x29c] ss:$36 sps:$4 sm:$0xff]  }
  0x6f   :  { %1619 = vmatpush1.bf16.msra.mxu1 %v5336_v14  ;;  %1645 = vmatprep.subr.bf16.mxu0 %v5347_v17  ;;  %v5402_v14 = vld [vmem:[#allocation2 + $0x250] ss:$36 sps:$4 sm:$0xff]   ;;  %v5479_v17 = vld [vmem:[#allocation2 + $0x2a4] ss:$36 sps:$4 sm:$0xff]  }
  0x70   :  { %1620 = vmatprep.subr.bf16.mxu1 %v5344_v16  ;;  %v5471_v16 = vld [vmem:[#allocation2 + $0x258] ss:$36 sps:$4 sm:$0xff]  }
  0x72   :  { %1646 = vmatpush1.bf16.msra.mxu0 %v5345_v19  ;;  %v5410_v19 = vld [vmem:[#allocation2 + $0x2e4] ss:$36 sps:$4 sm:$0xff]  }
  0x73   :  { %1621 = vmatpush1.bf16.msra.mxu1 %v5342_v18  ;;  %1647 = vmatprep.subr.bf16.mxu0 %v5353_v21  ;;  %v5405_v18 = vld [vmem:[#allocation2 + $0x298] ss:$36 sps:$4 sm:$0xff]   ;;  %v5482_v21 = vld [vmem:[#allocation2 + $0x2ec] ss:$36 sps:$4 sm:$0xff]  }
  0x74   :  { %1622 = vmatprep.subr.bf16.mxu1 %v5350_v20  ;;  %v5477_v20 = vld [vmem:[#allocation2 + $0x2a0] ss:$36 sps:$4 sm:$0xff]  }
  0x76   :  { %1648 = vmatpush1.bf16.msra.mxu0 %v5351_v23  ;;  %v5480_v23 = vld [vmem:[#allocation2 + $0x2e8] ss:$36 sps:$4 sm:$0xff]  }
  0x77   :  { %1623 = vmatpush1.bf16.msra.mxu1 %v5348_v22  ;;  %1649 = vmatprep.subr.bf16.mxu0 %v5359_v25  ;;  %v5408_v22 = vld [vmem:[#allocation2 + $0x2e0] ss:$36 sps:$4 sm:$0xff]   ;;  %v5485_v25 = vld [vmem:[#allocation2 + $0x334] ss:$36 sps:$4 sm:$0xff]  }
  0x78   :  { %1624 = vmatprep.subr.bf16.mxu1 %v5356_v24  ;;  %v5413_v24 = vld [vmem:[#allocation2 + $0x32c] ss:$36 sps:$4 sm:$0xff]  }
  0x7a   :  { %1650 = vmatpush1.bf16.msra.mxu0 %v5357_v27  ;;  %v5483_v27 = vld [vmem:[#allocation2 + $0x330] ss:$36 sps:$4 sm:$0xff]  }
  0x7b   :  { %1625 = vmatpush1.bf16.msra.mxu1 %v5354_v26  ;;  %1651 = vmatprep.subr.bf16.mxu0 %v5365_v29  ;;  %v5411_v26 = vld [vmem:[#allocation2 + $0x328] ss:$36 sps:$4 sm:$0xff]   ;;  %v5488_v29 = vld [vmem:[#allocation2 + $0x37c] ss:$36 sps:$4 sm:$0xff]  }
  0x7c   :  { %1626 = vmatprep.subr.bf16.mxu1 %v5362_v28  ;;  %v5416_v28 = vld [vmem:[#allocation2 + $0x374] ss:$36 sps:$4 sm:$0xff]  }
  0x7e   :  { %1652 = vmatpush1.bf16.msra.mxu0 %v5363_v31  ;;  %v5486_v31 = vld [vmem:[#allocation2 + $0x378] ss:$36 sps:$4 sm:$0xff]  }
  0x7f   :  { %1627 = vmatpush1.bf16.msra.mxu1 %v5360_v30  ;;  %1653 = vmatprep.subr.bf16.mxu0 %v5371_v33  ;;  %v5414_v30 = vld [vmem:[#allocation2 + $0x370] ss:$36 sps:$4 sm:$0xff]   ;;  %v5491_v33 = vld [vmem:[#allocation2 + $0x3c4] ss:$36 sps:$4 sm:$0xff]  }
  0x80   :  { %1628 = vmatprep.subr.bf16.mxu1 %v5368_v32  ;;  %v5419_v32 = vld [vmem:[#allocation2 + $0x3bc] ss:$36 sps:$4 sm:$0xff]  }
  0x82   :  { %1654 = vmatpush1.bf16.msra.mxu0 %v5369_v35  ;;  %v5489_v35 = vld [vmem:[#allocation2 + $0x3c0] ss:$36 sps:$4 sm:$0xff]  }
  0x83   :  { %1629 = vmatpush1.bf16.msra.mxu1 %v5366_v34  ;;  %1655 = vmatprep.subr.bf16.mxu0 %v5377_v37  ;;  %v5417_v34 = vld [vmem:[#allocation2 + $0x3b8] ss:$36 sps:$4 sm:$0xff]   ;;  %v5494_v37 = vld [vmem:[#allocation2 + $0x40c] ss:$36 sps:$4 sm:$0xff]  }
  0x84   :  { %1630 = vmatprep.subr.bf16.mxu1 %v5374_v36  ;;  %v5422_v36 = vld [vmem:[#allocation2 + $0x404] ss:$36 sps:$4 sm:$0xff]  }
  0x86   :  { %1656 = vmatpush1.bf16.msra.mxu0 %v5375_v40  ;;  %v5492_v40 = vld [vmem:[#allocation2 + $0x408] ss:$36 sps:$4 sm:$0xff]  }
  0x87   :  { %1631 = vmatpush1.bf16.msra.mxu1 %v5372_v39  ;;  %1682 = vmatprep.subr.bf16.mxu0 %v5380_v41  ;;  %v5420_v39 = vld [vmem:[#allocation2 + $0x400] ss:$36 sps:$4 sm:$0xff]   ;;  %v5428_v41 = vld [vmem:[#allocation2 + $0x44c] ss:$36 sps:$4 sm:$0xff]  }
  0x88   :  { %1764 = vmatprep.subr.bf16.mxu1 %v5425_v42  ;;  %v5497_v42 = vld [vmem:[#allocation2 + $0x454] ss:$36 sps:$4 sm:$0xff]  }
  0x89   :  { %1674 = vmatmul.mubr.bf16.vlgmr.msra.gmra.mrb[4].mxu0 %v6385_v38 }
  0x8a   :  { %1633 = vmatmul.mubr.bf16.vlgmr.msra.gmra.mrb[4].mxu1 %v6398_v9  ;;  %1683 = vmatpush1.bf16.msra.mxu0 %v5378_v43  ;;  %v5426_v43 = vld [vmem:[#allocation2 + $0x448] ss:$36 sps:$4 sm:$0xff]  }
  0x8b   :  { %1765 = vmatpush1.bf16.msra.mxu1 %v5423_v45  ;;  %1684 = vmatprep.subr.bf16.mxu0 %v5383_v44  ;;  %v5495_v44 = vld [vmem:[#allocation2 + $0x450] ss:$36 sps:$4 sm:$0xff]  }
  0x8c   :  { %1766 = vmatprep.subr.bf16.mxu1 %v5431_v46  ;;  %1714 = vmatprep.mubr.bf16.mxu0 %v6391_v53  ;;  %v5434_v45 = vld [vmem:[#allocation2 + $0x494] ss:$36 sps:$4 sm:$0xff]   ;;  %v5500_v46 = vld [vmem:[#allocation2 + $0x49c] ss:$36 sps:$4 sm:$0xff]  }
  0x8d   :  { %1796 = vmatprep.mubr.bf16.mxu1 %v6391_v53 }
  0x8e   :  { %1685 = vmatpush1.bf16.msra.mxu0 %v5381_v47  ;;  %v5432_v47 = vld [vmem:[#allocation2 + $0x490] ss:$36 sps:$4 sm:$0xff]  }
  0x8f   :  { %1767 = vmatpush1.bf16.msra.mxu1 %v5429_v49  ;;  %1686 = vmatprep.subr.bf16.mxu0 %v5386_v48  ;;  %v5440_v48 = vld [vmem:[#allocation2 + $0x4dc] ss:$36 sps:$4 sm:$0xff]  }
  0x90   :  { %1768 = vmatprep.subr.bf16.mxu1 %v5437_v50  ;;  %v5498_v49 = vld [vmem:[#allocation2 + $0x498] ss:$36 sps:$4 sm:$0xff]   ;;  %v5503_v50 = vld [vmem:[#allocation2 + $0x4e4] ss:$36 sps:$4 sm:$0xff]  }
  0x92   :  { %1687 = vmatpush1.bf16.msra.mxu0 %v5384_v51  ;;  %v5438_v51 = vld [vmem:[#allocation2 + $0x4d8] ss:$36 sps:$4 sm:$0xff]  }
  0x93   :  { %1769 = vmatpush1.bf16.msra.mxu1 %v5435_v54  ;;  %1688 = vmatprep.subr.bf16.mxu0 %v5389_v52  ;;  %v5446_v52 = vld [vmem:[#allocation2 + $0x524] ss:$36 sps:$4 sm:$0xff]  }
  0x94   :  { %1770 = vmatprep.subr.bf16.mxu1 %v5443_v55  ;;  %v5501_v54 = vld [vmem:[#allocation2 + $0x4e0] ss:$36 sps:$4 sm:$0xff]   ;;  %v5506_v55 = vld [vmem:[#allocation2 + $0x52c] ss:$36 sps:$4 sm:$0xff]  }
  0x96   :  { %1689 = vmatpush1.bf16.msra.mxu0 %v5387_v56  ;;  %v5444_v56 = vld [vmem:[#allocation2 + $0x520] ss:$36 sps:$4 sm:$0xff]  }
  0x97   :  { %1771 = vmatpush1.bf16.msra.mxu1 %v5441_v58  ;;  %1690 = vmatprep.subr.bf16.mxu0 %v5392_v57  ;;  %v5452_v57 = vld [vmem:[#allocation2 + $0x56c] ss:$36 sps:$4 sm:$0xff]  }
  0x98   :  { %1772 = vmatprep.subr.bf16.mxu1 %v5449_v59  ;;  %v5504_v58 = vld [vmem:[#allocation2 + $0x528] ss:$36 sps:$4 sm:$0xff]   ;;  %v5509_v59 = vld [vmem:[#allocation2 + $0x574] ss:$36 sps:$4 sm:$0xff]  }
  0x9a   :  { %1691 = vmatpush1.bf16.msra.mxu0 %v5390_v60  ;;  %v5450_v60 = vld [vmem:[#allocation2 + $0x568] ss:$36 sps:$4 sm:$0xff]  }
  0x9b   :  { %1773 = vmatpush1.bf16.msra.mxu1 %v5447_v62  ;;  %1692 = vmatprep.subr.bf16.mxu0 %v5395_v61  ;;  %v5458_v61 = vld [vmem:[#allocation2 + $0x5b4] ss:$36 sps:$4 sm:$0xff]  }
  0x9c   :  { %1774 = vmatprep.subr.bf16.mxu1 %v5455_v63  ;;  %v5507_v62 = vld [vmem:[#allocation2 + $0x570] ss:$36 sps:$4 sm:$0xff]   ;;  %v5512_v63 = vld [vmem:[#allocation2 + $0x5bc] ss:$36 sps:$4 sm:$0xff]  }
  0x9e   :  { %1693 = vmatpush1.bf16.msra.mxu0 %v5393_v1  ;;  %v5456_v1 = vld [vmem:[#allocation2 + $0x5b0] ss:$36 sps:$4 sm:$0xff]  }
  0x9f   :  { %1775 = vmatpush1.bf16.msra.mxu1 %v5453_v3  ;;  %1694 = vmatprep.subr.bf16.mxu0 %v5398_v2  ;;  %v5464_v2 = vld [vmem:[#allocation2 + $0x5fc] ss:$36 sps:$4 sm:$0xff]  }
  0xa0   :  { %1776 = vmatprep.subr.bf16.mxu1 %v5461_v4  ;;  %v5510_v3 = vld [vmem:[#allocation2 + $0x5b8] ss:$36 sps:$4 sm:$0xff]   ;;  %v5515_v4 = vld [vmem:[#allocation2 + $0x604] ss:$36 sps:$4 sm:$0xff]  }
  0xa2   :  { %1695 = vmatpush1.bf16.msra.mxu0 %v5396_v5  ;;  %v5462_v5 = vld [vmem:[#allocation2 + $0x5f8] ss:$36 sps:$4 sm:$0xff]  }
  0xa3   :  { %1777 = vmatpush1.bf16.msra.mxu1 %v5459_v7  ;;  %1696 = vmatprep.subr.bf16.mxu0 %v5401_v6  ;;  %v5470_v6 = vld [vmem:[#allocation2 + $0x644] ss:$36 sps:$4 sm:$0xff]  }
  0xa4   :  { %1778 = vmatprep.subr.bf16.mxu1 %v5467_v8  ;;  %v5513_v7 = vld [vmem:[#allocation2 + $0x600] ss:$36 sps:$4 sm:$0xff]   ;;  %v5518_v8 = vld [vmem:[#allocation2 + $0x64c] ss:$36 sps:$4 sm:$0xff]  }
  0xa6   :  { %1697 = vmatpush1.bf16.msra.mxu0 %v5399_v10  ;;  %v5468_v10 = vld [vmem:[#allocation2 + $0x640] ss:$36 sps:$4 sm:$0xff]  }
  0xa7   :  { %1779 = vmatpush1.bf16.msra.mxu1 %v5465_v12  ;;  %1698 = vmatprep.subr.bf16.mxu0 %v5404_v11  ;;  %v5476_v11 = vld [vmem:[#allocation2 + $0x68c] ss:$36 sps:$4 sm:$0xff]  }
  0xa8   :  { %1780 = vmatprep.subr.bf16.mxu1 %v5473_v13  ;;  %v5516_v12 = vld [vmem:[#allocation2 + $0x648] ss:$36 sps:$4 sm:$0xff]   ;;  %v5521_v13 = vld [vmem:[#allocation2 + $0x694] ss:$36 sps:$4 sm:$0xff]  }
  0xaa   :  { %1699 = vmatpush1.bf16.msra.mxu0 %v5402_v14  ;;  %v5474_v14 = vld [vmem:[#allocation2 + $0x688] ss:$36 sps:$4 sm:$0xff]  }
  0xab   :  { %1781 = vmatpush1.bf16.msra.mxu1 %v5471_v16  ;;  %1700 = vmatprep.subr.bf16.mxu0 %v5407_v15  ;;  %v5519_v15 = vld [vmem:[#allocation2 + $0x690] ss:$36 sps:$4 sm:$0xff]   ;;  %v5530_v16 = vld [vmem:[#allocation2 + $0x260] ss:$36 sps:$4 sm:$0xff]  }
  0xac   :  { %1782 = vmatprep.subr.bf16.mxu1 %v5479_v17  ;;  %v5531_v17 = vld [vmem:[#allocation2 + $0x20] ss:$36 sps:$4 sm:$0xff]  }
  0xae   :  { %1701 = vmatpush1.bf16.msra.mxu0 %v5405_v18  ;;  %v5522_v18 = vld [vmem:[#allocation2 + $0x4a0] ss:$36 sps:$4 sm:$0xff]  }
  0xaf   :  { %1783 = vmatpush1.bf16.msra.mxu1 %v5477_v20  ;;  %1702 = vmatprep.subr.bf16.mxu0 %v5410_v19  ;;  %v6961_v19 = vmov 0.0   ;;  %v5532_v20 = vld [vmem:[#allocation2 + $0x2a8] ss:$36 sps:$4 sm:$0xff]  }
  0xb0   :  { %1784 = vmatprep.subr.bf16.mxu1 %v5482_v21  ;;  %v5533_v21 = vld [vmem:[#allocation2 + $0x68] ss:$36 sps:$4 sm:$0xff]  }
  0xb2   :  { %1703 = vmatpush1.bf16.msra.mxu0 %v5408_v22  ;;  %v5523_v22 = vld [vmem:[#allocation2 + $0x4e8] ss:$36 sps:$4 sm:$0xff]  }
  0xb3   :  { %1785 = vmatpush1.bf16.msra.mxu1 %v5480_v23  ;;  %1704 = vmatprep.subr.bf16.mxu0 %v5413_v24  ;;  %v5534_v23 = vld [vmem:[#allocation2 + $0x2f0] ss:$36 sps:$4 sm:$0xff]  }
  0xb4   :  { %1786 = vmatprep.subr.bf16.mxu1 %v5485_v25  ;;  %v5535_v24 = vld [vmem:[#allocation2 + $0xb0] ss:$36 sps:$4 sm:$0xff]  }
  0xb5   :  { %v5524_v25 = vld [vmem:[#allocation2 + $0x530] ss:$36 sps:$4 sm:$0xff]  }
  0xb6   :  { %1705 = vmatpush1.bf16.msra.mxu0 %v5411_v26  ;;  %v5536_v26 = vld [vmem:[#allocation2 + $0x338] ss:$36 sps:$4 sm:$0xff]  }
  0xb7   :  { %1787 = vmatpush1.bf16.msra.mxu1 %v5483_v27  ;;  %1706 = vmatprep.subr.bf16.mxu0 %v5416_v28  ;;  %v5537_v27 = vld [vmem:[#allocation2 + $0xf8] ss:$36 sps:$4 sm:$0xff]  }
  0xb8   :  { %1788 = vmatprep.subr.bf16.mxu1 %v5488_v29  ;;  %v5525_v28 = vld [vmem:[#allocation2 + $0x578] ss:$36 sps:$4 sm:$0xff]   ;;  %v5538_v29 = vld [vmem:[#allocation2 + $0x380] ss:$36 sps:$4 sm:$0xff]  }
  0xba   :  { %1707 = vmatpush1.bf16.msra.mxu0 %v5414_v30  ;;  %v5539_v30 = vld [vmem:[#allocation2 + $0x140] ss:$36 sps:$4 sm:$0xff]  }
  0xbb   :  { %1789 = vmatpush1.bf16.msra.mxu1 %v5486_v31  ;;  %1708 = vmatprep.subr.bf16.mxu0 %v5419_v32  ;;  %v5540_v31 = vld [vmem:[#allocation2 + $0x3c8] ss:$36 sps:$4 sm:$0xff]  }
  0xbc   :  { %1790 = vmatprep.subr.bf16.mxu1 %v5491_v33  ;;  %v5541_v32 = vld [vmem:[#allocation2 + $0x188] ss:$36 sps:$4 sm:$0xff]  }
  0xbd   :  { %v5527_v33 = vld [vmem:[#allocation2 + $0x608] ss:$36 sps:$4 sm:$0xff]  }
  0xbe   :  { %1709 = vmatpush1.bf16.msra.mxu0 %v5417_v34  ;;  %v5542_v34 = vld [vmem:[#allocation2 + $0x410] ss:$36 sps:$4 sm:$0xff]  }
  0xbf   :  { %1791 = vmatpush1.bf16.msra.mxu1 %v5489_v35  ;;  %1710 = vmatprep.subr.bf16.mxu0 %v5422_v36  ;;  %v5543_v35 = vld [vmem:[#allocation2 + $0x1d0] ss:$36 sps:$4 sm:$0xff]  }
  0xc0   :  { %1792 = vmatprep.subr.bf16.mxu1 %v5494_v37  ;;  %v5528_v36 = vld [vmem:[#allocation2 + $0x650] ss:$36 sps:$4 sm:$0xff]   ;;  %v5544_v37 = vld [vmem:[#allocation2 + $0x458] ss:$36 sps:$4 sm:$0xff]  }
  0xc2   :  { %1711 = vmatpush1.bf16.msra.mxu0 %v5420_v39  ;;  %v5545_v39 = vld [vmem:[#allocation2 + $0x218] ss:$36 sps:$4 sm:$0xff]  }
  0xc3   :  { %1793 = vmatpush1.bf16.msra.mxu1 %v5492_v40  ;;  %1712 = vmatprep.subr.bf16.mxu0 %v5428_v41  ;;  %v5529_v40 = vld [vmem:[#allocation2 + $0x698] ss:$36 sps:$4 sm:$0xff]  }
  0xc4   :  { %1794 = vmatprep.subr.bf16.mxu1 %v5497_v42 }
  0xc6   :  { %1713 = vmatpush1.bf16.msra.mxu0 %v5426_v43 }
  0xc7   :  { %1795 = vmatpush1.bf16.msra.mxu1 %v5495_v44  ;;  %1723 = vmatprep.subr.bf16.mxu0 %v5434_v45  ;;  %v1927_v45 = vlaneseq }
  0xc8   :  { %1805 = vmatprep.subr.bf16.mxu1 %v5500_v46 }
  0xc9   :  { %1715 = vmatmul.mubr.bf16.vlgmr.msra.gmra.mrb[8].mxu0 %v6398_v9  ;;  %v1928_v46 = vshrl.u32 %v1927_v45, 7 }
  0xca   :  { %1797 = vmatmul.mubr.bf16.vlgmr.msra.gmra.mrb[8].mxu1 %v6398_v9  ;;  %1724 = vmatpush1.bf16.msra.mxu0 %v5432_v47 }
  0xcb   :  { %1755 = vmatprep.mubr.bf16.mxu0 %v6963_v0  ;;  %1725 = vmatprep.subr.bf16.mxu0 %v5440_v48  ;;  %v6425_v47 = vsub.s32 1, %v1928_v46  ;;  %v404_v48 = vld [vmem:[%s6952_s2] sm:$0x7] }
  0xcc   :  { %1806 = vmatpush1.bf16.msra.mxu1 %v5498_v49  ;;  %1837 = vmatprep.mubr.bf16.mxu1 %v6963_v0 }
  0xcd   :  { %1807 = vmatprep.subr.bf16.mxu1 %v5503_v50  ;;  %v6431_v50 = vrot.slane %v404_v48, %v6425_v47 }
  0xce   :  { %1726 = vmatpush1.bf16.msra.mxu0 %v5438_v51 }
  0xcf   :  { %1727 = vmatprep.subr.bf16.mxu0 %v5446_v52 }
  0xd0   :  { %1808 = vmatpush1.bf16.msra.mxu1 %v5501_v54 }
  0xd1   :  { %1809 = vmatprep.subr.bf16.mxu1 %v5506_v55 }
  0xd2   :  { %1728 = vmatpush1.bf16.msra.mxu0 %v5444_v56 }
  0xd3   :  { %1729 = vmatprep.subr.bf16.mxu0 %v5452_v57 }
  0xd4   :  { %1810 = vmatpush1.bf16.msra.mxu1 %v5504_v58 }
  0xd5   :  { %1811 = vmatprep.subr.bf16.mxu1 %v5509_v59 }
  0xd6   :  { %1730 = vmatpush1.bf16.msra.mxu0 %v5450_v60 }
  0xd7   :  { %1731 = vmatprep.subr.bf16.mxu0 %v5458_v61 }
  0xd8   :  { %1812 = vmatpush1.bf16.msra.mxu1 %v5507_v62 }
  0xd9   :  { %1813 = vmatprep.subr.bf16.mxu1 %v5512_v63 }
  0xda   :  { %1732 = vmatpush1.bf16.msra.mxu0 %v5456_v1 }
  0xdb   :  { %1733 = vmatprep.subr.bf16.mxu0 %v5464_v2 }
  0xdc   :  { %1814 = vmatpush1.bf16.msra.mxu1 %v5510_v3 }
  0xdd   :  { %1815 = vmatprep.subr.bf16.mxu1 %v5515_v4 }
  0xde   :  { %1734 = vmatpush1.bf16.msra.mxu0 %v5462_v5 }
  0xdf   :  { %1735 = vmatprep.subr.bf16.mxu0 %v5470_v6 }
  0xe0   :  { %1816 = vmatpush1.bf16.msra.mxu1 %v5513_v7 }
  0xe1   :  { %1817 = vmatprep.subr.bf16.mxu1 %v5518_v8  ;;  %v6434_v8 = vsub.s32 0, %v1928_v46 }
  0xe2   :  { %1736 = vmatpush1.bf16.msra.mxu0 %v5468_v10  ;;  %v6439_v10 = vld [vmem:[%s6953_s3] sm:$0x7] }
  0xe3   :  { %1737 = vmatprep.subr.bf16.mxu0 %v5476_v11 }
  0xe4   :  { %1818 = vmatpush1.bf16.msra.mxu1 %v5516_v12  ;;  %v6442_v12 = vrot.slane %v404_v48, %v6434_v8 }
  0xe5   :  { %1819 = vmatprep.subr.bf16.mxu1 %v5521_v13 }
  0xe6   :  { %1738 = vmatpush1.bf16.msra.mxu0 %v5474_v14 }
  0xe7   :  { %4846 = vmatprep.subr.bf16.mxu0 %v5530_v16  ;;  %v6446_v16 = vrot.slane %v6439_v10, %v6425_v47 }
  0xe8   :  { %1820 = vmatpush1.bf16.msra.mxu1 %v5519_v15 }
  0xe9   :  { %5044 = vmatprep.subr.bf16.mxu1 %v6961_v19  ;;  %1756 = vmatmul.mubr.bf16.vlgmr.msra.gmra.mrb[8].mxu0 %v6385_v38 }
  0xea   :  { %4847 = vmatpush3.bf16.msra.mxu0 %v5531_v17  ;;  %1878 = vmatprep.mubr.bf16.mxu0 %v6391_v53  ;;  %v5526_v53 = vld [vmem:[#allocation2 + $0x5c0] ss:$36 sps:$4 sm:$0xff]  }
  0xeb   :  { %1838 = vmatmul.mubr.bf16.vlgmr.msra.gmra.mrb[12].mxu1 %v6385_v38  ;;  %4848 = vmatprep.subr.bf16.mxu0 %v5532_v20 }
  0xec   :  { %5045 = vmatpush3.bf16.msra.mxu1 %v5522_v18  ;;  %5060 = vmatprep.mubr.msk.bf16.mxu1 %vm6300_vm0, %v6961_v19 }
  0xed   :  { %5046 = vmatprep.subr.bf16.mxu1 %v6961_v19 }
  0xee   :  { %4849 = vmatpush3.bf16.msra.mxu0 %v5533_v21 }
  0xef   :  { %4850 = vmatprep.subr.bf16.mxu0 %v5534_v23 }
  0xf0   :  { %5047 = vmatpush3.bf16.msra.mxu1 %v5523_v22 }
  0xf1   :  { %5048 = vmatprep.subr.bf16.mxu1 %v6961_v19 }
  0xf2   :  { %4851 = vmatpush3.bf16.msra.mxu0 %v5535_v24 }
  0xf3   :  { %4852 = vmatprep.subr.bf16.mxu0 %v5536_v26 }
  0xf4   :  { %5049 = vmatpush3.bf16.msra.mxu1 %v5524_v25 }
  0xf5   :  { %5050 = vmatprep.subr.bf16.mxu1 %v6961_v19 }
  0xf6   :  { %4853 = vmatpush3.bf16.msra.mxu0 %v5537_v27 }
  0xf7   :  { %4854 = vmatprep.subr.bf16.mxu0 %v5538_v29  ;;  %v6451_v29 = vsub.s32 2, %v1928_v46 }
  0xf8   :  { %5051 = vmatpush3.bf16.msra.mxu1 %v5525_v28 }
  0xf9   :  { %5052 = vmatprep.subr.bf16.mxu1 %v6961_v19 }
  0xfa   :  { %4855 = vmatpush3.bf16.msra.mxu0 %v5539_v30  ;;  %v6455_v30 = vrot.slane %v6439_v10, %v6434_v8 }
  0xfb   :  { %4856 = vmatprep.subr.bf16.mxu0 %v5540_v31 }
  0xfc   :  { %5053 = vmatpush3.bf16.msra.mxu1 %v5526_v53 }
  0xfd   :  { %5054 = vmatprep.subr.bf16.mxu1 %v6961_v19 }
  0xfe   :  { %4857 = vmatpush3.bf16.msra.mxu0 %v5541_v32  ;;  %v6460_v32 = vrot.slane %v404_v48, %v6451_v29 }
  0xff   :  { %4858 = vmatprep.subr.bf16.mxu0 %v5542_v34 }
 0x100   :  { %5055 = vmatpush3.bf16.msra.mxu1 %v5527_v33 }
 0x101   :  { %5056 = vmatprep.subr.bf16.mxu1 %v6961_v19 }
 0x102   :  { %4859 = vmatpush3.bf16.msra.mxu0 %v5543_v35 }
 0x103   :  { %4860 = vmatprep.subr.bf16.mxu0 %v5544_v37 }
 0x104   :  { %5057 = vmatpush3.bf16.msra.mxu1 %v5528_v36 }
 0x105   :  { %5058 = vmatprep.subr.bf16.mxu1 %v6961_v19 }
 0x106   :  { %4861 = vmatpush3.bf16.msra.mxu0 %v5545_v39 }
 0x108   :  { %5059 = vmatpush3.bf16.msra.mxu1 %v5529_v40 }
 0x109   :  { %1879 = vmatmul.mubr.bf16.vlgmr.msra.gmra.mrb[12].mxu0 %v6398_v9 }
 0x10b   :  { %5061 = vmatmul.mubr.bf16.vlgmr.msra.gmra.mrb[16].mxu1 %v6385_v38 }
 0x11d   :  { %v1593_v41 = vpop.f32.mrb[0].mxu1 }
 0x11e   :  { %v1595_v42 = vpop.f32.mrb[1].mxu1 }
 0x11f   :  { %v1597_v43 = vpop.f32.mrb[2].mxu1 }
 0x120   :  { %v1598_v44 = vpop.f32.mrb[3].mxu1 }
 0x13c   :  { %v1552_v49 = vpop.f32.mrb[0].mxu0 }
 0x13d   :  { %v1594_v51 = vadd.f32 %v1593_v41, %v1552_v49  ;;  %v1554_v9 = vpop.f32.mrb[1].mxu0 }
 0x13e   :  { %v1596_v52 = vadd.f32 %v1595_v42, %v1554_v9  ;;  %v1556_v38 = vpop.f32.mrb[2].mxu0 }
 0x13f   :  { %v1557_v54 = vpop.f32.mrb[3].mxu0  ;;  %v1942_v26 = vadd.f32 %v6442_v12, %v1594_v51 }
 0x140   :  { %v1943_v55 = vadd.f32 %v6431_v50, %v1596_v52 }
 0x141   :  { %v1964_v28 = vpack.c.bf16 %v1942_v26, %v1942_v26  ;;  %v5546_v26 = vld [vmem:[#allocation5] ss:$12 sps:$4 sm:$0xff]  }
 0x142   :  { %v1965_v56 = vpack.c.bf16 %v1943_v55, %v1943_v55 }
 0x144   :  { %2002 = vmatprep.mubr.bf16.mxu1 %v1965_v56 }
 0x15c   :  { %v1675_v58 = vpop.f32.mrb[4].mxu0 }
 0x15d   :  { %v1634_v57 = vpop.f32.mrb[4].mxu1  ;;  %v1677_v61 = vpop.f32.mrb[5].mxu0 }
 0x15e   :  { %v1676_v59 = vadd.f32 %v1675_v58, %v1634_v57  ;;  %v1636_v60 = vpop.f32.mrb[5].mxu1  ;;  %v1679_v63 = vpop.f32.mrb[6].mxu0 }
 0x15f   :  { %v1678_v62 = vadd.f32 %v1677_v61, %v1636_v60  ;;  %v1638_v1 = vpop.f32.mrb[6].mxu1  ;;  %v1680_v2 = vpop.f32.mrb[7].mxu0  ;;  %v6472_v61 = vrot.slane %v6439_v10, %v6451_v29 }
 0x160   :  { %v1639_v3 = vpop.f32.mrb[7].mxu1  ;;  %v1944_v34 = vadd.f32 %v6460_v32, %v1676_v59 }
 0x161   :  { %v1967_v17 = vpack.c.bf16 %v1678_v62, %v1678_v62 }
 0x162   :  { %v1966_v36 = vpack.c.bf16 %v1944_v34, %v1944_v34  ;;  %v5572_v34 = vld [vmem:[#allocation5 + $0x184] ss:$12 sps:$4 sm:$0xff]  }
 0x19d   :  { %v1798_v4 = vpop.f32.mrb[8].mxu1 }
 0x19e   :  { %v1800_v5 = vpop.f32.mrb[9].mxu1 }
 0x19f   :  { %v1802_v6 = vpop.f32.mrb[10].mxu1 }
 0x1a0   :  { %v1803_v7 = vpop.f32.mrb[11].mxu1 }
 0x1bc   :  { %v1757_v11 = vpop.f32.mrb[8].mxu0 }
 0x1bd   :  { %v1968_v13 = vpack.c.bf16 %v1757_v11, %v1757_v11  ;;  %v1759_v14 = vpop.f32.mrb[9].mxu0  ;;  %v6484_v11 = vld [vmem:[%s6950_s0] sm:$0xff] }
 0x1be   :  { %v1839_v15 = vpop.f32.mrb[12].mxu1  ;;  %v1761_v18 = vpop.f32.mrb[10].mxu0  ;;  %v1969_v31 = vpack.c.bf16 %v1759_v14, %v1759_v14  ;;  %v6490_v14 = vld [vmem:[%s6950_s0 + $0x8] sm:$0xff] }
 0x1bf   :  { %v1840_v20 = vadd.f32 %v1839_v15, %v1798_v4  ;;  %v1841_v21 = vpop.f32.mrb[13].mxu1  ;;  %v1762_v22 = vpop.f32.mrb[11].mxu0  ;;  %1970 = vmatprep.subr.bf16.mxu1 %v1968_v13  ;;  %v6496_v18 = vld [vmem:[%s6950_s0 + $0x10] sm:$0xff] }
 0x1c0   :  { %v1842_v23 = vadd.f32 %v1841_v21, %v1800_v5  ;;  %v1843_v24 = vpop.f32.mrb[14].mxu1  ;;  %1971 = vmatpush1.bf16.xpose.msra.mxu1 %v1967_v17 }
 0x1c1   :  { %v1844_v25 = vpop.f32.mrb[15].mxu1  ;;  %5064 = vmatprep.subr.bf16.mxu1 %v6961_v19  ;;  %v1961_v33 = vadd.f32 %v6455_v30, %v1840_v20 }
 0x1c2   :  { %v1962_v27 = vadd.f32 %v6446_v16, %v1842_v23 }
 0x1c3   :  { %v2063_v35 = vpack.c.bf16 %v1961_v33, %v1961_v33  ;;  %v5570_v33 = vld [vmem:[#allocation5 + $0x180] ss:$12 sps:$4 sm:$0xff]  }
 0x1c4   :  { %v2064_v53 = vpack.c.bf16 %v1962_v27, %v1962_v27  ;;  %v5548_v27 = vld [vmem:[#allocation5 + $0x4] ss:$12 sps:$4 sm:$0xff]  }
 0x1c5   :  { %v2071_v37 = vsel %vm2069_vm1, %v2063_v35, 0  ;;  %2625 = vmatprep.subr.bf16.mxu0 %v5548_v27  ;;  %v6501_v35 = vld [vmem:[#allocation5 + $0x30] ss:$12 sps:$4 sm:$0xff]   ;;  %v6582_v27 = vld [vmem:[#allocation5 + $0x154] ss:$12 sps:$4 sm:$0xff]  }
 0x1c6   :  { %2626 = vmatpush1.bf16.msra.mxu0 %v5546_v26  ;;  %v5608_v26 = vld [vmem:[#allocation5 + $0x214] ss:$12 sps:$4 sm:$0xff]  }
 0x1c7   :  { %2003 = vmatmul.mubr.bf16.vlgmr.msra.gmra.mrb[20].mxu1 %v1964_v28  ;;  %v5551_v28 = vld [vmem:[#allocation5 + $0x1c] ss:$12 sps:$4 sm:$0xff]  }
 0x1c8   :  { %5065 = vmatpush3.bf16.xpose.msra.mxu1 %v1969_v31  ;;  %5066 = vmatprep.mubr.msk.bf16.mxu1 %vm6300_vm0, %v6961_v19  ;;  %v6499_v31 = vld [vmem:[#allocation5 + $0x34] ss:$12 sps:$4 sm:$0xff]  }
 0x1c9   :  { %4765 = vmatprep.subr.msk.bf16.mxu1 %vm2069_vm1, %v2064_v53  ;;  %v5549_v53 = vld [vmem:[#allocation5 + $0x18] ss:$12 sps:$4 sm:$0xff]   ;;  %2627 = vmatprep.subr.bf16.mxu0 %v5551_v28  ;;  %v5606_v28 = vld [vmem:[#allocation5 + $0x210] ss:$12 sps:$4 sm:$0xff]  }
 0x1ca   :  { %2628 = vmatpush1.bf16.msra.mxu0 %v5549_v53  ;;  %v6585_v53 = vld [vmem:[#allocation5 + $0x150] ss:$12 sps:$4 sm:$0xff]  }
 0x1cb   :  { %2629 = vmatprep.subr.bf16.mxu0 %v6499_v31 }
 0x1ce   :  { %2630 = vmatpush1.bf16.msra.mxu0 %v6501_v35 }
 0x1d3   :  { %5067 = vmatmul.mubr.bf16.vlgmr.msra.gmra.mrb[20].mxu1 %v1966_v36  ;;  %v5578_v36 = vld [vmem:[#allocation5 + $0x19c] ss:$12 sps:$4 sm:$0xff]  }
 0x1d4   :  { %2080 = vmatpush1.bf16.msra.mxu1 %v2071_v37  ;;  %2111 = vmatprep.mubr.bf16.mxu1 %v6963_v0  ;;  %v6504_v37 = vld [vmem:[#allocation5 + $0x4c] ss:$12 sps:$4 sm:$0xff]  }
 0x1d5   :  { %5070 = vmatprep.subr.bf16.mxu1 %v6961_v19  ;;  %2631 = vmatprep.subr.bf16.mxu0 %v6504_v37 }
 0x1dc   :  { %v4862_v39 = vpop.f32.mrb[12].mxu0 }
 0x1dd   :  { %v4863_v41 = vpop.f32.mrb[13].mxu0 }
 0x1de   :  { %v1920_v40 = vpop.f32.mrb[16].mxu1  ;;  %v4864_v42 = vadd.f32 %v4863_v41, %v4862_v39  ;;  %v4865_v44 = vpop.f32.mrb[14].mxu0  ;;  %v5576_v39 = vld [vmem:[#allocation5 + $0x198] ss:$12 sps:$4 sm:$0xff]  }
 0x1df   :  { %v5062_v43 = vpop.f32.mrb[17].mxu1  ;;  %v4866_v46 = vpop.f32.mrb[15].mxu0  ;;  %v6510_v41 = vld [vmem:[#allocation5 + $0x64] ss:$12 sps:$4 sm:$0xff]  }
 0x1e0   :  { %v1923_v45 = vpop.f32.mrb[18].mxu1  ;;  %v1921_v48 = vadd.f32 %v4864_v42, %v1920_v40  ;;  %v6507_v40 = vld [vmem:[#allocation5 + $0x48] ss:$12 sps:$4 sm:$0xff]   ;;  %v6513_v42 = vld [vmem:[#allocation5 + $0x60] ss:$12 sps:$4 sm:$0xff]  }
 0x1e1   :  { %v5063_v49 = vpop.f32.mrb[19].mxu1  ;;  %2632 = vmatpush1.bf16.msra.mxu0 %v6507_v40  ;;  %v6516_v43 = vld [vmem:[#allocation5 + $0x7c] ss:$12 sps:$4 sm:$0xff]   ;;  %v6519_v44 = vld [vmem:[#allocation5 + $0x78] ss:$12 sps:$4 sm:$0xff]  }
 0x1e2   :  { %v1963_v62 = vadd.f32 %v6472_v61, %v1921_v48  ;;  %2633 = vmatprep.subr.bf16.mxu0 %v6510_v41  ;;  %v6522_v45 = vld [vmem:[#allocation5 + $0x94] ss:$12 sps:$4 sm:$0xff]   ;;  %v6525_v46 = vld [vmem:[#allocation5 + $0x90] ss:$12 sps:$4 sm:$0xff]   ;;  %v6528_v48 = vld [vmem:[#allocation5 + $0xac] ss:$12 sps:$4 sm:$0xff]  }
 0x1e3   :  { %v6531_v49 = vld [vmem:[#allocation5 + $0xa8] ss:$12 sps:$4 sm:$0xff]  }
 0x1e4   :  { %v2065_v1 = vpack.c.bf16 %v1963_v62, %v1963_v62 }
 0x1e5   :  { %2634 = vmatpush1.bf16.msra.mxu0 %v6513_v42 }
 0x1e6   :  { %v2077_v4 = vsel %vm2069_vm1, %v2065_v1, 0  ;;  %2635 = vmatprep.subr.bf16.mxu0 %v6516_v43 }
 0x1e9   :  { %2636 = vmatpush1.bf16.msra.mxu0 %v6519_v44 }
 0x1ea   :  { %2637 = vmatprep.subr.bf16.mxu0 %v6522_v45 }
 0x1ed   :  { %2638 = vmatpush1.bf16.msra.mxu0 %v6525_v46 }
 0x1ee   :  { %2639 = vmatprep.subr.bf16.mxu0 %v6528_v48 }
 0x1f1   :  { %2640 = vmatpush1.bf16.msra.mxu0 %v6531_v49 }
 0x2a6   :  { %v2044_v51 = vpop.f32.mrb[20].mxu1 }
 0x2a7   :  { %v5068_v9 = vpop.f32.mrb[21].mxu1  ;;  %v2051_v52 = vsel %vm2050_vm2, %v2044_v51, -inf }
 0x2a8   :  { %2052 = vmax.xlane.f32.xlu0 %v2051_v52  ;;  %v2047_v38 = vpop.f32.mrb[22].mxu1  ;;  %v6537_v9 = vld [vmem:[#allocation5 + $0xc0] ss:$12 sps:$4 sm:$0xff]   ;;  %v6540_v52 = vld [vmem:[#allocation5 + $0xdc] ss:$12 sps:$4 sm:$0xff]  }
 0x2a9   :  { %v5069_v54 = vpop.f32.mrb[23].mxu1  ;;  %v6543_v38 = vld [vmem:[#allocation5 + $0xd8] ss:$12 sps:$4 sm:$0xff]  }
 0x335   :  { %v2053_v55 = vpop.xlane.xlu0 %2052 }
 0x336   :  { %v2054_v56 = vsub.f32 %v2044_v51, %v2053_v55  ;;  %v6534_v51 = vld [vmem:[#allocation5 + $0xc4] ss:$12 sps:$4 sm:$0xff]  }
 0x337   :  { %2641 = vmatprep.subr.bf16.mxu0 %v6534_v51 }
 0x338   :  { %v2055_v57 = vmul.f32 1.442695, %v2054_v56  ;;  %2642 = vmatpush1.bf16.msra.mxu0 %v6537_v9 }
 0x339   :  { %2643 = vmatprep.subr.bf16.mxu0 %v6540_v52 }
 0x33a   :  { %5642 = vpow2.f32 %v2055_v57 }
 0x33c   :  { %2644 = vmatpush1.bf16.msra.mxu0 %v6543_v38 }
 0x344   :  { %v5643_v58 = vpop.eup %5642 }
 0x345   :  { %v2057_v59 = vsel %vm2050_vm2, %v5643_v58, 0.0 }
 0x346   :  { %2058 = vadd.xlane.f32.xlu0 %v2057_v59 }
 0x3d3   :  { %v2059_v60 = vpop.xlane.xlu0 %2058 }
 0x3d4   :  { %5644 = vrcp.f32 %v2059_v60 }
 0x3de   :  { %v5645_v63 = vpop.eup %5644 }
 0x3df   :  { %v2061_v2 = vmul.f32 %v5645_v63, %v5643_v58 }
 0x3e1   :  { %v2062_v3 = vpack.c.bf16 %v2061_v2, %v2061_v2  ;;  %v5584_v2 = vld [vmem:[#allocation5 + $0x1b4] ss:$12 sps:$4 sm:$0xff]  }
 0x3e3   :  { %4766 = vmatmul.mubr.msk.bf16.vlgmr.msra.gmra.mrb[24].mxu1 %vm2050_vm2, %v2062_v3 }
 0x3e4   :  { %5071 = vmatpush3.bf16.msra.mxu1 %v2077_v4  ;;  %5072 = vmatprep.mubr.msk.bf16.mxu1 %vm6300_vm0, %v6961_v19  ;;  %v6559_v4 = vld [vmem:[#allocation5 + $0xf4] ss:$12 sps:$4 sm:$0xff]  }
 0x3e5   :  { %2666 = vmatprep.subr.bf16.mxu1 %v5572_v34  ;;  %2645 = vmatprep.subr.bf16.mxu0 %v6559_v4  ;;  %v6588_v34 = vld [vmem:[#allocation5 + $0x16c] ss:$12 sps:$4 sm:$0xff]  }
 0x3eb   :  { %5073 = vmatmul.mubr.msk.bf16.vlgmr.msra.gmra.mrb[28].mxu1 %vm2050_vm2, %v2062_v3  ;;  %v5582_v3 = vld [vmem:[#allocation5 + $0x1b0] ss:$12 sps:$4 sm:$0xff]  }
 0x3ec   :  { %2698 = vmatprep.mubr.bf16.mxu1 %v6963_v0  ;;  %2667 = vmatpush1.bf16.msra.mxu1 %v5570_v33  ;;  %v5614_v33 = vld [vmem:[#allocation5 + $0x22c] ss:$12 sps:$4 sm:$0xff]  }
 0x3ed   :  { %2668 = vmatprep.subr.bf16.mxu1 %v5578_v36  ;;  %v5612_v36 = vld [vmem:[#allocation5 + $0x228] ss:$12 sps:$4 sm:$0xff]  }
 0x3f0   :  { %2669 = vmatpush1.bf16.msra.mxu1 %v5576_v39  ;;  %v6591_v39 = vld [vmem:[#allocation5 + $0x168] ss:$12 sps:$4 sm:$0xff]  }
 0x3f1   :  { %2670 = vmatprep.subr.bf16.mxu1 %v5584_v2 }
 0x3f4   :  { %2671 = vmatpush1.bf16.msra.mxu1 %v5582_v3  ;;  %v407_v3 = vld [vmem:[%s6954_s4] sm:$0x7] }
 0x4b6   :  { %v2113_v5 = vpop.f32.mrb[24].mxu1 }
 0x4b7   :  { %v2115_v6 = vpop.f32.mrb[25].mxu1  ;;  %v2114_v13 = vadd.f32 %v6484_v11, %v2113_v5  ;;  %v6561_v5 = vld [vmem:[#allocation5 + $0xf0] ss:$12 sps:$4 sm:$0xff]  }
 0x4b8   :  { %v2117_v7 = vpop.f32.mrb[26].mxu1  ;;  %v2116_v15 = vadd.f32 %v6490_v14, %v2115_v6  ;;  %2646 = vmatpush1.bf16.msra.mxu0 %v6561_v5  ;;  %v5590_v6 = vld [vmem:[#allocation5 + $0x1cc] ss:$12 sps:$4 sm:$0xff]  }
 0x4b9   :  { %v2118_v10 = vpop.f32.mrb[27].mxu1  ;;  %v5588_v7 = vld [vmem:[#allocation5 + $0x1c8] ss:$12 sps:$4 sm:$0xff]   ;;  %2672 = vmatprep.subr.bf16.mxu1 %v5590_v6  ;;  %v408_v6 = vld [vmem:[%s6955_s5] sm:$0x7] }
 0x4ba   :  { %v2160_v22 = vadd.f32 %v2116_v15, %v2114_v13  ;;  %v6565_v10 = vld [vmem:[#allocation5 + $0x10c] ss:$12 sps:$4 sm:$0xff]   ;;  %2673 = vmatpush1.bf16.msra.mxu1 %v5588_v7  ;;  %v6603_v7 = vrot.slane %v407_v3, %v6425_v47 }
 0x4bb   :  { %2647 = vmatprep.subr.bf16.mxu0 %v6565_v10 }
 0x4be   :  { %v2154_v17 = vpop.f32.mrb[28].mxu1 }
 0x4bf   :  { %v2155_v20 = vadd.f32 %v6496_v18, %v2154_v17  ;;  %v5074_v21 = vpop.f32.mrb[29].mxu1  ;;  %v5596_v17 = vld [vmem:[#allocation5 + $0x1e4] ss:$12 sps:$4 sm:$0xff]  }
 0x4c0   :  { %v2157_v23 = vpop.f32.mrb[30].mxu1  ;;  %v6573_v21 = vld [vmem:[#allocation5 + $0x124] ss:$12 sps:$4 sm:$0xff]   ;;  %2674 = vmatprep.subr.bf16.mxu1 %v5596_v17 }
 0x4c1   :  { %v5075_v24 = vpop.f32.mrb[31].mxu1  ;;  %v2161_v25 = vadd.f32 %v2160_v22, %v2155_v20  ;;  %v5602_v22 = vld [vmem:[#allocation5 + $0x1fc] ss:$12 sps:$4 sm:$0xff]  }
 0x4c2   :  { %v6575_v23 = vld [vmem:[#allocation5 + $0x13c] ss:$12 sps:$4 sm:$0xff]   ;;  %v5600_v24 = vld [vmem:[#allocation5 + $0x1f8] ss:$12 sps:$4 sm:$0xff]  }
 0x4c3   :  { %2162 = vadd.xlane.f32.xlu1 %v2161_v25  ;;  %v6579_v25 = vld [vmem:[#allocation5 + $0x138] ss:$12 sps:$4 sm:$0xff]  }
 0x550   :  { %v2163_v54 = vpop.xlane.xlu1 %2162 }
 0x551   :  { %v2164_v55 = vmul.f32 0.0033333334, %v2163_v54  ;;  %v5618_v54 = vld [vmem:[#allocation5 + $0xc8] ss:$12 sps:$4 sm:$0xff]  }
 0x553   :  { %v6547_v56 = vsub.f32 %v2114_v13, %v2164_v55  ;;  %v6549_v57 = vsub.f32 %v2116_v15, %v2164_v55  ;;  %v6551_v58 = vsub.f32 %v2155_v20, %v2164_v55  ;;  %v6567_v13 = vld [vmem:[#allocation5 + $0x108] ss:$12 sps:$4 sm:$0xff]   ;;  %v5594_v15 = vld [vmem:[#allocation5 + $0x1e0] ss:$12 sps:$4 sm:$0xff]  }
 0x554   :  { %2648 = vmatpush1.bf16.msra.mxu0 %v6567_v13  ;;  %v6571_v20 = vld [vmem:[#allocation5 + $0x120] ss:$12 sps:$4 sm:$0xff]   ;;  %2675 = vmatpush1.bf16.msra.mxu1 %v5594_v15  ;;  %v6606_v15 = vrot.slane %v407_v3, %v6451_v29 }
 0x555   :  { %v2168_v59 = vmul.f32 %v6547_v56, %v6547_v56  ;;  %v2169_v60 = vmul.f32 %v6549_v57, %v6549_v57  ;;  %v2170_v62 = vmul.f32 %v6551_v58, %v6551_v58  ;;  %2649 = vmatprep.subr.bf16.mxu0 %v6573_v21  ;;  %2676 = vmatprep.subr.bf16.mxu1 %v5602_v22 }
 0x556   :  { %6975 = vst [vmem:[#allocation11_spill] sm:$0xff] %v6606_v15  ;;  %v6612_v22 = vrot.slane %v408_v6, %v6425_v47 }
 0x557   :  { %v2171_v63 = vadd.f32 %v2169_v60, %v2168_v59  ;;  %v2175_v59 = vmul.f32 84.0, %v2164_v55 }
 0x558   :  { %2650 = vmatpush1.bf16.msra.mxu0 %v6571_v20  ;;  %2677 = vmatpush1.bf16.msra.mxu1 %v5600_v24  ;;  %6977 = vst [vmem:[#allocation13_spill] sm:$0xff] %v6612_v22  ;;  %v6615_v24 = vrot.slane %v408_v6, %v6451_v29 }
 0x559   :  { %v2172_v1 = vadd.f32 %v2171_v63, %v2170_v62  ;;  %2651 = vmatprep.subr.bf16.mxu0 %v6575_v23  ;;  %2678 = vmatprep.subr.bf16.mxu1 %v5608_v26  ;;  %v2176_v60 = vmul.f32 %v2175_v59, %v2164_v55  ;;  %v6609_v55 = vrot.slane %v407_v3, %v6434_v8  ;;  %v5620_v3 = vld [vmem:[#allocation5 + $0x188] ss:$12 sps:$4 sm:$0xff]  }
 0x55a   :  { %6978 = vst [vmem:[#allocation14_spill] sm:$0xff] %v6615_v24 }
 0x55b   :  { %2173 = vadd.xlane.f32.xlu1 %v2172_v1  ;;  %6976 = vst [vmem:[#allocation12_spill] sm:$0xff] %v6609_v55 }
 0x55c   :  { %2652 = vmatpush1.bf16.msra.mxu0 %v6579_v25  ;;  %2679 = vmatpush1.bf16.msra.mxu1 %v5606_v28 }
 0x55d   :  { %2653 = vmatprep.subr.bf16.mxu0 %v6582_v27  ;;  %2680 = vmatprep.subr.bf16.mxu1 %v5614_v33 }
 0x560   :  { %2654 = vmatpush1.bf16.msra.mxu0 %v6585_v53  ;;  %2681 = vmatpush1.bf16.msra.mxu1 %v5612_v36  ;;  %v6621_v36 = vrot.slane %v408_v6, %v6434_v8  ;;  %v5621_v6 = vld [vmem:[#allocation5 + $0xe0] ss:$12 sps:$4 sm:$0xff]  }
 0x561   :  { %2655 = vmatprep.subr.bf16.mxu0 %v6588_v34  ;;  %4881 = vmatprep.subr.bf16.mxu1 %v5618_v54 }
 0x562   :  { %6979 = vst [vmem:[#allocation15_spill] sm:$0xff] %v6621_v36 }
 0x564   :  { %2656 = vmatpush1.bf16.msra.mxu0 %v6591_v39 }
 0x565   :  { %5076 = vmatprep.subr.bf16.mxu0 %v6961_v19 }
 0x5e8   :  { %v2174_v62 = vpop.xlane.xlu1 %2173 }
 0x5e9   :  { %v2177_v63 = vsub.f32 %v2174_v62, %v2176_v60 }
 0x5eb   :  { %v2178_v1 = vmul.f32 0.0033333334, %v2177_v63 }
 0x5ed   :  { %v2179_v2 = vadd.f32 1e-05, %v2178_v1 }
 0x5ef   :  { %5646 = vrsqrt.f32 %v2179_v2 }
 0x5f9   :  { %v5647_v17 = vpop.eup %5646 }
 0x5fa   :  { %v2182_v26 = vmul.f32 %v5647_v17, %v6549_v57  ;;  %v2183_v28 = vmul.f32 %v5647_v17, %v6551_v58  ;;  %v2181_v33 = vmul.f32 %v5647_v17, %v6547_v56  ;;  %v5619_v57 = vld [vmem:[#allocation5 + $0x8] ss:$12 sps:$4 sm:$0xff]   ;;  %v5622_v17 = vld [vmem:[#allocation5 + $0x20] ss:$12 sps:$4 sm:$0xff]  }
 0x5fc   :  { %v2201_v54 = vmul.f32 %v6603_v7, %v2182_v26  ;;  %v2202_v59 = vmul.f32 %v6606_v15, %v2183_v28  ;;  %v2200_v60 = vmul.f32 %v6609_v55, %v2181_v33  ;;  %v5623_v26 = vld [vmem:[#allocation5 + $0x1a0] ss:$12 sps:$4 sm:$0xff]   ;;  %v5624_v28 = vld [vmem:[#allocation5 + $0xf8] ss:$12 sps:$4 sm:$0xff]  }
 0x5fd   :  { %v5625_v33 = vld [vmem:[#allocation5 + $0x38] ss:$12 sps:$4 sm:$0xff]  }
 0x5fe   :  { %v2220_v62 = vadd.f32 %v6612_v22, %v2201_v54  ;;  %v2221_v63 = vadd.f32 %v6615_v24, %v2202_v59  ;;  %v2219_v1 = vadd.f32 %v6621_v36, %v2200_v60  ;;  %v5626_v54 = vld [vmem:[#allocation5 + $0x1b8] ss:$12 sps:$4 sm:$0xff]   ;;  %v5627_v59 = vld [vmem:[#allocation5 + $0x110] ss:$12 sps:$4 sm:$0xff]  }
 0x5ff   :  { %v5628_v60 = vld [vmem:[#allocation5 + $0x50] ss:$12 sps:$4 sm:$0xff]  }
 0x600   :  { %v2223_v2 = vpack.c.bf16 %v2220_v62, %v2220_v62  ;;  %v6629_v58 = vpack.c.bf16 %v2221_v63, %v2221_v63  ;;  %v2222_v56 = vpack.c.bf16 %v2219_v1, %v2219_v1  ;;  %v5629_v62 = vld [vmem:[#allocation5 + $0x1d0] ss:$12 sps:$4 sm:$0xff]   ;;  %v5630_v63 = vld [vmem:[#allocation5 + $0x128] ss:$12 sps:$4 sm:$0xff]  }
 0x601   :  { %v5631_v1 = vld [vmem:[#allocation5 + $0x68] ss:$12 sps:$4 sm:$0xff]  }
 0x602   :  { %2657 = vmatprep.mubr.bf16.mxu0 %v2223_v2  ;;  %2699 = vmatmul.mubr.bf16.vlgmr.msra.gmra.mrb[32].mxu1 %v6629_v58 }
 0x603   :  { %4882 = vmatpush3.bf16.msra.mxu1 %v5619_v57  ;;  %2658 = vmatmul.mubr.bf16.vlgmr.msra.gmra.mrb[16].mxu0 %v2222_v56  ;;  %v5632_v57 = vld [vmem:[#allocation5 + $0x1e8] ss:$12 sps:$4 sm:$0xff]  }
 0x604   :  { %2739 = vmatprep.mubr.bf16.mxu1 %v2223_v2  ;;  %5077 = vmatpush3.bf16.msra.mxu0 %v5620_v3  ;;  %v5633_v2 = vld [vmem:[#allocation5 + $0x140] ss:$12 sps:$4 sm:$0xff]  }
 0x605   :  { %4883 = vmatprep.subr.bf16.mxu1 %v5621_v6  ;;  %5078 = vmatprep.subr.bf16.mxu0 %v6961_v19  ;;  %v5634_v3 = vld [vmem:[#allocation5 + $0x80] ss:$12 sps:$4 sm:$0xff]  }
 0x606   :  { %5092 = vmatprep.mubr.msk.bf16.mxu0 %vm6300_vm0, %v6961_v19  ;;  %v5635_v6 = vld [vmem:[#allocation5 + $0x200] ss:$12 sps:$4 sm:$0xff]  }
 0x607   :  { %4884 = vmatpush3.bf16.msra.mxu1 %v5622_v17  ;;  %v5636_v17 = vld [vmem:[#allocation5 + $0x158] ss:$12 sps:$4 sm:$0xff]  }
 0x608   :  { %5079 = vmatpush3.bf16.msra.mxu0 %v5623_v26  ;;  %4885 = vmatprep.subr.bf16.mxu1 %v5624_v28  ;;  %v5637_v26 = vld [vmem:[#allocation5 + $0x98] ss:$12 sps:$4 sm:$0xff]  }
 0x609   :  { %5080 = vmatprep.subr.bf16.mxu0 %v6961_v19  ;;  %v5638_v28 = vld [vmem:[#allocation5 + $0x218] ss:$12 sps:$4 sm:$0xff]  }
 0x60b   :  { %4886 = vmatpush3.bf16.msra.mxu1 %v5625_v33  ;;  %v5639_v33 = vld [vmem:[#allocation5 + $0x170] ss:$12 sps:$4 sm:$0xff]  }
 0x60c   :  { %5081 = vmatpush3.bf16.msra.mxu0 %v5626_v54  ;;  %4887 = vmatprep.subr.bf16.mxu1 %v5627_v59  ;;  %v5640_v54 = vld [vmem:[#allocation5 + $0xb0] ss:$12 sps:$4 sm:$0xff]  }
 0x60d   :  { %5082 = vmatprep.subr.bf16.mxu0 %v6961_v19  ;;  %v5641_v59 = vld [vmem:[#allocation5 + $0x230] ss:$12 sps:$4 sm:$0xff]  }
 0x60f   :  { %4888 = vmatpush3.bf16.msra.mxu1 %v5628_v60  ;;  %v5669_v60 = vld [vmem:[#allocation2 + $0x4] ss:$36 sps:$4 sm:$0xff]  }
 0x610   :  { %5083 = vmatpush3.bf16.msra.mxu0 %v5629_v62  ;;  %4889 = vmatprep.subr.bf16.mxu1 %v5630_v63  ;;  %v5670_v62 = vld [vmem:[#allocation2 + $0x484] ss:$36 sps:$4 sm:$0xff]  }
 0x611   :  { %5084 = vmatprep.subr.bf16.mxu0 %v6961_v19  ;;  %v5671_v63 = vld [vmem:[#allocation2] ss:$36 sps:$4 sm:$0xff]  }
 0x613   :  { %4890 = vmatpush3.bf16.msra.mxu1 %v5631_v1  ;;  %v5672_v1 = vld [vmem:[#allocation2 + $0x4c] ss:$36 sps:$4 sm:$0xff]  }
 0x614   :  { %5085 = vmatpush3.bf16.msra.mxu0 %v5632_v57  ;;  %4891 = vmatprep.subr.bf16.mxu1 %v5633_v2  ;;  %v5673_v57 = vld [vmem:[#allocation2 + $0x480] ss:$36 sps:$4 sm:$0xff]   ;;  %v5674_v2 = vld [vmem:[#allocation2 + $0x4cc] ss:$36 sps:$4 sm:$0xff]  }
 0x615   :  { %5086 = vmatprep.subr.bf16.mxu0 %v6961_v19 }
 0x617   :  { %4892 = vmatpush3.bf16.msra.mxu1 %v5634_v3  ;;  %v5675_v3 = vld [vmem:[#allocation2 + $0x48] ss:$36 sps:$4 sm:$0xff]  }
 0x618   :  { %5087 = vmatpush3.bf16.msra.mxu0 %v5635_v6  ;;  %4893 = vmatprep.subr.bf16.mxu1 %v5636_v17  ;;  %v5676_v6 = vld [vmem:[#allocation2 + $0x94] ss:$36 sps:$4 sm:$0xff]   ;;  %v5677_v17 = vld [vmem:[#allocation2 + $0x4c8] ss:$36 sps:$4 sm:$0xff]  }
 0x619   :  { %5088 = vmatprep.subr.bf16.mxu0 %v6961_v19 }
 0x61b   :  { %4894 = vmatpush3.bf16.msra.mxu1 %v5637_v26  ;;  %v5678_v26 = vld [vmem:[#allocation2 + $0x514] ss:$36 sps:$4 sm:$0xff]  }
 0x61c   :  { %5089 = vmatpush3.bf16.msra.mxu0 %v5638_v28  ;;  %4895 = vmatprep.subr.bf16.mxu1 %v5639_v33  ;;  %v5681_v28 = vld [vmem:[#allocation2 + $0x510] ss:$36 sps:$4 sm:$0xff]   ;;  %v5682_v33 = vld [vmem:[#allocation2 + $0x55c] ss:$36 sps:$4 sm:$0xff]  }
 0x61d   :  { %5090 = vmatprep.subr.bf16.mxu0 %v6961_v19 }
 0x61f   :  { %4896 = vmatpush3.bf16.msra.mxu1 %v5640_v54  ;;  %v5683_v54 = vld [vmem:[#allocation2 + $0xd8] ss:$36 sps:$4 sm:$0xff]  }
 0x620   :  { %5091 = vmatpush3.bf16.msra.mxu0 %v5641_v59  ;;  %2855 = vmatprep.subr.bf16.mxu1 %v5669_v60  ;;  %v5684_v59 = vld [vmem:[#allocation2 + $0x124] ss:$36 sps:$4 sm:$0xff]   ;;  %v5685_v60 = vld [vmem:[#allocation2 + $0x558] ss:$36 sps:$4 sm:$0xff]  }
 0x621   :  { %2896 = vmatprep.subr.bf16.mxu0 %v5670_v62  ;;  %v5686_v62 = vld [vmem:[#allocation2 + $0x5a4] ss:$36 sps:$4 sm:$0xff]  }
 0x622   :  { %2740 = vmatmul.mubr.bf16.vlgmr.msra.gmra.mrb[36].mxu1 %v2222_v56  ;;  %v5679_v56 = vld [vmem:[#allocation2 + $0x90] ss:$36 sps:$4 sm:$0xff]  }
 0x623   :  { %5093 = vmatmul.mubr.bf16.vlgmr.msra.gmra.mrb[20].mxu0 %v6629_v58  ;;  %2856 = vmatpush1.bf16.msra.mxu1 %v5671_v63  ;;  %v5680_v58 = vld [vmem:[#allocation2 + $0xdc] ss:$36 sps:$4 sm:$0xff]  }
 0x624   :  { %2857 = vmatprep.subr.bf16.mxu1 %v5672_v1  ;;  %2897 = vmatpush1.bf16.msra.mxu0 %v5673_v57  ;;  %v5687_v63 = vld [vmem:[#allocation2 + $0x120] ss:$36 sps:$4 sm:$0xff]   ;;  %v5688_v1 = vld [vmem:[#allocation2 + $0x16c] ss:$36 sps:$4 sm:$0xff]  }
 0x625   :  { %2898 = vmatprep.subr.bf16.mxu0 %v5674_v2  ;;  %2928 = vmatprep.mubr.bf16.mxu0 %v6963_v0  ;;  %v5689_v57 = vld [vmem:[#allocation2 + $0x5a0] ss:$36 sps:$4 sm:$0xff]   ;;  %v5690_v2 = vld [vmem:[#allocation2 + $0x5ec] ss:$36 sps:$4 sm:$0xff]  }
 0x627   :  { %2858 = vmatpush1.bf16.msra.mxu1 %v5675_v3  ;;  %v5691_v3 = vld [vmem:[#allocation2 + $0x168] ss:$36 sps:$4 sm:$0xff]  }
 0x628   :  { %2859 = vmatprep.subr.bf16.mxu1 %v5676_v6  ;;  %2899 = vmatpush1.bf16.msra.mxu0 %v5677_v17  ;;  %v5692_v6 = vld [vmem:[#allocation2 + $0x1b4] ss:$36 sps:$4 sm:$0xff]   ;;  %v5693_v17 = vld [vmem:[#allocation2 + $0x5e8] ss:$36 sps:$4 sm:$0xff]  }
 0x629   :  { %2900 = vmatprep.subr.bf16.mxu0 %v5678_v26  ;;  %v5694_v26 = vld [vmem:[#allocation2 + $0x634] ss:$36 sps:$4 sm:$0xff]  }
 0x62b   :  { %2860 = vmatpush1.bf16.msra.mxu1 %v5679_v56  ;;  %v5695_v56 = vld [vmem:[#allocation2 + $0x1b0] ss:$36 sps:$4 sm:$0xff]  }
 0x62c   :  { %2861 = vmatprep.subr.bf16.mxu1 %v5680_v58  ;;  %2901 = vmatpush1.bf16.msra.mxu0 %v5681_v28  ;;  %v5696_v58 = vld [vmem:[#allocation2 + $0x1fc] ss:$36 sps:$4 sm:$0xff]   ;;  %v5697_v28 = vld [vmem:[#allocation2 + $0x630] ss:$36 sps:$4 sm:$0xff]  }
 0x62d   :  { %2902 = vmatprep.subr.bf16.mxu0 %v5682_v33  ;;  %v5698_v33 = vld [vmem:[#allocation2 + $0x67c] ss:$36 sps:$4 sm:$0xff]  }
 0x62f   :  { %2862 = vmatpush1.bf16.msra.mxu1 %v5683_v54  ;;  %v5699_v54 = vld [vmem:[#allocation2 + $0x1f8] ss:$36 sps:$4 sm:$0xff]  }
 0x630   :  { %2863 = vmatprep.subr.bf16.mxu1 %v5684_v59  ;;  %2903 = vmatpush1.bf16.msra.mxu0 %v5685_v60  ;;  %v5700_v59 = vld [vmem:[#allocation2 + $0x244] ss:$36 sps:$4 sm:$0xff]   ;;  %v5701_v60 = vld [vmem:[#allocation2 + $0x678] ss:$36 sps:$4 sm:$0xff]  }
 0x631   :  { %2904 = vmatprep.subr.bf16.mxu0 %v5686_v62  ;;  %v5702_v62 = vld [vmem:[#allocation2 + $0xc] ss:$36 sps:$4 sm:$0xff]  }
 0x633   :  { %2864 = vmatpush1.bf16.msra.mxu1 %v5687_v63  ;;  %v5703_v63 = vld [vmem:[#allocation2 + $0x240] ss:$36 sps:$4 sm:$0xff]  }
 0x634   :  { %2865 = vmatprep.subr.bf16.mxu1 %v5688_v1  ;;  %2905 = vmatpush1.bf16.msra.mxu0 %v5689_v57  ;;  %v5704_v1 = vld [vmem:[#allocation2 + $0x28c] ss:$36 sps:$4 sm:$0xff]  }
 0x635   :  { %2906 = vmatprep.subr.bf16.mxu0 %v5690_v2  ;;  %v5705_v57 = vld [vmem:[#allocation2 + $0x288] ss:$36 sps:$4 sm:$0xff]   ;;  %v5706_v2 = vld [vmem:[#allocation2 + $0x2d4] ss:$36 sps:$4 sm:$0xff]  }
 0x637   :  { %2866 = vmatpush1.bf16.msra.mxu1 %v5691_v3  ;;  %v5707_v3 = vld [vmem:[#allocation2 + $0x2d0] ss:$36 sps:$4 sm:$0xff]  }
 0x638   :  { %2867 = vmatprep.subr.bf16.mxu1 %v5692_v6  ;;  %2907 = vmatpush1.bf16.msra.mxu0 %v5693_v17  ;;  %v5708_v6 = vld [vmem:[#allocation2 + $0x31c] ss:$36 sps:$4 sm:$0xff]  }
 0x639   :  { %2908 = vmatprep.subr.bf16.mxu0 %v5694_v26  ;;  %v5709_v17 = vld [vmem:[#allocation2 + $0x318] ss:$36 sps:$4 sm:$0xff]   ;;  %v5710_v26 = vld [vmem:[#allocation2 + $0x364] ss:$36 sps:$4 sm:$0xff]  }
 0x63b   :  { %2868 = vmatpush1.bf16.msra.mxu1 %v5695_v56  ;;  %v5711_v56 = vld [vmem:[#allocation2 + $0x360] ss:$36 sps:$4 sm:$0xff]  }
 0x63c   :  { %2869 = vmatprep.subr.bf16.mxu1 %v5696_v58  ;;  %2909 = vmatpush1.bf16.msra.mxu0 %v5697_v28  ;;  %v5712_v58 = vld [vmem:[#allocation2 + $0x3ac] ss:$36 sps:$4 sm:$0xff]  }
 0x63d   :  { %2910 = vmatprep.subr.bf16.mxu0 %v5698_v33  ;;  %v5713_v28 = vld [vmem:[#allocation2 + $0x3a8] ss:$36 sps:$4 sm:$0xff]   ;;  %v5714_v33 = vld [vmem:[#allocation2 + $0x3f4] ss:$36 sps:$4 sm:$0xff]  }
 0x63f   :  { %2870 = vmatpush1.bf16.msra.mxu1 %v5699_v54  ;;  %v5715_v54 = vld [vmem:[#allocation2 + $0x3f0] ss:$36 sps:$4 sm:$0xff]  }
 0x640   :  { %2871 = vmatprep.subr.bf16.mxu1 %v5700_v59  ;;  %2911 = vmatpush1.bf16.msra.mxu0 %v5701_v60  ;;  %v5716_v59 = vld [vmem:[#allocation2 + $0x43c] ss:$36 sps:$4 sm:$0xff]  }
 0x641   :  { %2937 = vmatprep.subr.bf16.mxu0 %v5702_v62  ;;  %v5717_v60 = vld [vmem:[#allocation2 + $0x438] ss:$36 sps:$4 sm:$0xff]   ;;  %v5718_v62 = vld [vmem:[#allocation2 + $0x48c] ss:$36 sps:$4 sm:$0xff]  }
 0x643   :  { %2872 = vmatpush1.bf16.msra.mxu1 %v5703_v63  ;;  %v406_v63 = vld [vmem:[%s6957_s7] sm:$0x7] }
 0x644   :  { %2873 = vmatprep.subr.bf16.mxu1 %v5704_v1  ;;  %v6647_v1 = vrot.slane %v406_v63, %v6434_v8  ;;  %v6655_v19 = vrot.slane %v406_v63, %v6451_v29 }
 0x647   :  { %2874 = vmatpush1.bf16.msra.mxu1 %v5705_v57  ;;  %v6650_v57 = vrot.slane %v406_v63, %v6425_v47 }
 0x648   :  { %2875 = vmatprep.subr.bf16.mxu1 %v5706_v2 }
 0x64b   :  { %2876 = vmatpush1.bf16.msra.mxu1 %v5707_v3 }
 0x64c   :  { %2877 = vmatprep.subr.bf16.mxu1 %v5708_v6 }
 0x64f   :  { %2878 = vmatpush1.bf16.msra.mxu1 %v5709_v17 }
 0x650   :  { %2879 = vmatprep.subr.bf16.mxu1 %v5710_v26 }
 0x653   :  { %2880 = vmatpush1.bf16.msra.mxu1 %v5711_v56 }
 0x654   :  { %2881 = vmatprep.subr.bf16.mxu1 %v5712_v58 }
 0x657   :  { %2882 = vmatpush1.bf16.msra.mxu1 %v5713_v28 }
 0x658   :  { %2883 = vmatprep.subr.bf16.mxu1 %v5714_v33 }
 0x65b   :  { %2884 = vmatpush1.bf16.msra.mxu1 %v5715_v54 }
 0x65c   :  { %2885 = vmatprep.subr.bf16.mxu1 %v5716_v59 }
 0x65f   :  { %2886 = vmatpush1.bf16.msra.mxu1 %v5717_v60 }
 0x660   :  { %2978 = vmatprep.subr.bf16.mxu1 %v5718_v62 }
 0x6d5   :  { %v2700_v2 = vpop.f32.mrb[32].mxu1 }
 0x6d6   :  { %v2659_v3 = vpop.f32.mrb[16].mxu0  ;;  %v2702_v6 = vpop.f32.mrb[33].mxu1 }
 0x6d7   :  { %v2660_v17 = vadd.f32 %v2659_v3, %v6647_v1  ;;  %v2661_v26 = vpop.f32.mrb[17].mxu0  ;;  %v2704_v56 = vpop.f32.mrb[34].mxu1 }
 0x6d8   :  { %v2662_v58 = vadd.f32 %v2661_v26, %v6650_v57  ;;  %v2663_v28 = vpop.f32.mrb[18].mxu0  ;;  %v2705_v33 = vpop.f32.mrb[35].mxu1 }
 0x6d9   :  { %v2701_v54 = vadd.f32 %v2700_v2, %v2660_v17  ;;  %v2664_v59 = vpop.f32.mrb[19].mxu0 }
 0x6da   :  { %v2703_v60 = vadd.f32 %v2702_v6, %v2662_v58 }
 0x6db   :  { %v2787_v56 = vadd.f32 %v6484_v11, %v2701_v54 }
 0x6dc   :  { %v2788_v26 = vadd.f32 %v6490_v14, %v2703_v60 }
 0x6de   :  { %v2790_v58 = vadd.f32 %v2788_v26, %v2787_v56 }
 0x6f5   :  { %v4897_v62 = vpop.f32.mrb[36].mxu1 }
 0x6f6   :  { %v4898_v0 = vpop.f32.mrb[37].mxu1  ;;  %v2781_v36 = vpop.f32.mrb[20].mxu0 }
 0x6f7   :  { %v4899_v24 = vadd.f32 %v4898_v0, %v4897_v62  ;;  %v4900_v22 = vpop.f32.mrb[38].mxu1  ;;  %v5094_v55 = vpop.f32.mrb[21].mxu0 }
 0x6f8   :  { %v4901_v15 = vpop.f32.mrb[39].mxu1  ;;  %v2784_v3 = vpop.f32.mrb[22].mxu0 }
 0x6f9   :  { %v2742_v28 = vadd.f32 %v4899_v24, %v6655_v19  ;;  %v5095_v2 = vpop.f32.mrb[23].mxu0 }
 0x6fa   :  { %v409_v2 = vld [vmem:[%s6958_s8] sm:$0x7] }
 0x6fb   :  { %v2782_v17 = vadd.f32 %v2781_v36, %v2742_v28 }
 0x6fd   :  { %v2789_v6 = vadd.f32 %v6496_v18, %v2782_v17  ;;  %v6671_v17 = vrot.slane %v409_v2, %v6451_v29 }
 0x6ff   :  { %v2791_v63 = vadd.f32 %v2790_v58, %v2789_v6 }
 0x701   :  { %2792 = vadd.xlane.f32.xlu0 %v2791_v63 }
 0x78e   :  { %v2793_v33 = vpop.xlane.xlu0 %2792 }
 0x78f   :  { %v2794_v59 = vmul.f32 0.0033333334, %v2793_v33 }
 0x791   :  { %v2795_v0 = vsub.f32 %v2787_v56, %v2794_v59  ;;  %v2796_v22 = vsub.f32 %v2788_v26, %v2794_v59  ;;  %v2797_v55 = vsub.f32 %v2789_v6, %v2794_v59  ;;  %v2805_v14 = vmul.f32 84.0, %v2794_v59  ;;  %v410_v56 = vld [vmem:[%s6959_s9] sm:$0x7] }
 0x792   :  { %v6668_v26 = vrot.slane %v409_v2, %v6425_v47  ;;  %v6674_v6 = vrot.slane %v409_v2, %v6434_v8  ;;  %v6677_v63 = vrot.slane %v410_v56, %v6425_v47  ;;  %v6680_v33 = vrot.slane %v410_v56, %v6451_v29  ;;  %v5723_v2 = vld [vmem:[#allocation2 + $0x50] ss:$36 sps:$4 sm:$0xff]  }
 0x793   :  { %v2798_v15 = vmul.f32 %v2795_v0, %v2795_v0  ;;  %v2799_v62 = vmul.f32 %v2796_v22, %v2796_v22  ;;  %v2800_v3 = vmul.f32 %v2797_v55, %v2797_v55  ;;  %v2806_v24 = vmul.f32 %v2805_v14, %v2794_v59 }
 0x795   :  { %v2801_v11 = vadd.f32 %v2799_v62, %v2798_v15 }
 0x797   :  { %v2802_v54 = vadd.f32 %v2801_v11, %v2800_v3  ;;  %v6683_v3 = vrot.slane %v410_v56, %v6434_v8  ;;  %v5724_v56 = vld [vmem:[#allocation2 + $0x4d0] ss:$36 sps:$4 sm:$0xff]  }
 0x799   :  { %2803 = vadd.xlane.f32.xlu1 %v2802_v54 }
 0x826   :  { %v2804_v60 = vpop.xlane.xlu1 %2803 }
 0x827   :  { %v2807_v36 = vsub.f32 %v2804_v60, %v2806_v24  ;;  %v5720_v60 = vld [vmem:[#allocation2 + $0x488] ss:$36 sps:$4 sm:$0xff]  }
 0x829   :  { %v2808_v28 = vmul.f32 0.0033333334, %v2807_v36  ;;  %v5721_v36 = vld [vmem:[#allocation2 + $0x54] ss:$36 sps:$4 sm:$0xff]  }
 0x82b   :  { %v2809_v18 = vadd.f32 1e-05, %v2808_v28  ;;  %v5722_v28 = vld [vmem:[#allocation2 + $0x4d4] ss:$36 sps:$4 sm:$0xff]  }
 0x82d   :  { %5648 = vrsqrt.f32 %v2809_v18  ;;  %v6980_v18 = vmov 0  }
 0x837   :  { %v5649_v58 = vpop.eup %5648 }
 0x838   :  { %v2812_v59 = vmul.f32 %v5649_v58, %v2796_v22  ;;  %v2813_v15 = vmul.f32 %v5649_v58, %v2797_v55  ;;  %v2811_v62 = vmul.f32 %v5649_v58, %v2795_v0  ;;  %v5719_v55 = vld [vmem:[#allocation2 + $0x8] ss:$36 sps:$4 sm:$0xff]   ;;  %v5725_v58 = vld [vmem:[#allocation2 + $0x9c] ss:$36 sps:$4 sm:$0xff]  }
 0x83a   :  { %v2831_v11 = vmul.f32 %v6668_v26, %v2812_v59  ;;  %v2832_v54 = vmul.f32 %v6671_v17, %v2813_v15  ;;  %v2830_v14 = vmul.f32 %v6674_v6, %v2811_v62  ;;  %v5726_v59 = vld [vmem:[#allocation2 + $0x51c] ss:$36 sps:$4 sm:$0xff]  }
 0x83b   :  { %v5727_v15 = vld [vmem:[#allocation2 + $0x98] ss:$36 sps:$4 sm:$0xff]  }
 0x83c   :  { %v6689_v24 = vadd.f32 %v6677_v63, %v2831_v11  ;;  %v6692_v47 = vadd.f32 %v6680_v33, %v2832_v54  ;;  %v6695_v29 = vadd.f32 %v6683_v3, %v2830_v14  ;;  %v5728_v62 = vld [vmem:[#allocation2 + $0x518] ss:$36 sps:$4 sm:$0xff]   ;;  %v5729_v11 = vld [vmem:[#allocation2 + $0xe4] ss:$36 sps:$4 sm:$0xff]  }
 0x83d   :  { %v5730_v54 = vld [vmem:[#allocation2 + $0x564] ss:$36 sps:$4 sm:$0xff]  }
 0x83e   :  { %v6699_v0 = vpack.c.bf16 %v6689_v24, %v6689_v24  ;;  %v6703_v8 = vpack.c.bf16 %v6692_v47, %v6692_v47  ;;  %v6707_v22 = vpack.c.bf16 %v6695_v29, %v6695_v29  ;;  %v5731_v14 = vld [vmem:[#allocation2 + $0xe0] ss:$36 sps:$4 sm:$0xff]  }
 0x840   :  { %2887 = vmatprep.mubr.bf16.mxu1 %v6699_v0  ;;  %2929 = vmatmul.mubr.bf16.vlgmr.msra.gmra.mrb[24].mxu0 %v6703_v8 }
 0x841   :  { %2938 = vmatpush1.bf16.msra.mxu0 %v5719_v55  ;;  %2888 = vmatmul.mubr.bf16.vlgmr.msra.gmra.mrb[40].mxu1 %v6707_v22  ;;  %v5732_v55 = vld [vmem:[#allocation2 + $0x560] ss:$36 sps:$4 sm:$0xff]  }
 0x842   :  { %2969 = vmatprep.mubr.bf16.mxu0 %v6699_v0  ;;  %2979 = vmatpush1.bf16.msra.mxu1 %v5720_v60  ;;  %v5733_v60 = vld [vmem:[#allocation2 + $0x12c] ss:$36 sps:$4 sm:$0xff]  }
 0x843   :  { %2939 = vmatprep.subr.bf16.mxu0 %v5721_v36  ;;  %2980 = vmatprep.subr.bf16.mxu1 %v5722_v28  ;;  %v5734_v36 = vld [vmem:[#allocation2 + $0x5ac] ss:$36 sps:$4 sm:$0xff]  }
 0x844   :  { %3010 = vmatprep.mubr.bf16.mxu1 %v6980_v18  ;;  %v5735_v28 = vld [vmem:[#allocation2 + $0x128] ss:$36 sps:$4 sm:$0xff]  }
 0x845   :  { %2940 = vmatpush1.bf16.msra.mxu0 %v5723_v2  ;;  %v5736_v2 = vld [vmem:[#allocation2 + $0x5a8] ss:$36 sps:$4 sm:$0xff]  }
 0x846   :  { %2981 = vmatpush1.bf16.msra.mxu1 %v5724_v56  ;;  %2941 = vmatprep.subr.bf16.mxu0 %v5725_v58  ;;  %v5737_v56 = vld [vmem:[#allocation2 + $0x174] ss:$36 sps:$4 sm:$0xff]  }
 0x847   :  { %2982 = vmatprep.subr.bf16.mxu1 %v5726_v59  ;;  %v5738_v58 = vld [vmem:[#allocation2 + $0x5f4] ss:$36 sps:$4 sm:$0xff]  }
 0x848   :  { %v5739_v59 = vld [vmem:[#allocation2 + $0x170] ss:$36 sps:$4 sm:$0xff]  }
 0x849   :  { %2942 = vmatpush1.bf16.msra.mxu0 %v5727_v15  ;;  %v5740_v15 = vld [vmem:[#allocation2 + $0x5f0] ss:$36 sps:$4 sm:$0xff]  }
 0x84a   :  { %2983 = vmatpush1.bf16.msra.mxu1 %v5728_v62  ;;  %2943 = vmatprep.subr.bf16.mxu0 %v5729_v11  ;;  %v5741_v62 = vld [vmem:[#allocation2 + $0x1bc] ss:$36 sps:$4 sm:$0xff]  }
 0x84b   :  { %2984 = vmatprep.subr.bf16.mxu1 %v5730_v54  ;;  %v5742_v11 = vld [vmem:[#allocation2 + $0x63c] ss:$36 sps:$4 sm:$0xff]  }
 0x84c   :  { %v5743_v54 = vld [vmem:[#allocation2 + $0x1b8] ss:$36 sps:$4 sm:$0xff]  }
 0x84d   :  { %2944 = vmatpush1.bf16.msra.mxu0 %v5731_v14  ;;  %v5744_v14 = vld [vmem:[#allocation2 + $0x638] ss:$36 sps:$4 sm:$0xff]  }
 0x84e   :  { %2985 = vmatpush1.bf16.msra.mxu1 %v5732_v55  ;;  %2945 = vmatprep.subr.bf16.mxu0 %v5733_v60  ;;  %v5745_v55 = vld [vmem:[#allocation2 + $0x204] ss:$36 sps:$4 sm:$0xff]  }
 0x84f   :  { %2986 = vmatprep.subr.bf16.mxu1 %v5734_v36  ;;  %v5746_v60 = vld [vmem:[#allocation2 + $0x684] ss:$36 sps:$4 sm:$0xff]  }
 0x850   :  { %v5747_v36 = vld [vmem:[#allocation2 + $0x200] ss:$36 sps:$4 sm:$0xff]  }
 0x851   :  { %2946 = vmatpush1.bf16.msra.mxu0 %v5735_v28  ;;  %v5748_v28 = vld [vmem:[#allocation2 + $0x680] ss:$36 sps:$4 sm:$0xff]  }
 0x852   :  { %2987 = vmatpush1.bf16.msra.mxu1 %v5736_v2  ;;  %2947 = vmatprep.subr.bf16.mxu0 %v5737_v56  ;;  %v5749_v2 = vld [vmem:[#allocation2 + $0x24c] ss:$36 sps:$4 sm:$0xff]   ;;  %v5750_v56 = vld [vmem:[#allocation2 + $0x14] ss:$36 sps:$4 sm:$0xff]  }
 0x853   :  { %2988 = vmatprep.subr.bf16.mxu1 %v5738_v58  ;;  %v5751_v58 = vld [vmem:[#allocation2 + $0x248] ss:$36 sps:$4 sm:$0xff]  }
 0x855   :  { %2948 = vmatpush1.bf16.msra.mxu0 %v5739_v59  ;;  %v5752_v59 = vld [vmem:[#allocation2 + $0x10] ss:$36 sps:$4 sm:$0xff]  }
 0x856   :  { %2989 = vmatpush1.bf16.msra.mxu1 %v5740_v15  ;;  %2949 = vmatprep.subr.bf16.mxu0 %v5741_v62  ;;  %v5753_v15 = vld [vmem:[#allocation2 + $0x294] ss:$36 sps:$4 sm:$0xff]   ;;  %v5754_v62 = vld [vmem:[#allocation2 + $0x5c] ss:$36 sps:$4 sm:$0xff]  }
 0x857   :  { %2990 = vmatprep.subr.bf16.mxu1 %v5742_v11  ;;  %v5755_v11 = vld [vmem:[#allocation2 + $0x290] ss:$36 sps:$4 sm:$0xff]  }
 0x859   :  { %2950 = vmatpush1.bf16.msra.mxu0 %v5743_v54  ;;  %v5756_v54 = vld [vmem:[#allocation2 + $0x58] ss:$36 sps:$4 sm:$0xff]  }
 0x85a   :  { %2991 = vmatpush1.bf16.msra.mxu1 %v5744_v14  ;;  %2951 = vmatprep.subr.bf16.mxu0 %v5745_v55  ;;  %v5757_v14 = vld [vmem:[#allocation2 + $0x2dc] ss:$36 sps:$4 sm:$0xff]   ;;  %v5758_v55 = vld [vmem:[#allocation2 + $0xa4] ss:$36 sps:$4 sm:$0xff]  }
 0x85b   :  { %2992 = vmatprep.subr.bf16.mxu1 %v5746_v60  ;;  %v5759_v60 = vld [vmem:[#allocation2 + $0x2d8] ss:$36 sps:$4 sm:$0xff]  }
 0x85d   :  { %2952 = vmatpush1.bf16.msra.mxu0 %v5747_v36  ;;  %v5760_v36 = vld [vmem:[#allocation2 + $0xa0] ss:$36 sps:$4 sm:$0xff]  }
 0x85e   :  { %2993 = vmatpush1.bf16.msra.mxu1 %v5748_v28  ;;  %2953 = vmatprep.subr.bf16.mxu0 %v5749_v2  ;;  %v5761_v28 = vld [vmem:[#allocation2 + $0x324] ss:$36 sps:$4 sm:$0xff]   ;;  %v5762_v2 = vld [vmem:[#allocation2 + $0xec] ss:$36 sps:$4 sm:$0xff]  }
 0x85f   :  { %3019 = vmatprep.subr.bf16.mxu1 %v5750_v56  ;;  %v5763_v56 = vld [vmem:[#allocation2 + $0x320] ss:$36 sps:$4 sm:$0xff]  }
 0x861   :  { %2954 = vmatpush1.bf16.msra.mxu0 %v5751_v58  ;;  %3011 = vmatmul.mubr.bf16.vlgmr.msra.gmra.mrb[44].mxu1 %v6703_v8  ;;  %v5764_v58 = vld [vmem:[#allocation2 + $0xe8] ss:$36 sps:$4 sm:$0xff]  }
 0x862   :  { %3020 = vmatpush1.bf16.msra.mxu1 %v5752_v59  ;;  %3051 = vmatprep.mubr.bf16.mxu1 %v6699_v0  ;;  %v5765_v59 = vld [vmem:[#allocation2 + $0x36c] ss:$36 sps:$4 sm:$0xff]  }
 0x863   :  { %2955 = vmatprep.subr.bf16.mxu0 %v5753_v15  ;;  %3021 = vmatprep.subr.bf16.mxu1 %v5754_v62  ;;  %v5766_v15 = vld [vmem:[#allocation2 + $0x134] ss:$36 sps:$4 sm:$0xff]   ;;  %v5767_v62 = vld [vmem:[#allocation2 + $0x368] ss:$36 sps:$4 sm:$0xff]  }
 0x865   :  { %2956 = vmatpush1.bf16.msra.mxu0 %v5755_v11  ;;  %v5768_v11 = vld [vmem:[#allocation2 + $0x130] ss:$36 sps:$4 sm:$0xff]  }
 0x866   :  { %3022 = vmatpush1.bf16.msra.mxu1 %v5756_v54  ;;  %2957 = vmatprep.subr.bf16.mxu0 %v5757_v14  ;;  %v5769_v54 = vld [vmem:[#allocation2 + $0x3b4] ss:$36 sps:$4 sm:$0xff]   ;;  %v5770_v14 = vld [vmem:[#allocation2 + $0x17c] ss:$36 sps:$4 sm:$0xff]  }
 0x867   :  { %3023 = vmatprep.subr.bf16.mxu1 %v5758_v55  ;;  %v5771_v55 = vld [vmem:[#allocation2 + $0x3b0] ss:$36 sps:$4 sm:$0xff]  }
 0x869   :  { %2958 = vmatpush1.bf16.msra.mxu0 %v5759_v60  ;;  %v5772_v60 = vld [vmem:[#allocation2 + $0x178] ss:$36 sps:$4 sm:$0xff]  }
 0x86a   :  { %3024 = vmatpush1.bf16.msra.mxu1 %v5760_v36  ;;  %2959 = vmatprep.subr.bf16.mxu0 %v5761_v28  ;;  %v5773_v36 = vld [vmem:[#allocation2 + $0x3fc] ss:$36 sps:$4 sm:$0xff]   ;;  %v5774_v28 = vld [vmem:[#allocation2 + $0x1c4] ss:$36 sps:$4 sm:$0xff]  }
 0x86b   :  { %3025 = vmatprep.subr.bf16.mxu1 %v5762_v2  ;;  %v5775_v2 = vld [vmem:[#allocation2 + $0x3f8] ss:$36 sps:$4 sm:$0xff]  }
 0x86d   :  { %2960 = vmatpush1.bf16.msra.mxu0 %v5763_v56  ;;  %v5776_v56 = vld [vmem:[#allocation2 + $0x1c0] ss:$36 sps:$4 sm:$0xff]  }
 0x86e   :  { %3026 = vmatpush1.bf16.msra.mxu1 %v5764_v58  ;;  %2961 = vmatprep.subr.bf16.mxu0 %v5765_v59  ;;  %v5777_v58 = vld [vmem:[#allocation2 + $0x444] ss:$36 sps:$4 sm:$0xff]   ;;  %v5778_v59 = vld [vmem:[#allocation2 + $0x20c] ss:$36 sps:$4 sm:$0xff]  }
 0x86f   :  { %3027 = vmatprep.subr.bf16.mxu1 %v5766_v15  ;;  %v5779_v15 = vld [vmem:[#allocation2 + $0x440] ss:$36 sps:$4 sm:$0xff]  }
 0x871   :  { %2962 = vmatpush1.bf16.msra.mxu0 %v5767_v62  ;;  %v5780_v62 = vld [vmem:[#allocation2 + $0x208] ss:$36 sps:$4 sm:$0xff]  }
 0x872   :  { %3028 = vmatpush1.bf16.msra.mxu1 %v5768_v11  ;;  %2963 = vmatprep.subr.bf16.mxu0 %v5769_v54  ;;  %v5781_v11 = vld [vmem:[#allocation2 + $0x1c] ss:$36 sps:$4 sm:$0xff]   ;;  %v5782_v54 = vld [vmem:[#allocation2 + $0x254] ss:$36 sps:$4 sm:$0xff]  }
 0x873   :  { %3029 = vmatprep.subr.bf16.mxu1 %v5770_v14  ;;  %v5783_v14 = vld [vmem:[#allocation2 + $0x18] ss:$36 sps:$4 sm:$0xff]  }
 0x875   :  { %2964 = vmatpush1.bf16.msra.mxu0 %v5771_v55  ;;  %v5784_v55 = vld [vmem:[#allocation2 + $0x250] ss:$36 sps:$4 sm:$0xff]  }
 0x876   :  { %3030 = vmatpush1.bf16.msra.mxu1 %v5772_v60  ;;  %2965 = vmatprep.subr.bf16.mxu0 %v5773_v36  ;;  %v5785_v60 = vld [vmem:[#allocation2 + $0x64] ss:$36 sps:$4 sm:$0xff]   ;;  %v5786_v36 = vld [vmem:[#allocation2 + $0x29c] ss:$36 sps:$4 sm:$0xff]  }
 0x877   :  { %3031 = vmatprep.subr.bf16.mxu1 %v5774_v28  ;;  %v5787_v28 = vld [vmem:[#allocation2 + $0x60] ss:$36 sps:$4 sm:$0xff]  }
 0x879   :  { %2966 = vmatpush1.bf16.msra.mxu0 %v5775_v2  ;;  %v5788_v2 = vld [vmem:[#allocation2 + $0x298] ss:$36 sps:$4 sm:$0xff]  }
 0x87a   :  { %3032 = vmatpush1.bf16.msra.mxu1 %v5776_v56  ;;  %2967 = vmatprep.subr.bf16.mxu0 %v5777_v58  ;;  %v5789_v56 = vld [vmem:[#allocation2 + $0xac] ss:$36 sps:$4 sm:$0xff]   ;;  %v5790_v58 = vld [vmem:[#allocation2 + $0x2e4] ss:$36 sps:$4 sm:$0xff]  }
 0x87b   :  { %3033 = vmatprep.subr.bf16.mxu1 %v5778_v59  ;;  %v5791_v59 = vld [vmem:[#allocation2 + $0xa8] ss:$36 sps:$4 sm:$0xff]  }
 0x87d   :  { %2968 = vmatpush1.bf16.msra.mxu0 %v5779_v15  ;;  %v5792_v15 = vld [vmem:[#allocation2 + $0x2e0] ss:$36 sps:$4 sm:$0xff]  }
 0x87e   :  { %3034 = vmatpush1.bf16.msra.mxu1 %v5780_v62  ;;  %3101 = vmatprep.subr.bf16.mxu0 %v5781_v11  ;;  %v5793_v62 = vld [vmem:[#allocation2 + $0xf4] ss:$36 sps:$4 sm:$0xff]   ;;  %v5794_v11 = vld [vmem:[#allocation2 + $0x32c] ss:$36 sps:$4 sm:$0xff]  }
 0x87f   :  { %3035 = vmatprep.subr.bf16.mxu1 %v5782_v54  ;;  %v5795_v54 = vld [vmem:[#allocation2 + $0xf0] ss:$36 sps:$4 sm:$0xff]  }
 0x880   :  { %2970 = vmatmul.mubr.bf16.vlgmr.msra.gmra.mrb[28].mxu0 %v6707_v22 }
 0x881   :  { %3102 = vmatpush1.bf16.msra.mxu0 %v5783_v14  ;;  %3133 = vmatprep.mubr.bf16.mxu0 %v6699_v0  ;;  %v5796_v14 = vld [vmem:[#allocation2 + $0x328] ss:$36 sps:$4 sm:$0xff]  }
 0x882   :  { %3036 = vmatpush1.bf16.msra.mxu1 %v5784_v55  ;;  %3103 = vmatprep.subr.bf16.mxu0 %v5785_v60  ;;  %v5797_v55 = vld [vmem:[#allocation2 + $0x13c] ss:$36 sps:$4 sm:$0xff]   ;;  %v5798_v60 = vld [vmem:[#allocation2 + $0x374] ss:$36 sps:$4 sm:$0xff]  }
 0x883   :  { %3037 = vmatprep.subr.bf16.mxu1 %v5786_v36  ;;  %v5799_v36 = vld [vmem:[#allocation2 + $0x138] ss:$36 sps:$4 sm:$0xff]  }
 0x885   :  { %3104 = vmatpush1.bf16.msra.mxu0 %v5787_v28  ;;  %v5800_v28 = vld [vmem:[#allocation2 + $0x370] ss:$36 sps:$4 sm:$0xff]  }
 0x886   :  { %3038 = vmatpush1.bf16.msra.mxu1 %v5788_v2  ;;  %3105 = vmatprep.subr.bf16.mxu0 %v5789_v56  ;;  %v5801_v2 = vld [vmem:[#allocation2 + $0x184] ss:$36 sps:$4 sm:$0xff]   ;;  %v5802_v56 = vld [vmem:[#allocation2 + $0x3bc] ss:$36 sps:$4 sm:$0xff]  }
 0x887   :  { %3039 = vmatprep.subr.bf16.mxu1 %v5790_v58  ;;  %v5803_v58 = vld [vmem:[#allocation2 + $0x180] ss:$36 sps:$4 sm:$0xff]  }
 0x889   :  { %3106 = vmatpush1.bf16.msra.mxu0 %v5791_v59  ;;  %v5804_v59 = vld [vmem:[#allocation2 + $0x3b8] ss:$36 sps:$4 sm:$0xff]  }
 0x88a   :  { %3040 = vmatpush1.bf16.msra.mxu1 %v5792_v15  ;;  %3107 = vmatprep.subr.bf16.mxu0 %v5793_v62  ;;  %v5805_v15 = vld [vmem:[#allocation2 + $0x1cc] ss:$36 sps:$4 sm:$0xff]   ;;  %v5806_v62 = vld [vmem:[#allocation2 + $0x404] ss:$36 sps:$4 sm:$0xff]  }
 0x88b   :  { %3041 = vmatprep.subr.bf16.mxu1 %v5794_v11  ;;  %v5807_v11 = vld [vmem:[#allocation2 + $0x1c8] ss:$36 sps:$4 sm:$0xff]  }
 0x88d   :  { %3108 = vmatpush1.bf16.msra.mxu0 %v5795_v54  ;;  %v5808_v54 = vld [vmem:[#allocation2 + $0x400] ss:$36 sps:$4 sm:$0xff]  }
 0x88e   :  { %3042 = vmatpush1.bf16.msra.mxu1 %v5796_v14  ;;  %3109 = vmatprep.subr.bf16.mxu0 %v5797_v55  ;;  %v5809_v14 = vld [vmem:[#allocation2 + $0x214] ss:$36 sps:$4 sm:$0xff]   ;;  %v5810_v55 = vld [vmem:[#allocation2 + $0x44c] ss:$36 sps:$4 sm:$0xff]  }
 0x88f   :  { %3043 = vmatprep.subr.bf16.mxu1 %v5798_v60  ;;  %v5811_v60 = vld [vmem:[#allocation2 + $0x210] ss:$36 sps:$4 sm:$0xff]  }
 0x891   :  { %3110 = vmatpush1.bf16.msra.mxu0 %v5799_v36  ;;  %v5812_v36 = vld [vmem:[#allocation2 + $0x448] ss:$36 sps:$4 sm:$0xff]  }
 0x892   :  { %3044 = vmatpush1.bf16.msra.mxu1 %v5800_v28  ;;  %3111 = vmatprep.subr.bf16.mxu0 %v5801_v2  ;;  %v5813_v28 = vld [vmem:[#allocation2 + $0x25c] ss:$36 sps:$4 sm:$0xff]   ;;  %v5814_v2 = vld [vmem:[#allocation2 + $0x494] ss:$36 sps:$4 sm:$0xff]  }
 0x893   :  { %3045 = vmatprep.subr.bf16.mxu1 %v5802_v56  ;;  %v5815_v56 = vld [vmem:[#allocation2 + $0x258] ss:$36 sps:$4 sm:$0xff]  }
 0x895   :  { %3112 = vmatpush1.bf16.msra.mxu0 %v5803_v58  ;;  %v5816_v58 = vld [vmem:[#allocation2 + $0x490] ss:$36 sps:$4 sm:$0xff]  }
 0x896   :  { %3046 = vmatpush1.bf16.msra.mxu1 %v5804_v59  ;;  %3113 = vmatprep.subr.bf16.mxu0 %v5805_v15  ;;  %v5817_v59 = vld [vmem:[#allocation2 + $0x2a4] ss:$36 sps:$4 sm:$0xff]   ;;  %v5818_v15 = vld [vmem:[#allocation2 + $0x4dc] ss:$36 sps:$4 sm:$0xff]  }
 0x897   :  { %3047 = vmatprep.subr.bf16.mxu1 %v5806_v62  ;;  %v5819_v62 = vld [vmem:[#allocation2 + $0x2a0] ss:$36 sps:$4 sm:$0xff]  }
 0x899   :  { %3114 = vmatpush1.bf16.msra.mxu0 %v5807_v11  ;;  %v5820_v11 = vld [vmem:[#allocation2 + $0x4d8] ss:$36 sps:$4 sm:$0xff]  }
 0x89a   :  { %3048 = vmatpush1.bf16.msra.mxu1 %v5808_v54  ;;  %3115 = vmatprep.subr.bf16.mxu0 %v5809_v14  ;;  %v5821_v54 = vld [vmem:[#allocation2 + $0x2ec] ss:$36 sps:$4 sm:$0xff]   ;;  %v5822_v14 = vld [vmem:[#allocation2 + $0x524] ss:$36 sps:$4 sm:$0xff]  }
 0x89b   :  { %3049 = vmatprep.subr.bf16.mxu1 %v5810_v55  ;;  %v5823_v55 = vld [vmem:[#allocation2 + $0x2e8] ss:$36 sps:$4 sm:$0xff]  }
 0x89d   :  { %3116 = vmatpush1.bf16.msra.mxu0 %v5811_v60  ;;  %v5824_v60 = vld [vmem:[#allocation2 + $0x520] ss:$36 sps:$4 sm:$0xff]  }
 0x89e   :  { %3050 = vmatpush1.bf16.msra.mxu1 %v5812_v36  ;;  %3117 = vmatprep.subr.bf16.mxu0 %v5813_v28  ;;  %v5825_v36 = vld [vmem:[#allocation2 + $0x334] ss:$36 sps:$4 sm:$0xff]   ;;  %v5826_v28 = vld [vmem:[#allocation2 + $0x56c] ss:$36 sps:$4 sm:$0xff]  }
 0x89f   :  { %3060 = vmatprep.subr.bf16.mxu1 %v5814_v2  ;;  %v5827_v2 = vld [vmem:[#allocation2 + $0x330] ss:$36 sps:$4 sm:$0xff]  }
 0x8a1   :  { %3052 = vmatmul.mubr.bf16.vlgmr.msra.gmra.mrb[48].mxu1 %v6707_v22  ;;  %3118 = vmatpush1.bf16.msra.mxu0 %v5815_v56  ;;  %v5828_v56 = vld [vmem:[#allocation2 + $0x568] ss:$36 sps:$4 sm:$0xff]  }
 0x8a2   :  { %3061 = vmatpush1.bf16.msra.mxu1 %v5816_v58  ;;  %3119 = vmatprep.subr.bf16.mxu0 %v5817_v59  ;;  %v5829_v58 = vld [vmem:[#allocation2 + $0x37c] ss:$36 sps:$4 sm:$0xff]   ;;  %v5830_v59 = vld [vmem:[#allocation2 + $0x5b4] ss:$36 sps:$4 sm:$0xff]  }
 0x8a3   :  { %3062 = vmatprep.subr.bf16.mxu1 %v5818_v15  ;;  %3092 = vmatprep.mubr.bf16.mxu1 %v6980_v18  ;;  %v5831_v15 = vld [vmem:[#allocation2 + $0x378] ss:$36 sps:$4 sm:$0xff]  }
 0x8a5   :  { %3120 = vmatpush1.bf16.msra.mxu0 %v5819_v62  ;;  %v5832_v62 = vld [vmem:[#allocation2 + $0x5b0] ss:$36 sps:$4 sm:$0xff]  }
 0x8a6   :  { %3063 = vmatpush1.bf16.msra.mxu1 %v5820_v11  ;;  %3121 = vmatprep.subr.bf16.mxu0 %v5821_v54  ;;  %v5833_v11 = vld [vmem:[#allocation2 + $0x3c4] ss:$36 sps:$4 sm:$0xff]   ;;  %v5834_v54 = vld [vmem:[#allocation2 + $0x5fc] ss:$36 sps:$4 sm:$0xff]  }
 0x8a7   :  { %3064 = vmatprep.subr.bf16.mxu1 %v5822_v14  ;;  %v5835_v14 = vld [vmem:[#allocation2 + $0x3c0] ss:$36 sps:$4 sm:$0xff]  }
 0x8a9   :  { %3122 = vmatpush1.bf16.msra.mxu0 %v5823_v55  ;;  %v5836_v55 = vld [vmem:[#allocation2 + $0x5f8] ss:$36 sps:$4 sm:$0xff]  }
 0x8aa   :  { %3065 = vmatpush1.bf16.msra.mxu1 %v5824_v60  ;;  %3123 = vmatprep.subr.bf16.mxu0 %v5825_v36  ;;  %v5837_v60 = vld [vmem:[#allocation2 + $0x40c] ss:$36 sps:$4 sm:$0xff]   ;;  %v5838_v36 = vld [vmem:[#allocation2 + $0x644] ss:$36 sps:$4 sm:$0xff]  }
 0x8ab   :  { %3066 = vmatprep.subr.bf16.mxu1 %v5826_v28  ;;  %v5839_v28 = vld [vmem:[#allocation2 + $0x408] ss:$36 sps:$4 sm:$0xff]  }
 0x8ad   :  { %3124 = vmatpush1.bf16.msra.mxu0 %v5827_v2  ;;  %v5840_v2 = vld [vmem:[#allocation2 + $0x640] ss:$36 sps:$4 sm:$0xff]  }
 0x8ae   :  { %3067 = vmatpush1.bf16.msra.mxu1 %v5828_v56  ;;  %3125 = vmatprep.subr.bf16.mxu0 %v5829_v58  ;;  %v5841_v56 = vld [vmem:[#allocation2 + $0x454] ss:$36 sps:$4 sm:$0xff]   ;;  %v5842_v58 = vld [vmem:[#allocation2 + $0x68c] ss:$36 sps:$4 sm:$0xff]  }
 0x8af   :  { %3068 = vmatprep.subr.bf16.mxu1 %v5830_v59  ;;  %v5843_v59 = vld [vmem:[#allocation2 + $0x450] ss:$36 sps:$4 sm:$0xff]  }
 0x8b1   :  { %3126 = vmatpush1.bf16.msra.mxu0 %v5831_v15  ;;  %v5844_v15 = vld [vmem:[#allocation2 + $0x688] ss:$36 sps:$4 sm:$0xff]  }
 0x8b2   :  { %3069 = vmatpush1.bf16.msra.mxu1 %v5832_v62  ;;  %3127 = vmatprep.subr.bf16.mxu0 %v5833_v11  ;;  %v5845_v62 = vld [vmem:[#allocation2 + $0x49c] ss:$36 sps:$4 sm:$0xff]  }
 0x8b3   :  { %3070 = vmatprep.subr.bf16.mxu1 %v5834_v54  ;;  %v5846_v11 = vld [vmem:[#allocation2 + $0x260] ss:$36 sps:$4 sm:$0xff]   ;;  %v5847_v54 = vld [vmem:[#allocation2 + $0x498] ss:$36 sps:$4 sm:$0xff]  }
 0x8b5   :  { %3128 = vmatpush1.bf16.msra.mxu0 %v5835_v14  ;;  %v5848_v14 = vld [vmem:[#allocation2 + $0x20] ss:$36 sps:$4 sm:$0xff]  }
 0x8b6   :  { %3071 = vmatpush1.bf16.msra.mxu1 %v5836_v55  ;;  %3129 = vmatprep.subr.bf16.mxu0 %v5837_v60  ;;  %v5849_v55 = vld [vmem:[#allocation2 + $0x4e4] ss:$36 sps:$4 sm:$0xff]  }
 0x8b7   :  { %3072 = vmatprep.subr.bf16.mxu1 %v5838_v36  ;;  %v5850_v60 = vld [vmem:[#allocation2 + $0x2a8] ss:$36 sps:$4 sm:$0xff]   ;;  %v5851_v36 = vld [vmem:[#allocation2 + $0x4e0] ss:$36 sps:$4 sm:$0xff]  }
 0x8b9   :  { %3130 = vmatpush1.bf16.msra.mxu0 %v5839_v28  ;;  %v5852_v28 = vld [vmem:[#allocation2 + $0x68] ss:$36 sps:$4 sm:$0xff]  }
 0x8ba   :  { %3073 = vmatpush1.bf16.msra.mxu1 %v5840_v2  ;;  %3131 = vmatprep.subr.bf16.mxu0 %v5841_v56  ;;  %v5853_v2 = vld [vmem:[#allocation2 + $0x52c] ss:$36 sps:$4 sm:$0xff]  }
 0x8bb   :  { %3074 = vmatprep.subr.bf16.mxu1 %v5842_v58  ;;  %v5854_v56 = vld [vmem:[#allocation2 + $0x2f0] ss:$36 sps:$4 sm:$0xff]   ;;  %v5855_v58 = vld [vmem:[#allocation2 + $0x528] ss:$36 sps:$4 sm:$0xff]  }
 0x8bd   :  { %3132 = vmatpush1.bf16.msra.mxu0 %v5843_v59  ;;  %v5856_v59 = vld [vmem:[#allocation2 + $0xb0] ss:$36 sps:$4 sm:$0xff]  }
 0x8be   :  { %3075 = vmatpush1.bf16.msra.mxu1 %v5844_v15  ;;  %3142 = vmatprep.subr.bf16.mxu0 %v5845_v62  ;;  %v5857_v15 = vld [vmem:[#allocation2 + $0x574] ss:$36 sps:$4 sm:$0xff]  }
 0x8bf   :  { %4912 = vmatprep.subr.bf16.mxu1 %v5846_v11  ;;  %v5859_v62 = vld [vmem:[#allocation2 + $0x570] ss:$36 sps:$4 sm:$0xff]   ;;  %v5860_v11 = vld [vmem:[#allocation2 + $0xf8] ss:$36 sps:$4 sm:$0xff]  }
 0x8c0   :  { %3134 = vmatmul.mubr.bf16.vlgmr.msra.gmra.mrb[32].mxu0 %v6707_v22 }
 0x8c1   :  { %3093 = vmatmul.mubr.bf16.vlgmr.msra.gmra.mrb[48].mxu1 %v6703_v8  ;;  %3143 = vmatpush1.bf16.msra.mxu0 %v5847_v54  ;;  %v5861_v54 = vld [vmem:[#allocation2 + $0x5bc] ss:$36 sps:$4 sm:$0xff]  }
 0x8c2   :  { %4913 = vmatpush3.bf16.msra.mxu1 %v5848_v14  ;;  %3215 = vmatprep.mubr.bf16.mxu1 %v6699_v0  ;;  %v5858_v0 = vld [vmem:[#allocation2 + $0x338] ss:$36 sps:$4 sm:$0xff]   ;;  %v5862_v14 = vld [vmem:[#allocation2 + $0x380] ss:$36 sps:$4 sm:$0xff]  }
 0x8c3   :  { %3144 = vmatprep.subr.bf16.mxu0 %v5849_v55  ;;  %4914 = vmatprep.subr.bf16.mxu1 %v5850_v60  ;;  %v5863_v55 = vld [vmem:[#allocation2 + $0x5b8] ss:$36 sps:$4 sm:$0xff]   ;;  %v5864_v60 = vld [vmem:[#allocation2 + $0x140] ss:$36 sps:$4 sm:$0xff]  }
 0x8c4   :  { %3174 = vmatprep.mubr.bf16.mxu0 %v6980_v18 }
 0x8c5   :  { %3145 = vmatpush1.bf16.msra.mxu0 %v5851_v36  ;;  %v5865_v36 = vld [vmem:[#allocation2 + $0x604] ss:$36 sps:$4 sm:$0xff]  }
 0x8c6   :  { %4915 = vmatpush3.bf16.msra.mxu1 %v5852_v28  ;;  %3146 = vmatprep.subr.bf16.mxu0 %v5853_v2  ;;  %v5866_v28 = vld [vmem:[#allocation2 + $0x3c8] ss:$36 sps:$4 sm:$0xff]   ;;  %v5867_v2 = vld [vmem:[#allocation2 + $0x600] ss:$36 sps:$4 sm:$0xff]  }
 0x8c7   :  { %4916 = vmatprep.subr.bf16.mxu1 %v5854_v56  ;;  %v5868_v56 = vld [vmem:[#allocation2 + $0x188] ss:$36 sps:$4 sm:$0xff]  }
 0x8c9   :  { %3147 = vmatpush1.bf16.msra.mxu0 %v5855_v58  ;;  %v5869_v58 = vld [vmem:[#allocation2 + $0x64c] ss:$36 sps:$4 sm:$0xff]  }
 0x8ca   :  { %4917 = vmatpush3.bf16.msra.mxu1 %v5856_v59  ;;  %3148 = vmatprep.subr.bf16.mxu0 %v5857_v15  ;;  %v5870_v59 = vld [vmem:[#allocation2 + $0x410] ss:$36 sps:$4 sm:$0xff]   ;;  %v5871_v15 = vld [vmem:[#allocation2 + $0x648] ss:$36 sps:$4 sm:$0xff]  }
 0x8cb   :  { %4918 = vmatprep.subr.bf16.mxu1 %v5858_v0  ;;  %v5872_v0 = vld [vmem:[#allocation2 + $0x1d0] ss:$36 sps:$4 sm:$0xff]  }
 0x8cd   :  { %3149 = vmatpush1.bf16.msra.mxu0 %v5859_v62  ;;  %v5873_v62 = vld [vmem:[#allocation2 + $0x694] ss:$36 sps:$4 sm:$0xff]  }
 0x8ce   :  { %4919 = vmatpush3.bf16.msra.mxu1 %v5860_v11  ;;  %3150 = vmatprep.subr.bf16.mxu0 %v5861_v54  ;;  %v5874_v11 = vld [vmem:[#allocation2 + $0x458] ss:$36 sps:$4 sm:$0xff]   ;;  %v5875_v54 = vld [vmem:[#allocation2 + $0x690] ss:$36 sps:$4 sm:$0xff]  }
 0x8cf   :  { %4920 = vmatprep.subr.bf16.mxu1 %v5862_v14  ;;  %v5876_v14 = vld [vmem:[#allocation2 + $0x218] ss:$36 sps:$4 sm:$0xff]  }
 0x8d1   :  { %3151 = vmatpush1.bf16.msra.mxu0 %v5863_v55  ;;  %v6981_v55 = vmov 0.0  }
 0x8d2   :  { %4921 = vmatpush3.bf16.msra.mxu1 %v5864_v60  ;;  %3152 = vmatprep.subr.bf16.mxu0 %v5865_v36  ;;  %v5877_v60 = vld [vmem:[#allocation2 + $0x4a0] ss:$36 sps:$4 sm:$0xff]   ;;  %v5878_v36 = vld [vmem:[#allocation2 + $0x4e8] ss:$36 sps:$4 sm:$0xff]  }
 0x8d3   :  { %4922 = vmatprep.subr.bf16.mxu1 %v5866_v28  ;;  %v5879_v28 = vld [vmem:[#allocation2 + $0x530] ss:$36 sps:$4 sm:$0xff]  }
 0x8d5   :  { %3153 = vmatpush1.bf16.msra.mxu0 %v5867_v2  ;;  %v5880_v2 = vld [vmem:[#allocation2 + $0x578] ss:$36 sps:$4 sm:$0xff]  }
 0x8d6   :  { %4923 = vmatpush3.bf16.msra.mxu1 %v5868_v56  ;;  %3154 = vmatprep.subr.bf16.mxu0 %v5869_v58  ;;  %v5882_v56 = vld [vmem:[#allocation2 + $0x608] ss:$36 sps:$4 sm:$0xff]   ;;  %v5883_v58 = vld [vmem:[#allocation2 + $0x650] ss:$36 sps:$4 sm:$0xff]  }
 0x8d7   :  { %4924 = vmatprep.subr.bf16.mxu1 %v5870_v59  ;;  %v5884_v59 = vld [vmem:[#allocation2 + $0x698] ss:$36 sps:$4 sm:$0xff]  }
 0x8d9   :  { %3155 = vmatpush1.bf16.msra.mxu0 %v5871_v15  ;;  %v5885_v15 = vld [vmem:[#allocation5 + $0x4] ss:$12 sps:$4 sm:$0xff]  }
 0x8da   :  { %4925 = vmatpush3.bf16.msra.mxu1 %v5872_v0  ;;  %3156 = vmatprep.subr.bf16.mxu0 %v5873_v62  ;;  %v5886_v0 = vld [vmem:[#allocation5] ss:$12 sps:$4 sm:$0xff]   ;;  %v5887_v62 = vld [vmem:[#allocation5 + $0x1c] ss:$12 sps:$4 sm:$0xff]  }
 0x8db   :  { %4926 = vmatprep.subr.bf16.mxu1 %v5874_v11  ;;  %v5888_v11 = vld [vmem:[#allocation5 + $0x18] ss:$12 sps:$4 sm:$0xff]  }
 0x8dd   :  { %3157 = vmatpush1.bf16.msra.mxu0 %v5875_v54 }
 0x8de   :  { %4927 = vmatpush3.bf16.msra.mxu1 %v5876_v14  ;;  %5096 = vmatprep.subr.bf16.mxu0 %v6981_v55 }
 0x8e0   :  { %3175 = vmatmul.mubr.bf16.vlgmr.msra.gmra.mrb[36].mxu0 %v6703_v8 }
 0x8e1   :  { %3216 = vmatmul.mubr.bf16.vlgmr.msra.gmra.mrb[52].mxu1 %v6707_v22  ;;  %5097 = vmatpush3.bf16.msra.mxu0 %v5877_v60  ;;  %v5881_v22 = vld [vmem:[#allocation2 + $0x5c0] ss:$36 sps:$4 sm:$0xff]  }
 0x8e2   :  { %5098 = vmatprep.subr.bf16.mxu0 %v6981_v55  ;;  %5112 = vmatprep.mubr.msk.bf16.mxu0 %vm6300_vm0, %v6981_v55 }
 0x8e5   :  { %5099 = vmatpush3.bf16.msra.mxu0 %v5878_v36 }
 0x8e6   :  { %5100 = vmatprep.subr.bf16.mxu0 %v6981_v55 }
 0x8e9   :  { %5101 = vmatpush3.bf16.msra.mxu0 %v5879_v28 }
 0x8ea   :  { %5102 = vmatprep.subr.bf16.mxu0 %v6981_v55 }
 0x8ed   :  { %5103 = vmatpush3.bf16.msra.mxu0 %v5880_v2 }
 0x8ee   :  { %5104 = vmatprep.subr.bf16.mxu0 %v6981_v55 }
 0x8f1   :  { %5105 = vmatpush3.bf16.msra.mxu0 %v5881_v22 }
 0x8f2   :  { %5106 = vmatprep.subr.bf16.mxu0 %v6981_v55 }
 0x8f5   :  { %5107 = vmatpush3.bf16.msra.mxu0 %v5882_v56 }
 0x8f6   :  { %5108 = vmatprep.subr.bf16.mxu0 %v6981_v55 }
 0x8f9   :  { %5109 = vmatpush3.bf16.msra.mxu0 %v5883_v58 }
 0x8fa   :  { %5110 = vmatprep.subr.bf16.mxu0 %v6981_v55 }
 0x8fd   :  { %5111 = vmatpush3.bf16.msra.mxu0 %v5884_v59 }
 0x8fe   :  { %3496 = vmatprep.subr.bf16.mxu0 %v5885_v15 }
 0x900   :  { %5113 = vmatmul.mubr.bf16.vlgmr.msra.gmra.mrb[40].mxu0 %v6703_v8 }
 0x901   :  { %3497 = vmatpush1.bf16.msra.mxu0 %v5886_v0 }
 0x902   :  { %3498 = vmatprep.subr.bf16.mxu0 %v5887_v62 }
 0x905   :  { %3499 = vmatpush1.bf16.msra.mxu0 %v5888_v11 }
 0x906   :  { %3500 = vmatprep.subr.bf16.mxu0 %v6499_v31 }
 0x909   :  { %3501 = vmatpush1.bf16.msra.mxu0 %v6501_v35 }
 0x90a   :  { %3502 = vmatprep.subr.bf16.mxu0 %v6504_v37 }
 0x90d   :  { %3503 = vmatpush1.bf16.msra.mxu0 %v6507_v40 }
 0x90e   :  { %3504 = vmatprep.subr.bf16.mxu0 %v6510_v41 }
 0x911   :  { %3505 = vmatpush1.bf16.msra.mxu0 %v6513_v42 }
 0x912   :  { %3506 = vmatprep.subr.bf16.mxu0 %v6516_v43 }
 0x913   :  { %v2930_v8 = vpop.f32.mrb[24].mxu0 }
 0x914   :  { %v2889_v54 = vpop.f32.mrb[40].mxu1  ;;  %v2932_v14 = vpop.f32.mrb[25].mxu0 }
 0x915   :  { %v2931_v60 = vadd.f32 %v2930_v8, %v2889_v54  ;;  %v2891_v36 = vpop.f32.mrb[41].mxu1  ;;  %v2934_v28 = vpop.f32.mrb[26].mxu0  ;;  %3507 = vmatpush1.bf16.msra.mxu0 %v6519_v44 }
 0x916   :  { %v2933_v31 = vadd.f32 %v2932_v14, %v2891_v36  ;;  %v2893_v35 = vpop.f32.mrb[42].mxu1  ;;  %v2935_v2 = vpop.f32.mrb[27].mxu0  ;;  %3508 = vmatprep.subr.bf16.mxu0 %v6522_v45 }
 0x917   :  { %v2894_v37 = vpop.f32.mrb[43].mxu1 }
 0x918   :  { %v3264_v40 = vadd.f32 %v2933_v31, %v6431_v50 }
 0x919   :  { %3509 = vmatpush1.bf16.msra.mxu0 %v6525_v46 }
 0x91a   :  { %v3270_v41 = vpack.c.bf16 %v3264_v40, %v3264_v40  ;;  %3510 = vmatprep.subr.bf16.mxu0 %v6528_v48 }
 0x91c   :  { %3307 = vmatprep.mubr.bf16.mxu1 %v3270_v41 }
 0x91d   :  { %3511 = vmatpush1.bf16.msra.mxu0 %v6531_v49 }
 0x91e   :  { %3512 = vmatprep.subr.bf16.mxu0 %v6534_v51 }
 0x921   :  { %3513 = vmatpush1.bf16.msra.mxu0 %v6537_v9 }
 0x922   :  { %3514 = vmatprep.subr.bf16.mxu0 %v6540_v52 }
 0x925   :  { %3515 = vmatpush1.bf16.msra.mxu0 %v6543_v38 }
 0x926   :  { %3516 = vmatprep.subr.bf16.mxu0 %v6559_v4 }
 0x929   :  { %3517 = vmatpush1.bf16.msra.mxu0 %v6561_v5 }
 0x92a   :  { %3518 = vmatprep.subr.bf16.mxu0 %v6565_v10 }
 0x92d   :  { %3519 = vmatpush1.bf16.msra.mxu0 %v6567_v13 }
 0x92e   :  { %3520 = vmatprep.subr.bf16.mxu0 %v6573_v21 }
 0x931   :  { %3521 = vmatpush1.bf16.msra.mxu0 %v6571_v20 }
 0x932   :  { %3522 = vmatprep.subr.bf16.mxu0 %v6575_v23 }
 0x934   :  { %v3012_v42 = vpop.f32.mrb[44].mxu1 }
 0x935   :  { %v3014_v43 = vpop.f32.mrb[45].mxu1  ;;  %3523 = vmatpush1.bf16.msra.mxu0 %v6579_v25 }
 0x936   :  { %v3016_v44 = vpop.f32.mrb[46].mxu1  ;;  %3524 = vmatprep.subr.bf16.mxu0 %v6582_v27 }
 0x937   :  { %v3017_v45 = vpop.f32.mrb[47].mxu1 }
 0x939   :  { %3525 = vmatpush1.bf16.msra.mxu0 %v6585_v53  ;;  %v3263_v53 = vadd.f32 %v2931_v60, %v6442_v12 }
 0x93a   :  { %3526 = vmatprep.subr.bf16.mxu0 %v6588_v34 }
 0x93b   :  { %v3269_v34 = vpack.c.bf16 %v3263_v53, %v3263_v53  ;;  %v5889_v53 = vld [vmem:[#allocation5 + $0x184] ss:$12 sps:$4 sm:$0xff]  }
 0x93d   :  { %3527 = vmatpush1.bf16.msra.mxu0 %v6591_v39 }
 0x93e   :  { %5128 = vmatprep.subr.bf16.mxu0 %v6981_v55 }
 0x953   :  { %v2971_v46 = vpop.f32.mrb[28].mxu0 }
 0x954   :  { %v3013_v48 = vadd.f32 %v3012_v42, %v2971_v46  ;;  %v2973_v49 = vpop.f32.mrb[29].mxu0 }
 0x955   :  { %v3015_v51 = vadd.f32 %v3014_v43, %v2973_v49  ;;  %v2975_v9 = vpop.f32.mrb[30].mxu0 }
 0x956   :  { %v2976_v52 = vpop.f32.mrb[31].mxu0  ;;  %v3265_v22 = vadd.f32 %v3013_v48, %v6460_v32 }
 0x957   :  { %v3272_v21 = vpack.c.bf16 %v3015_v51, %v3015_v51 }
 0x958   :  { %v3271_v56 = vpack.c.bf16 %v3265_v22, %v3265_v22  ;;  %v5892_v22 = vld [vmem:[#allocation5 + $0x198] ss:$12 sps:$4 sm:$0xff]  }
 0x993   :  { %v3135_v38 = vpop.f32.mrb[32].mxu0 }
 0x994   :  { %v3094_v4 = vpop.f32.mrb[48].mxu1  ;;  %v3137_v5 = vpop.f32.mrb[33].mxu0 }
 0x995   :  { %v3273_v10 = vpack.c.bf16 %v3094_v4, %v3094_v4  ;;  %v3096_v13 = vpop.f32.mrb[49].mxu1  ;;  %v3139_v20 = vpop.f32.mrb[34].mxu0 }
 0x996   :  { %v3098_v23 = vpop.f32.mrb[50].mxu1  ;;  %v3140_v25 = vpop.f32.mrb[35].mxu0  ;;  %v3274_v39 = vpack.c.bf16 %v3096_v13, %v3096_v13 }
 0x997   :  { %v3099_v27 = vpop.f32.mrb[51].mxu1  ;;  %3275 = vmatprep.subr.bf16.mxu1 %v3273_v10 }
 0x998   :  { %3276 = vmatpush1.bf16.xpose.msra.mxu1 %v3272_v21 }
 0x999   :  { %5116 = vmatprep.subr.bf16.mxu1 %v6981_v55 }
 0x99f   :  { %3308 = vmatmul.mubr.bf16.vlgmr.msra.gmra.mrb[56].mxu1 %v3269_v34  ;;  %v5890_v34 = vld [vmem:[#allocation5 + $0x180] ss:$12 sps:$4 sm:$0xff]  }
 0x9a0   :  { %5117 = vmatpush3.bf16.xpose.msra.mxu1 %v3274_v39  ;;  %5118 = vmatprep.mubr.msk.bf16.mxu1 %vm6300_vm0, %v6981_v55  ;;  %v5891_v39 = vld [vmem:[#allocation5 + $0x19c] ss:$12 sps:$4 sm:$0xff]  }
 0x9ab   :  { %5119 = vmatmul.mubr.bf16.vlgmr.msra.gmra.mrb[56].mxu1 %v3271_v56  ;;  %v5893_v56 = vld [vmem:[#allocation5 + $0x1b4] ss:$12 sps:$4 sm:$0xff]  }
 0x9ac   :  { %3414 = vmatprep.mubr.bf16.mxu1 %v6980_v18 }
 0x9b3   :  { %v3176_v58 = vpop.f32.mrb[36].mxu0 }
 0x9b4   :  { %v3177_v59 = vadd.f32 %v3176_v58, %v3135_v38  ;;  %v3178_v15 = vpop.f32.mrb[37].mxu0  ;;  %v4928_v0 = vpop.f32.mrb[52].mxu1  ;;  %v5894_v58 = vld [vmem:[#allocation5 + $0x1b0] ss:$12 sps:$4 sm:$0xff]  }
 0x9b5   :  { %v3179_v62 = vadd.f32 %v3178_v15, %v3137_v5  ;;  %v3180_v11 = vpop.f32.mrb[38].mxu0  ;;  %v4929_v8 = vpop.f32.mrb[53].mxu1  ;;  %v5896_v15 = vld [vmem:[#allocation5 + $0x1c8] ss:$12 sps:$4 sm:$0xff]  }
 0x9b6   :  { %v3266_v54 = vadd.f32 %v3177_v59, %v6455_v30  ;;  %v4930_v14 = vadd.f32 %v4929_v8, %v4928_v0  ;;  %v3181_v60 = vpop.f32.mrb[39].mxu0  ;;  %v4931_v36 = vpop.f32.mrb[54].mxu1  ;;  %v5895_v59 = vld [vmem:[#allocation5 + $0x1cc] ss:$12 sps:$4 sm:$0xff]   ;;  %v5897_v0 = vld [vmem:[#allocation5 + $0x1e4] ss:$12 sps:$4 sm:$0xff]  }
 0x9b7   :  { %v3267_v28 = vadd.f32 %v3179_v62, %v6446_v16  ;;  %v4932_v31 = vpop.f32.mrb[55].mxu1  ;;  %v5898_v62 = vld [vmem:[#allocation5 + $0x1e0] ss:$12 sps:$4 sm:$0xff]   ;;  %v5899_v11 = vld [vmem:[#allocation5 + $0x1fc] ss:$12 sps:$4 sm:$0xff]  }
 0x9b8   :  { %v3367_v35 = vpack.c.bf16 %v3266_v54, %v3266_v54  ;;  %v5900_v8 = vld [vmem:[#allocation5 + $0x1f8] ss:$12 sps:$4 sm:$0xff]   ;;  %v5901_v54 = vld [vmem:[#allocation5 + $0x214] ss:$12 sps:$4 sm:$0xff]  }
 0x9b9   :  { %v3368_v2 = vpack.c.bf16 %v3267_v28, %v3267_v28  ;;  %v5903_v60 = vld [vmem:[#allocation5 + $0x22c] ss:$12 sps:$4 sm:$0xff]   ;;  %v5904_v36 = vld [vmem:[#allocation5 + $0x228] ss:$12 sps:$4 sm:$0xff]  }
 0x9ba   :  { %v3374_v37 = vsel %vm2069_vm1, %v3367_v35, 0  ;;  %v5905_v28 = vld [vmem:[#allocation5 + $0xc8] ss:$12 sps:$4 sm:$0xff]  }
 0x9bb   :  { %4840 = vmatprep.subr.msk.bf16.mxu1 %vm2069_vm1, %v3368_v2 }
 0x9bc   :  { %3383 = vmatpush1.bf16.msra.mxu1 %v3374_v37 }
 0x9bd   :  { %5122 = vmatprep.subr.bf16.mxu1 %v6981_v55 }
 0x9d3   :  { %v3257_v40 = vpop.f32.mrb[40].mxu0 }
 0x9d4   :  { %v3258_v41 = vadd.f32 %v4930_v14, %v3257_v40  ;;  %v5114_v42 = vpop.f32.mrb[41].mxu0  ;;  %v5902_v14 = vld [vmem:[#allocation5 + $0x210] ss:$12 sps:$4 sm:$0xff]  }
 0x9d5   :  { %v3260_v43 = vpop.f32.mrb[42].mxu0 }
 0x9d6   :  { %v5115_v44 = vpop.f32.mrb[43].mxu0  ;;  %v3268_v13 = vadd.f32 %v3258_v41, %v6472_v61 }
 0x9d8   :  { %v3369_v21 = vpack.c.bf16 %v3268_v13, %v3268_v13 }
 0x9da   :  { %v3380_v27 = vsel %vm2069_vm1, %v3369_v21, 0 }
 0xa7e   :  { %v3349_v45 = vpop.f32.mrb[56].mxu1 }
 0xa7f   :  { %v5120_v46 = vpop.f32.mrb[57].mxu1  ;;  %v3355_v48 = vsel %vm2050_vm2, %v3349_v45, -inf }
 0xa80   :  { %3356 = vmax.xlane.f32.xlu0 %v3355_v48  ;;  %v3352_v49 = vpop.f32.mrb[58].mxu1 }
 0xa81   :  { %v5121_v51 = vpop.f32.mrb[59].mxu1 }
 0xb0d   :  { %v3357_v9 = vpop.xlane.xlu0 %3356 }
 0xb0e   :  { %v3358_v52 = vsub.f32 %v3349_v45, %v3357_v9 }
 0xb10   :  { %v3359_v38 = vmul.f32 1.442695, %v3358_v52 }
 0xb12   :  { %5650 = vpow2.f32 %v3359_v38 }
 0xb1c   :  { %v5651_v4 = vpop.eup %5650 }
 0xb1d   :  { %v3361_v5 = vsel %vm2050_vm2, %v5651_v4, 0.0 }
 0xb1e   :  { %3362 = vadd.xlane.f32.xlu1 %v3361_v5 }
 0xbab   :  { %v3363_v10 = vpop.xlane.xlu1 %3362 }
 0xbac   :  { %5652 = vrcp.f32 %v3363_v10 }
 0xbb6   :  { %v5653_v20 = vpop.eup %5652 }
 0xbb7   :  { %v3365_v23 = vmul.f32 %v5653_v20, %v5651_v4 }
 0xbb9   :  { %v3366_v25 = vpack.c.bf16 %v3365_v23, %v3365_v23 }
 0xbbb   :  { %4841 = vmatmul.mubr.msk.bf16.vlgmr.msra.gmra.mrb[60].mxu1 %vm2050_vm2, %v3366_v25 }
 0xbbc   :  { %5123 = vmatpush3.bf16.msra.mxu1 %v3380_v27  ;;  %5124 = vmatprep.mubr.msk.bf16.mxu1 %vm6300_vm0, %v6981_v55 }
 0xbbd   :  { %3537 = vmatprep.subr.bf16.mxu1 %v5889_v53 }
 0xbc3   :  { %5125 = vmatmul.mubr.msk.bf16.vlgmr.msra.gmra.mrb[64].mxu1 %vm2050_vm2, %v3366_v25 }
 0xbc4   :  { %3538 = vmatpush1.bf16.msra.mxu1 %v5890_v34  ;;  %3569 = vmatprep.mubr.bf16.mxu1 %v6980_v18 }
 0xbc5   :  { %3539 = vmatprep.subr.bf16.mxu1 %v5891_v39 }
 0xbc8   :  { %3540 = vmatpush1.bf16.msra.mxu1 %v5892_v22 }
 0xbc9   :  { %3541 = vmatprep.subr.bf16.mxu1 %v5893_v56 }
 0xbcc   :  { %3542 = vmatpush1.bf16.msra.mxu1 %v5894_v58  ;;  %v6982_v58 = vld [vmem:[#allocation11_spill] sm:$0xff] }
 0xbcd   :  { %3543 = vmatprep.subr.bf16.mxu1 %v5895_v59 }
 0xbd0   :  { %3544 = vmatpush1.bf16.msra.mxu1 %v5896_v15  ;;  %v6983_v15 = vld [vmem:[#allocation12_spill] sm:$0xff] }
 0xbd1   :  { %3545 = vmatprep.subr.bf16.mxu1 %v5897_v0 }
 0xbd4   :  { %3546 = vmatpush1.bf16.msra.mxu1 %v5898_v62  ;;  %v6984_v62 = vld [vmem:[#allocation13_spill] sm:$0xff] }
 0xbd5   :  { %3547 = vmatprep.subr.bf16.mxu1 %v5899_v11 }
 0xbd8   :  { %3548 = vmatpush1.bf16.msra.mxu1 %v5900_v8  ;;  %v6985_v8 = vld [vmem:[#allocation14_spill] sm:$0xff] }
 0xbd9   :  { %3549 = vmatprep.subr.bf16.mxu1 %v5901_v54 }
 0xbdc   :  { %3550 = vmatpush1.bf16.msra.mxu1 %v5902_v14  ;;  %v6986_v14 = vld [vmem:[#allocation15_spill] sm:$0xff] }
 0xbdd   :  { %3551 = vmatprep.subr.bf16.mxu1 %v5903_v60 }
 0xbe0   :  { %3552 = vmatpush1.bf16.msra.mxu1 %v5904_v36 }
 0xbe1   :  { %4947 = vmatprep.subr.bf16.mxu1 %v5905_v28 }
 0xc8e   :  { %v3416_v31 = vpop.f32.mrb[60].mxu1 }
 0xc8f   :  { %v3418_v35 = vpop.f32.mrb[61].mxu1  ;;  %v3417_v40 = vadd.f32 %v3416_v31, %v6695_v29 }
 0xc90   :  { %v3420_v2 = vpop.f32.mrb[62].mxu1  ;;  %v3419_v41 = vadd.f32 %v3418_v35, %v6689_v24  ;;  %v5906_v35 = vld [vmem:[#allocation5 + $0x8] ss:$12 sps:$4 sm:$0xff]  }
 0xc91   :  { %v3421_v37 = vpop.f32.mrb[63].mxu1  ;;  %v5907_v2 = vld [vmem:[#allocation5 + $0x188] ss:$12 sps:$4 sm:$0xff]  }
 0xc92   :  { %v3463_v43 = vadd.f32 %v3419_v41, %v3417_v40  ;;  %v5908_v37 = vld [vmem:[#allocation5 + $0xe0] ss:$12 sps:$4 sm:$0xff]  }
 0xc96   :  { %v3457_v42 = vpop.f32.mrb[64].mxu1 }
 0xc97   :  { %v3458_v44 = vadd.f32 %v3457_v42, %v6692_v47  ;;  %v5126_v45 = vpop.f32.mrb[65].mxu1  ;;  %v5911_v42 = vld [vmem:[#allocation5 + $0xf8] ss:$12 sps:$4 sm:$0xff]  }
 0xc98   :  { %v3460_v46 = vpop.f32.mrb[66].mxu1  ;;  %v5914_v45 = vld [vmem:[#allocation5 + $0x110] ss:$12 sps:$4 sm:$0xff]  }
 0xc99   :  { %v5127_v48 = vpop.f32.mrb[67].mxu1  ;;  %v3464_v49 = vadd.f32 %v3463_v43, %v3458_v44  ;;  %v5912_v43 = vld [vmem:[#allocation5 + $0x38] ss:$12 sps:$4 sm:$0xff]   ;;  %v5915_v46 = vld [vmem:[#allocation5 + $0x50] ss:$12 sps:$4 sm:$0xff]  }
 0xc9a   :  { %v5916_v48 = vld [vmem:[#allocation5 + $0x1d0] ss:$12 sps:$4 sm:$0xff]  }
 0xc9b   :  { %3465 = vadd.xlane.f32.xlu0 %v3464_v49  ;;  %v5917_v49 = vld [vmem:[#allocation5 + $0x128] ss:$12 sps:$4 sm:$0xff]  }
 0xd28   :  { %v3466_v51 = vpop.xlane.xlu0 %3465 }
 0xd29   :  { %v3467_v9 = vmul.f32 0.0033333334, %v3466_v51  ;;  %v5918_v51 = vld [vmem:[#allocation5 + $0x68] ss:$12 sps:$4 sm:$0xff]  }
 0xd2b   :  { %v3468_v52 = vsub.f32 %v3417_v40, %v3467_v9  ;;  %v3469_v38 = vsub.f32 %v3419_v41, %v3467_v9  ;;  %v3470_v4 = vsub.f32 %v3458_v44, %v3467_v9  ;;  %v3478_v24 = vmul.f32 84.0, %v3467_v9  ;;  %v5909_v40 = vld [vmem:[#allocation5 + $0x20] ss:$12 sps:$4 sm:$0xff]   ;;  %v5913_v44 = vld [vmem:[#allocation5 + $0x1b8] ss:$12 sps:$4 sm:$0xff]  }
 0xd2c   :  { %v5910_v41 = vld [vmem:[#allocation5 + $0x1a0] ss:$12 sps:$4 sm:$0xff]  }
 0xd2d   :  { %v3471_v5 = vmul.f32 %v3468_v52, %v3468_v52  ;;  %v3472_v10 = vmul.f32 %v3469_v38, %v3469_v38  ;;  %v3473_v13 = vmul.f32 %v3470_v4, %v3470_v4  ;;  %v3479_v21 = vmul.f32 %v3478_v24, %v3467_v9  ;;  %v5919_v9 = vld [vmem:[#allocation5 + $0x1e8] ss:$12 sps:$4 sm:$0xff]   ;;  %v5928_v24 = vld [vmem:[#allocation5 + $0x230] ss:$12 sps:$4 sm:$0xff]  }
 0xd2f   :  { %v3474_v29 = vadd.f32 %v3472_v10, %v3471_v5  ;;  %v5923_v5 = vld [vmem:[#allocation5 + $0x158] ss:$12 sps:$4 sm:$0xff]  }
 0xd30   :  { %v5924_v10 = vld [vmem:[#allocation5 + $0x98] ss:$12 sps:$4 sm:$0xff]  }
 0xd31   :  { %v3475_v20 = vadd.f32 %v3474_v29, %v3473_v13  ;;  %v5925_v13 = vld [vmem:[#allocation5 + $0x218] ss:$12 sps:$4 sm:$0xff]   ;;  %v5926_v29 = vld [vmem:[#allocation5 + $0x170] ss:$12 sps:$4 sm:$0xff]  }
 0xd33   :  { %3476 = vadd.xlane.f32.xlu1 %v3475_v20  ;;  %v5927_v20 = vld [vmem:[#allocation5 + $0xb0] ss:$12 sps:$4 sm:$0xff]  }
 0xdc0   :  { %v3477_v23 = vpop.xlane.xlu1 %3476 }
 0xdc1   :  { %v3480_v47 = vsub.f32 %v3477_v23, %v3479_v21  ;;  %v5929_v21 = vld [vmem:[#allocation2 + $0x4] ss:$36 sps:$4 sm:$0xff]  }
 0xdc2   :  { %v5930_v23 = vld [vmem:[#allocation2 + $0x484] ss:$36 sps:$4 sm:$0xff]  }
 0xdc3   :  { %v3481_v25 = vmul.f32 0.0033333334, %v3480_v47  ;;  %v5931_v47 = vld [vmem:[#allocation2] ss:$36 sps:$4 sm:$0xff]  }
 0xdc5   :  { %v3482_v27 = vadd.f32 1e-05, %v3481_v25  ;;  %v5932_v25 = vld [vmem:[#allocation2 + $0x4c] ss:$36 sps:$4 sm:$0xff]  }
 0xdc7   :  { %5654 = vrsqrt.f32 %v3482_v27  ;;  %v5933_v27 = vld [vmem:[#allocation2 + $0x480] ss:$36 sps:$4 sm:$0xff]  }
 0xdd1   :  { %v5655_v53 = vpop.eup %5654 }
 0xdd2   :  { %v3485_v34 = vmul.f32 %v5655_v53, %v3469_v38  ;;  %v3486_v39 = vmul.f32 %v5655_v53, %v3470_v4  ;;  %v3484_v22 = vmul.f32 %v5655_v53, %v3468_v52  ;;  %v5920_v52 = vld [vmem:[#allocation5 + $0x140] ss:$12 sps:$4 sm:$0xff]  }
 0xdd3   :  { %v5921_v38 = vld [vmem:[#allocation5 + $0x80] ss:$12 sps:$4 sm:$0xff]  }
 0xdd4   :  { %v3488_v56 = vmul.f32 %v3485_v34, %v6603_v7  ;;  %v3489_v59 = vmul.f32 %v3486_v39, %v6982_v58  ;;  %v3487_v0 = vmul.f32 %v3484_v22, %v6983_v15  ;;  %v5922_v4 = vld [vmem:[#allocation5 + $0x200] ss:$12 sps:$4 sm:$0xff]   ;;  %v5936_v39 = vld [vmem:[#allocation2 + $0x94] ss:$36 sps:$4 sm:$0xff]  }
 0xdd5   :  { %v5934_v53 = vld [vmem:[#allocation2 + $0x4cc] ss:$36 sps:$4 sm:$0xff]  }
 0xdd6   :  { %v3491_v11 = vadd.f32 %v3488_v56, %v6984_v62  ;;  %v3492_v54 = vadd.f32 %v3489_v59, %v6985_v8  ;;  %v3490_v60 = vadd.f32 %v3487_v0, %v6986_v14  ;;  %v5935_v34 = vld [vmem:[#allocation2 + $0x48] ss:$36 sps:$4 sm:$0xff]   ;;  %v5938_v56 = vld [vmem:[#allocation2 + $0x514] ss:$36 sps:$4 sm:$0xff]   ;;  %v5940_v0 = vld [vmem:[#allocation2 + $0xdc] ss:$36 sps:$4 sm:$0xff]  }
 0xdd7   :  { %v5937_v22 = vld [vmem:[#allocation2 + $0x4c8] ss:$36 sps:$4 sm:$0xff]   ;;  %v5939_v59 = vld [vmem:[#allocation2 + $0x90] ss:$36 sps:$4 sm:$0xff]  }
 0xdd8   :  { %v3494_v36 = vpack.c.bf16 %v3491_v11, %v3491_v11  ;;  %v6796_v28 = vpack.c.bf16 %v3492_v54, %v3492_v54  ;;  %v3493_v31 = vpack.c.bf16 %v3490_v60, %v3490_v60  ;;  %v5941_v11 = vld [vmem:[#allocation2 + $0x510] ss:$36 sps:$4 sm:$0xff]   ;;  %v5942_v54 = vld [vmem:[#allocation2 + $0x55c] ss:$36 sps:$4 sm:$0xff]  }
 0xdd9   :  { %v5943_v60 = vld [vmem:[#allocation2 + $0xd8] ss:$36 sps:$4 sm:$0xff]  }
 0xdda   :  { %3528 = vmatprep.mubr.bf16.mxu0 %v3494_v36  ;;  %3570 = vmatmul.mubr.bf16.vlgmr.msra.gmra.mrb[68].mxu1 %v6796_v28 }
 0xddb   :  { %4948 = vmatpush3.bf16.msra.mxu1 %v5906_v35  ;;  %3529 = vmatmul.mubr.bf16.vlgmr.msra.gmra.mrb[44].mxu0 %v3493_v31  ;;  %v5947_v35 = vld [vmem:[#allocation2 + $0x120] ss:$36 sps:$4 sm:$0xff]  }
 0xddc   :  { %3610 = vmatprep.mubr.bf16.mxu1 %v3494_v36  ;;  %5129 = vmatpush3.bf16.msra.mxu0 %v5907_v2  ;;  %v5944_v36 = vld [vmem:[#allocation2 + $0x124] ss:$36 sps:$4 sm:$0xff]   ;;  %v5948_v2 = vld [vmem:[#allocation2 + $0x16c] ss:$36 sps:$4 sm:$0xff]  }
 0xddd   :  { %4949 = vmatprep.subr.bf16.mxu1 %v5908_v37  ;;  %5130 = vmatprep.subr.bf16.mxu0 %v6981_v55  ;;  %v5949_v37 = vld [vmem:[#allocation2 + $0x5a0] ss:$36 sps:$4 sm:$0xff]  }
 0xdde   :  { %5144 = vmatprep.mubr.msk.bf16.mxu0 %vm6300_vm0, %v6981_v55 }
 0xddf   :  { %4950 = vmatpush3.bf16.msra.mxu1 %v5909_v40  ;;  %v5950_v40 = vld [vmem:[#allocation2 + $0x5ec] ss:$36 sps:$4 sm:$0xff]  }
 0xde0   :  { %5131 = vmatpush3.bf16.msra.mxu0 %v5910_v41  ;;  %4951 = vmatprep.subr.bf16.mxu1 %v5911_v42  ;;  %v5951_v41 = vld [vmem:[#allocation2 + $0x168] ss:$36 sps:$4 sm:$0xff]   ;;  %v5952_v42 = vld [vmem:[#allocation2 + $0x1b4] ss:$36 sps:$4 sm:$0xff]  }
 0xde1   :  { %5132 = vmatprep.subr.bf16.mxu0 %v6981_v55 }
 0xde3   :  { %4952 = vmatpush3.bf16.msra.mxu1 %v5912_v43  ;;  %v5953_v43 = vld [vmem:[#allocation2 + $0x5e8] ss:$36 sps:$4 sm:$0xff]  }
 0xde4   :  { %5133 = vmatpush3.bf16.msra.mxu0 %v5913_v44  ;;  %4953 = vmatprep.subr.bf16.mxu1 %v5914_v45  ;;  %v5954_v44 = vld [vmem:[#allocation2 + $0x634] ss:$36 sps:$4 sm:$0xff]  }
 0xde5   :  { %5134 = vmatprep.subr.bf16.mxu0 %v6981_v55  ;;  %v5955_v45 = vld [vmem:[#allocation2 + $0x1b0] ss:$36 sps:$4 sm:$0xff]  }
 0xde7   :  { %4954 = vmatpush3.bf16.msra.mxu1 %v5915_v46  ;;  %v5956_v46 = vld [vmem:[#allocation2 + $0x1fc] ss:$36 sps:$4 sm:$0xff]  }
 0xde8   :  { %5135 = vmatpush3.bf16.msra.mxu0 %v5916_v48  ;;  %4955 = vmatprep.subr.bf16.mxu1 %v5917_v49  ;;  %v5957_v48 = vld [vmem:[#allocation2 + $0x630] ss:$36 sps:$4 sm:$0xff]   ;;  %v5958_v49 = vld [vmem:[#allocation2 + $0x67c] ss:$36 sps:$4 sm:$0xff]  }
 0xde9   :  { %5136 = vmatprep.subr.bf16.mxu0 %v6981_v55 }
 0xdeb   :  { %4956 = vmatpush3.bf16.msra.mxu1 %v5918_v51  ;;  %v5959_v51 = vld [vmem:[#allocation2 + $0x1f8] ss:$36 sps:$4 sm:$0xff]  }
 0xdec   :  { %5137 = vmatpush3.bf16.msra.mxu0 %v5919_v9  ;;  %4957 = vmatprep.subr.bf16.mxu1 %v5920_v52  ;;  %v5960_v9 = vld [vmem:[#allocation2 + $0x244] ss:$36 sps:$4 sm:$0xff]   ;;  %v5961_v52 = vld [vmem:[#allocation2 + $0x678] ss:$36 sps:$4 sm:$0xff]  }
 0xded   :  { %5138 = vmatprep.subr.bf16.mxu0 %v6981_v55 }
 0xdef   :  { %4958 = vmatpush3.bf16.msra.mxu1 %v5921_v38  ;;  %v5962_v38 = vld [vmem:[#allocation2 + $0xc] ss:$36 sps:$4 sm:$0xff]  }
 0xdf0   :  { %5139 = vmatpush3.bf16.msra.mxu0 %v5922_v4  ;;  %4959 = vmatprep.subr.bf16.mxu1 %v5923_v5  ;;  %v5963_v4 = vld [vmem:[#allocation2 + $0x240] ss:$36 sps:$4 sm:$0xff]   ;;  %v5964_v5 = vld [vmem:[#allocation2 + $0x28c] ss:$36 sps:$4 sm:$0xff]  }
 0xdf1   :  { %5140 = vmatprep.subr.bf16.mxu0 %v6981_v55 }
 0xdf3   :  { %4960 = vmatpush3.bf16.msra.mxu1 %v5924_v10  ;;  %v5965_v10 = vld [vmem:[#allocation2 + $0x288] ss:$36 sps:$4 sm:$0xff]  }
 0xdf4   :  { %5141 = vmatpush3.bf16.msra.mxu0 %v5925_v13  ;;  %4961 = vmatprep.subr.bf16.mxu1 %v5926_v29  ;;  %v5966_v13 = vld [vmem:[#allocation2 + $0x2d4] ss:$36 sps:$4 sm:$0xff]  }
 0xdf5   :  { %5142 = vmatprep.subr.bf16.mxu0 %v6981_v55  ;;  %v5967_v29 = vld [vmem:[#allocation2 + $0x2d0] ss:$36 sps:$4 sm:$0xff]  }
 0xdf7   :  { %4962 = vmatpush3.bf16.msra.mxu1 %v5927_v20  ;;  %v5968_v20 = vld [vmem:[#allocation2 + $0x31c] ss:$36 sps:$4 sm:$0xff]  }
 0xdf8   :  { %5143 = vmatpush3.bf16.msra.mxu0 %v5928_v24  ;;  %3694 = vmatprep.subr.bf16.mxu1 %v5929_v21  ;;  %v5969_v24 = vld [vmem:[#allocation2 + $0x318] ss:$36 sps:$4 sm:$0xff]   ;;  %v5970_v21 = vld [vmem:[#allocation2 + $0x364] ss:$36 sps:$4 sm:$0xff]  }
 0xdf9   :  { %3735 = vmatprep.subr.bf16.mxu0 %v5930_v23  ;;  %v5971_v23 = vld [vmem:[#allocation2 + $0x360] ss:$36 sps:$4 sm:$0xff]  }
 0xdfa   :  { %3611 = vmatmul.mubr.bf16.vlgmr.msra.gmra.mrb[72].mxu1 %v3493_v31  ;;  %v5946_v31 = vld [vmem:[#allocation2 + $0x5a4] ss:$36 sps:$4 sm:$0xff]  }
 0xdfb   :  { %5145 = vmatmul.mubr.bf16.vlgmr.msra.gmra.mrb[48].mxu0 %v6796_v28  ;;  %3695 = vmatpush1.bf16.msra.mxu1 %v5931_v47  ;;  %v5945_v28 = vld [vmem:[#allocation2 + $0x558] ss:$36 sps:$4 sm:$0xff]   ;;  %v5972_v47 = vld [vmem:[#allocation2 + $0x3ac] ss:$36 sps:$4 sm:$0xff]  }
 0xdfc   :  { %3696 = vmatprep.subr.bf16.mxu1 %v5932_v25  ;;  %3736 = vmatpush1.bf16.msra.mxu0 %v5933_v27  ;;  %v5973_v25 = vld [vmem:[#allocation2 + $0x3a8] ss:$36 sps:$4 sm:$0xff]   ;;  %v5974_v27 = vld [vmem:[#allocation2 + $0x3f4] ss:$36 sps:$4 sm:$0xff]  }
 0xdfd   :  { %3737 = vmatprep.subr.bf16.mxu0 %v5934_v53  ;;  %3767 = vmatprep.mubr.bf16.mxu0 %v6980_v18  ;;  %v5975_v53 = vld [vmem:[#allocation2 + $0x3f0] ss:$36 sps:$4 sm:$0xff]  }
 0xdff   :  { %3697 = vmatpush1.bf16.msra.mxu1 %v5935_v34  ;;  %v5976_v34 = vld [vmem:[#allocation2 + $0x43c] ss:$36 sps:$4 sm:$0xff]  }
 0xe00   :  { %3698 = vmatprep.subr.bf16.mxu1 %v5936_v39  ;;  %3738 = vmatpush1.bf16.msra.mxu0 %v5937_v22  ;;  %v5977_v39 = vld [vmem:[#allocation2 + $0x438] ss:$36 sps:$4 sm:$0xff]   ;;  %v5978_v22 = vld [vmem:[#allocation2 + $0x48c] ss:$36 sps:$4 sm:$0xff]  }
 0xe01   :  { %3739 = vmatprep.subr.bf16.mxu0 %v5938_v56 }
 0xe03   :  { %3699 = vmatpush1.bf16.msra.mxu1 %v5939_v59 }
 0xe04   :  { %3700 = vmatprep.subr.bf16.mxu1 %v5940_v0  ;;  %3740 = vmatpush1.bf16.msra.mxu0 %v5941_v11 }
 0xe05   :  { %3741 = vmatprep.subr.bf16.mxu0 %v5942_v54 }
 0xe07   :  { %3701 = vmatpush1.bf16.msra.mxu1 %v5943_v60 }
 0xe08   :  { %3702 = vmatprep.subr.bf16.mxu1 %v5944_v36  ;;  %3742 = vmatpush1.bf16.msra.mxu0 %v5945_v28 }
 0xe09   :  { %3743 = vmatprep.subr.bf16.mxu0 %v5946_v31 }
 0xe0b   :  { %3703 = vmatpush1.bf16.msra.mxu1 %v5947_v35 }
 0xe0c   :  { %3704 = vmatprep.subr.bf16.mxu1 %v5948_v2  ;;  %3744 = vmatpush1.bf16.msra.mxu0 %v5949_v37 }
 0xe0d   :  { %3745 = vmatprep.subr.bf16.mxu0 %v5950_v40 }
 0xe0f   :  { %3705 = vmatpush1.bf16.msra.mxu1 %v5951_v41 }
 0xe10   :  { %3706 = vmatprep.subr.bf16.mxu1 %v5952_v42  ;;  %3746 = vmatpush1.bf16.msra.mxu0 %v5953_v43 }
 0xe11   :  { %3747 = vmatprep.subr.bf16.mxu0 %v5954_v44 }
 0xe13   :  { %3707 = vmatpush1.bf16.msra.mxu1 %v5955_v45 }
 0xe14   :  { %3708 = vmatprep.subr.bf16.mxu1 %v5956_v46  ;;  %3748 = vmatpush1.bf16.msra.mxu0 %v5957_v48 }
 0xe15   :  { %3749 = vmatprep.subr.bf16.mxu0 %v5958_v49  ;;  %v6815_v49 = vld [vmem:[%s6950_s0] sm:$0xff] }
 0xe17   :  { %3709 = vmatpush1.bf16.msra.mxu1 %v5959_v51 }
 0xe18   :  { %3710 = vmatprep.subr.bf16.mxu1 %v5960_v9  ;;  %3750 = vmatpush1.bf16.msra.mxu0 %v5961_v52  ;;  %v6821_v9 = vld [vmem:[%s6950_s0 + $0x8] sm:$0xff] }
 0xe19   :  { %3776 = vmatprep.subr.bf16.mxu0 %v5962_v38 }
 0xe1b   :  { %3711 = vmatpush1.bf16.msra.mxu1 %v5963_v4 }
 0xe1c   :  { %3712 = vmatprep.subr.bf16.mxu1 %v5964_v5 }
 0xe1f   :  { %3713 = vmatpush1.bf16.msra.mxu1 %v5965_v10  ;;  %v6828_v10 = vld [vmem:[%s6950_s0 + $0x10] sm:$0xff]  ;;  %s6301_s0 = smov [#allocation7]  }
 0xe20   :  { %3714 = vmatprep.subr.bf16.mxu1 %v5966_v13  ;;  %s4539_s22 = sshll.u32 %s6301_s0, 4  ;;  %s4540_s22 = int_to_ptr.vmem [resolvable:$true] %s4539_s22 }
 0xe21   :  { %s6264_s23 = scalar_lea.vmem %s4540_s22, 384  ;;  %p6269_p3 = scmp.lt.s32.totalorder %s4540_s22, %s4540_s22 }
 0xe22   :  { %p6265_p2 = scmp.ne.s32.totalorder %s4540_s22, %s6264_s23  ;;  %p6270_p4 = scmp.lt.s32.totalorder %s6264_s23, %s6264_s23 }
 0xe23   :  { %3715 = vmatpush1.bf16.msra.mxu1 %v5967_v29 }
 0xe24   :  { %3716 = vmatprep.subr.bf16.mxu1 %v5968_v20  ;;  %p6271_p5 = por %p6270_p4, %p6269_p3 }
 0xe26   :  { %p6272_p6 = pnand %p6271_p5, %p6265_p2 }
 0xe27   :  { %3717 = vmatpush1.bf16.msra.mxu1 %v5969_v24 }
 0xe28   :  { %3718 = vmatprep.subr.bf16.mxu1 %v5970_v21 }
 0xe2b   :  { %3719 = vmatpush1.bf16.msra.mxu1 %v5971_v23 }
 0xe2c   :  { %3720 = vmatprep.subr.bf16.mxu1 %v5972_v47 }
 0xe2f   :  { %3721 = vmatpush1.bf16.msra.mxu1 %v5973_v25 }
 0xe30   :  { %3722 = vmatprep.subr.bf16.mxu1 %v5974_v27 }
 0xe33   :  { %3723 = vmatpush1.bf16.msra.mxu1 %v5975_v53 }
 0xe34   :  { %3724 = vmatprep.subr.bf16.mxu1 %v5976_v34 }
 0xe37   :  { %3725 = vmatpush1.bf16.msra.mxu1 %v5977_v39 }
 0xe38   :  { %3817 = vmatprep.subr.bf16.mxu1 %v5978_v22 }
 0xead   :  { %v3571_v56 = vpop.f32.mrb[68].mxu1 }
 0xeae   :  { %v3530_v59 = vpop.f32.mrb[44].mxu0  ;;  %v3573_v0 = vpop.f32.mrb[69].mxu1 }
 0xeaf   :  { %v3531_v11 = vadd.f32 %v3530_v59, %v6647_v1  ;;  %v3532_v54 = vpop.f32.mrb[45].mxu0  ;;  %v3575_v60 = vpop.f32.mrb[70].mxu1 }
 0xeb0   :  { %v3533_v36 = vadd.f32 %v3532_v54, %v6650_v57  ;;  %v3534_v28 = vpop.f32.mrb[46].mxu0  ;;  %v3576_v31 = vpop.f32.mrb[71].mxu1 }
 0xeb1   :  { %v3572_v35 = vadd.f32 %v3571_v56, %v3531_v11  ;;  %v3535_v2 = vpop.f32.mrb[47].mxu0 }
 0xeb2   :  { %v3574_v37 = vadd.f32 %v3573_v0, %v3533_v36 }
 0xeb3   :  { %v3658_v51 = vadd.f32 %v6815_v49, %v3572_v35 }
 0xeb4   :  { %v3659_v52 = vadd.f32 %v6821_v9, %v3574_v37 }
 0xeb6   :  { %v3661_v29 = vadd.f32 %v3659_v52, %v3658_v51 }
 0xecd   :  { %v4963_v40 = vpop.f32.mrb[72].mxu1 }
 0xece   :  { %v4964_v41 = vpop.f32.mrb[73].mxu1  ;;  %v3652_v42 = vpop.f32.mrb[48].mxu0 }
 0xecf   :  { %v4965_v43 = vadd.f32 %v4964_v41, %v4963_v40  ;;  %v4966_v44 = vpop.f32.mrb[74].mxu1  ;;  %v5146_v45 = vpop.f32.mrb[49].mxu0 }
 0xed0   :  { %v4967_v46 = vpop.f32.mrb[75].mxu1  ;;  %v3655_v48 = vpop.f32.mrb[50].mxu0 }
 0xed1   :  { %v3613_v38 = vadd.f32 %v4965_v43, %v6655_v19  ;;  %v5147_v4 = vpop.f32.mrb[51].mxu0  ;;  %v5982_v48 = vld [vmem:[#allocation2 + $0x8] ss:$36 sps:$4 sm:$0xff]  }
 0xed2   :  { %v5986_v4 = vld [vmem:[#allocation2 + $0x50] ss:$36 sps:$4 sm:$0xff]  }
 0xed3   :  { %v3653_v5 = vadd.f32 %v3652_v42, %v3613_v38  ;;  %v5985_v38 = vld [vmem:[#allocation2 + $0x4d4] ss:$36 sps:$4 sm:$0xff]  }
 0xed5   :  { %v3660_v13 = vadd.f32 %v6828_v10, %v3653_v5  ;;  %v5987_v5 = vld [vmem:[#allocation2 + $0x4d0] ss:$36 sps:$4 sm:$0xff]  }
 0xed7   :  { %v3662_v20 = vadd.f32 %v3661_v29, %v3660_v13  ;;  %v5989_v29 = vld [vmem:[#allocation2 + $0x51c] ss:$36 sps:$4 sm:$0xff]  }
 0xed9   :  { %3663 = vadd.xlane.f32.xlu0 %v3662_v20  ;;  %v5990_v20 = vld [vmem:[#allocation2 + $0x98] ss:$36 sps:$4 sm:$0xff]  }
 0xf66   :  { %v3664_v24 = vpop.xlane.xlu0 %3663 }
 0xf67   :  { %v3665_v21 = vmul.f32 0.0033333334, %v3664_v24  ;;  %v5991_v24 = vld [vmem:[#allocation2 + $0x518] ss:$36 sps:$4 sm:$0xff]  }
 0xf69   :  { %v3666_v23 = vsub.f32 %v3658_v51, %v3665_v21  ;;  %v3667_v47 = vsub.f32 %v3659_v52, %v3665_v21  ;;  %v3668_v25 = vsub.f32 %v3660_v13, %v3665_v21  ;;  %v3676_v56 = vmul.f32 84.0, %v3665_v21  ;;  %v5983_v51 = vld [vmem:[#allocation2 + $0x488] ss:$36 sps:$4 sm:$0xff]   ;;  %v5984_v52 = vld [vmem:[#allocation2 + $0x54] ss:$36 sps:$4 sm:$0xff]  }
 0xf6a   :  { %v5988_v13 = vld [vmem:[#allocation2 + $0x9c] ss:$36 sps:$4 sm:$0xff]  }
 0xf6b   :  { %v3669_v27 = vmul.f32 %v3666_v23, %v3666_v23  ;;  %v3670_v53 = vmul.f32 %v3667_v47, %v3667_v47  ;;  %v3671_v34 = vmul.f32 %v3668_v25, %v3668_v25  ;;  %v3677_v59 = vmul.f32 %v3676_v56, %v3665_v21  ;;  %v5992_v21 = vld [vmem:[#allocation2 + $0xe4] ss:$36 sps:$4 sm:$0xff]   ;;  %v6001_v56 = vld [vmem:[#allocation2 + $0x5f4] ss:$36 sps:$4 sm:$0xff]  }
 0xf6d   :  { %v3672_v39 = vadd.f32 %v3670_v53, %v3669_v27  ;;  %v5996_v27 = vld [vmem:[#allocation2 + $0x12c] ss:$36 sps:$4 sm:$0xff]  }
 0xf6e   :  { %v5997_v53 = vld [vmem:[#allocation2 + $0x5ac] ss:$36 sps:$4 sm:$0xff]  }
 0xf6f   :  { %v3673_v22 = vadd.f32 %v3672_v39, %v3671_v34  ;;  %v5998_v34 = vld [vmem:[#allocation2 + $0x128] ss:$36 sps:$4 sm:$0xff]  }
 0xf70   :  { %v5999_v39 = vld [vmem:[#allocation2 + $0x5a8] ss:$36 sps:$4 sm:$0xff]  }
 0xf71   :  { %3674 = vadd.xlane.f32.xlu1 %v3673_v22  ;;  %v6000_v22 = vld [vmem:[#allocation2 + $0x174] ss:$36 sps:$4 sm:$0xff]  }
 0xffe   :  { %v3675_v0 = vpop.xlane.xlu1 %3674 }
 0xfff   :  { %v3678_v11 = vsub.f32 %v3675_v0, %v3677_v59  ;;  %v6002_v59 = vld [vmem:[#allocation2 + $0x170] ss:$36 sps:$4 sm:$0xff]  }
0x1000   :  { %v6003_v0 = vld [vmem:[#allocation2 + $0x5f0] ss:$36 sps:$4 sm:$0xff]  }
0x1001   :  { %v3679_v54 = vmul.f32 0.0033333334, %v3678_v11  ;;  %v6004_v11 = vld [vmem:[#allocation2 + $0x1bc] ss:$36 sps:$4 sm:$0xff]  }
0x1003   :  { %v3680_v60 = vadd.f32 1e-05, %v3679_v54  ;;  %v6005_v54 = vld [vmem:[#allocation2 + $0x63c] ss:$36 sps:$4 sm:$0xff]  }
0x1005   :  { %5656 = vrsqrt.f32 %v3680_v60  ;;  %v6006_v60 = vld [vmem:[#allocation2 + $0x1b8] ss:$36 sps:$4 sm:$0xff]  }
0x100f   :  { %v5657_v36 = vpop.eup %5656 }
0x1010   :  { %v3683_v28 = vmul.f32 %v5657_v36, %v3667_v47  ;;  %v3684_v31 = vmul.f32 %v5657_v36, %v3668_v25  ;;  %v3682_v35 = vmul.f32 %v5657_v36, %v3666_v23  ;;  %v5993_v23 = vld [vmem:[#allocation2 + $0x564] ss:$36 sps:$4 sm:$0xff]   ;;  %v6007_v36 = vld [vmem:[#allocation2 + $0x638] ss:$36 sps:$4 sm:$0xff]  }
0x1011   :  { %v5994_v47 = vld [vmem:[#allocation2 + $0xe0] ss:$36 sps:$4 sm:$0xff]  }
0x1012   :  { %v3686_v2 = vmul.f32 %v3683_v28, %v6668_v26  ;;  %v3687_v37 = vmul.f32 %v3684_v31, %v6671_v17  ;;  %v3685_v40 = vmul.f32 %v3682_v35, %v6674_v6  ;;  %v5995_v25 = vld [vmem:[#allocation2 + $0x560] ss:$36 sps:$4 sm:$0xff]  }
0x1013   :  { %v6008_v28 = vld [vmem:[#allocation2 + $0x204] ss:$36 sps:$4 sm:$0xff]  }
0x1014   :  { %v6835_v41 = vadd.f32 %v3686_v2, %v6677_v63  ;;  %v6838_v42 = vadd.f32 %v3687_v37, %v6680_v33  ;;  %v6841_v43 = vadd.f32 %v3685_v40, %v6683_v3  ;;  %v6009_v31 = vld [vmem:[#allocation2 + $0x684] ss:$36 sps:$4 sm:$0xff]   ;;  %v6012_v37 = vld [vmem:[#allocation2 + $0x24c] ss:$36 sps:$4 sm:$0xff]   ;;  %v6013_v40 = vld [vmem:[#allocation2 + $0x14] ss:$36 sps:$4 sm:$0xff]  }
0x1015   :  { %v6010_v35 = vld [vmem:[#allocation2 + $0x200] ss:$36 sps:$4 sm:$0xff]  }
0x1016   :  { %v6845_v44 = vpack.c.bf16 %v6835_v41, %v6835_v41  ;;  %v6849_v45 = vpack.c.bf16 %v6838_v42, %v6838_v42  ;;  %v6853_v46 = vpack.c.bf16 %v6841_v43, %v6841_v43  ;;  %v6011_v2 = vld [vmem:[#allocation2 + $0x680] ss:$36 sps:$4 sm:$0xff]  }
0x1018   :  { %3726 = vmatprep.mubr.bf16.mxu1 %v6845_v44  ;;  %3768 = vmatmul.mubr.bf16.vlgmr.msra.gmra.mrb[52].mxu0 %v6849_v45 }
0x1019   :  { %3777 = vmatpush1.bf16.msra.mxu0 %v5982_v48  ;;  %3727 = vmatmul.mubr.bf16.vlgmr.msra.gmra.mrb[76].mxu1 %v6853_v46  ;;  %v6014_v48 = vld [vmem:[#allocation2 + $0x248] ss:$36 sps:$4 sm:$0xff]  }
0x101a   :  { %3808 = vmatprep.mubr.bf16.mxu0 %v6845_v44  ;;  %3818 = vmatpush1.bf16.msra.mxu1 %v5983_v51  ;;  %v6015_v51 = vld [vmem:[#allocation2 + $0x10] ss:$36 sps:$4 sm:$0xff]  }
0x101b   :  { %3778 = vmatprep.subr.bf16.mxu0 %v5984_v52  ;;  %3819 = vmatprep.subr.bf16.mxu1 %v5985_v38  ;;  %v6016_v52 = vld [vmem:[#allocation2 + $0x294] ss:$36 sps:$4 sm:$0xff]   ;;  %v6017_v38 = vld [vmem:[#allocation2 + $0x5c] ss:$36 sps:$4 sm:$0xff]  }
0x101c   :  { %3849 = vmatprep.mubr.bf16.mxu1 %v6980_v18 }
0x101d   :  { %3779 = vmatpush1.bf16.msra.mxu0 %v5986_v4  ;;  %v6018_v4 = vld [vmem:[#allocation2 + $0x290] ss:$36 sps:$4 sm:$0xff]  }
0x101e   :  { %3820 = vmatpush1.bf16.msra.mxu1 %v5987_v5  ;;  %3780 = vmatprep.subr.bf16.mxu0 %v5988_v13  ;;  %v6019_v5 = vld [vmem:[#allocation2 + $0x58] ss:$36 sps:$4 sm:$0xff]  }
0x101f   :  { %3821 = vmatprep.subr.bf16.mxu1 %v5989_v29  ;;  %v6020_v13 = vld [vmem:[#allocation2 + $0x2dc] ss:$36 sps:$4 sm:$0xff]   ;;  %v6021_v29 = vld [vmem:[#allocation2 + $0xa4] ss:$36 sps:$4 sm:$0xff]  }
0x1021   :  { %3781 = vmatpush1.bf16.msra.mxu0 %v5990_v20  ;;  %v6022_v20 = vld [vmem:[#allocation2 + $0x2d8] ss:$36 sps:$4 sm:$0xff]  }
0x1022   :  { %3822 = vmatpush1.bf16.msra.mxu1 %v5991_v24  ;;  %3782 = vmatprep.subr.bf16.mxu0 %v5992_v21  ;;  %v6023_v24 = vld [vmem:[#allocation2 + $0xa0] ss:$36 sps:$4 sm:$0xff]  }
0x1023   :  { %3823 = vmatprep.subr.bf16.mxu1 %v5993_v23  ;;  %v6024_v21 = vld [vmem:[#allocation2 + $0x324] ss:$36 sps:$4 sm:$0xff]   ;;  %v6025_v23 = vld [vmem:[#allocation2 + $0xec] ss:$36 sps:$4 sm:$0xff]  }
0x1025   :  { %3783 = vmatpush1.bf16.msra.mxu0 %v5994_v47  ;;  %v6026_v47 = vld [vmem:[#allocation2 + $0x320] ss:$36 sps:$4 sm:$0xff]  }
0x1026   :  { %3824 = vmatpush1.bf16.msra.mxu1 %v5995_v25  ;;  %3784 = vmatprep.subr.bf16.mxu0 %v5996_v27  ;;  %v6027_v25 = vld [vmem:[#allocation2 + $0xe8] ss:$36 sps:$4 sm:$0xff]  }
0x1027   :  { %3825 = vmatprep.subr.bf16.mxu1 %v5997_v53  ;;  %v6028_v27 = vld [vmem:[#allocation2 + $0x36c] ss:$36 sps:$4 sm:$0xff]   ;;  %v6029_v53 = vld [vmem:[#allocation2 + $0x134] ss:$36 sps:$4 sm:$0xff]  }
0x1029   :  { %3785 = vmatpush1.bf16.msra.mxu0 %v5998_v34  ;;  %v6030_v34 = vld [vmem:[#allocation2 + $0x368] ss:$36 sps:$4 sm:$0xff]  }
0x102a   :  { %3826 = vmatpush1.bf16.msra.mxu1 %v5999_v39  ;;  %3786 = vmatprep.subr.bf16.mxu0 %v6000_v22  ;;  %v6031_v39 = vld [vmem:[#allocation2 + $0x130] ss:$36 sps:$4 sm:$0xff]  }
0x102b   :  { %3827 = vmatprep.subr.bf16.mxu1 %v6001_v56  ;;  %v6032_v22 = vld [vmem:[#allocation2 + $0x3b4] ss:$36 sps:$4 sm:$0xff]   ;;  %v6033_v56 = vld [vmem:[#allocation2 + $0x17c] ss:$36 sps:$4 sm:$0xff]  }
0x102d   :  { %3787 = vmatpush1.bf16.msra.mxu0 %v6002_v59  ;;  %v6034_v59 = vld [vmem:[#allocation2 + $0x3b0] ss:$36 sps:$4 sm:$0xff]  }
0x102e   :  { %3828 = vmatpush1.bf16.msra.mxu1 %v6003_v0  ;;  %3788 = vmatprep.subr.bf16.mxu0 %v6004_v11  ;;  %v6035_v0 = vld [vmem:[#allocation2 + $0x178] ss:$36 sps:$4 sm:$0xff]  }
0x102f   :  { %3829 = vmatprep.subr.bf16.mxu1 %v6005_v54  ;;  %v6036_v11 = vld [vmem:[#allocation2 + $0x3fc] ss:$36 sps:$4 sm:$0xff]   ;;  %v6037_v54 = vld [vmem:[#allocation2 + $0x1c4] ss:$36 sps:$4 sm:$0xff]  }
0x1031   :  { %3789 = vmatpush1.bf16.msra.mxu0 %v6006_v60  ;;  %v6038_v60 = vld [vmem:[#allocation2 + $0x3f8] ss:$36 sps:$4 sm:$0xff]  }
0x1032   :  { %3830 = vmatpush1.bf16.msra.mxu1 %v6007_v36  ;;  %3790 = vmatprep.subr.bf16.mxu0 %v6008_v28  ;;  %v6039_v36 = vld [vmem:[#allocation2 + $0x1c0] ss:$36 sps:$4 sm:$0xff]  }
0x1033   :  { %3831 = vmatprep.subr.bf16.mxu1 %v6009_v31  ;;  %v6040_v28 = vld [vmem:[#allocation2 + $0x444] ss:$36 sps:$4 sm:$0xff]   ;;  %v6041_v31 = vld [vmem:[#allocation2 + $0x20c] ss:$36 sps:$4 sm:$0xff]  }
0x1035   :  { %3791 = vmatpush1.bf16.msra.mxu0 %v6010_v35  ;;  %v6042_v35 = vld [vmem:[#allocation2 + $0x440] ss:$36 sps:$4 sm:$0xff]  }
0x1036   :  { %3832 = vmatpush1.bf16.msra.mxu1 %v6011_v2  ;;  %3792 = vmatprep.subr.bf16.mxu0 %v6012_v37  ;;  %v6043_v2 = vld [vmem:[#allocation2 + $0x208] ss:$36 sps:$4 sm:$0xff]   ;;  %v6044_v37 = vld [vmem:[#allocation2 + $0x1c] ss:$36 sps:$4 sm:$0xff]  }
0x1037   :  { %3858 = vmatprep.subr.bf16.mxu1 %v6013_v40  ;;  %v6045_v40 = vld [vmem:[#allocation2 + $0x254] ss:$36 sps:$4 sm:$0xff]  }
0x1039   :  { %3793 = vmatpush1.bf16.msra.mxu0 %v6014_v48  ;;  %3850 = vmatmul.mubr.bf16.vlgmr.msra.gmra.mrb[80].mxu1 %v6849_v45  ;;  %v6046_v48 = vld [vmem:[#allocation2 + $0x18] ss:$36 sps:$4 sm:$0xff]  }
0x103a   :  { %3859 = vmatpush1.bf16.msra.mxu1 %v6015_v51  ;;  %3890 = vmatprep.mubr.bf16.mxu1 %v6845_v44  ;;  %v6047_v51 = vld [vmem:[#allocation2 + $0x250] ss:$36 sps:$4 sm:$0xff]  }
0x103b   :  { %3794 = vmatprep.subr.bf16.mxu0 %v6016_v52  ;;  %3860 = vmatprep.subr.bf16.mxu1 %v6017_v38  ;;  %v6048_v52 = vld [vmem:[#allocation2 + $0x64] ss:$36 sps:$4 sm:$0xff]   ;;  %v6049_v38 = vld [vmem:[#allocation2 + $0x29c] ss:$36 sps:$4 sm:$0xff]  }
0x103d   :  { %3795 = vmatpush1.bf16.msra.mxu0 %v6018_v4  ;;  %v6050_v4 = vld [vmem:[#allocation2 + $0x60] ss:$36 sps:$4 sm:$0xff]  }
0x103e   :  { %3861 = vmatpush1.bf16.msra.mxu1 %v6019_v5  ;;  %3796 = vmatprep.subr.bf16.mxu0 %v6020_v13  ;;  %v6051_v5 = vld [vmem:[#allocation2 + $0x298] ss:$36 sps:$4 sm:$0xff]   ;;  %v6052_v13 = vld [vmem:[#allocation2 + $0xac] ss:$36 sps:$4 sm:$0xff]  }
0x103f   :  { %3862 = vmatprep.subr.bf16.mxu1 %v6021_v29  ;;  %v6053_v29 = vld [vmem:[#allocation2 + $0x2e4] ss:$36 sps:$4 sm:$0xff]  }
0x1041   :  { %3797 = vmatpush1.bf16.msra.mxu0 %v6022_v20  ;;  %v6054_v20 = vld [vmem:[#allocation2 + $0xa8] ss:$36 sps:$4 sm:$0xff]  }
0x1042   :  { %3863 = vmatpush1.bf16.msra.mxu1 %v6023_v24  ;;  %3798 = vmatprep.subr.bf16.mxu0 %v6024_v21  ;;  %v6055_v24 = vld [vmem:[#allocation2 + $0x2e0] ss:$36 sps:$4 sm:$0xff]   ;;  %v6056_v21 = vld [vmem:[#allocation2 + $0xf4] ss:$36 sps:$4 sm:$0xff]  }
0x1043   :  { %3864 = vmatprep.subr.bf16.mxu1 %v6025_v23  ;;  %v6057_v23 = vld [vmem:[#allocation2 + $0x32c] ss:$36 sps:$4 sm:$0xff]  }
0x1045   :  { %3799 = vmatpush1.bf16.msra.mxu0 %v6026_v47  ;;  %v6058_v47 = vld [vmem:[#allocation2 + $0xf0] ss:$36 sps:$4 sm:$0xff]  }
0x1046   :  { %3865 = vmatpush1.bf16.msra.mxu1 %v6027_v25  ;;  %3800 = vmatprep.subr.bf16.mxu0 %v6028_v27  ;;  %v6059_v25 = vld [vmem:[#allocation2 + $0x328] ss:$36 sps:$4 sm:$0xff]   ;;  %v6060_v27 = vld [vmem:[#allocation2 + $0x13c] ss:$36 sps:$4 sm:$0xff]  }
0x1047   :  { %3866 = vmatprep.subr.bf16.mxu1 %v6029_v53  ;;  %v6061_v53 = vld [vmem:[#allocation2 + $0x374] ss:$36 sps:$4 sm:$0xff]  }
0x1049   :  { %3801 = vmatpush1.bf16.msra.mxu0 %v6030_v34  ;;  %v6062_v34 = vld [vmem:[#allocation2 + $0x138] ss:$36 sps:$4 sm:$0xff]  }
0x104a   :  { %3867 = vmatpush1.bf16.msra.mxu1 %v6031_v39  ;;  %3802 = vmatprep.subr.bf16.mxu0 %v6032_v22  ;;  %v6063_v39 = vld [vmem:[#allocation2 + $0x370] ss:$36 sps:$4 sm:$0xff]   ;;  %v6064_v22 = vld [vmem:[#allocation2 + $0x184] ss:$36 sps:$4 sm:$0xff]  }
0x104b   :  { %3868 = vmatprep.subr.bf16.mxu1 %v6033_v56  ;;  %v6065_v56 = vld [vmem:[#allocation2 + $0x3bc] ss:$36 sps:$4 sm:$0xff]  }
0x104d   :  { %3803 = vmatpush1.bf16.msra.mxu0 %v6034_v59  ;;  %v6066_v59 = vld [vmem:[#allocation2 + $0x180] ss:$36 sps:$4 sm:$0xff]  }
0x104e   :  { %3869 = vmatpush1.bf16.msra.mxu1 %v6035_v0  ;;  %3804 = vmatprep.subr.bf16.mxu0 %v6036_v11  ;;  %v6067_v0 = vld [vmem:[#allocation2 + $0x3b8] ss:$36 sps:$4 sm:$0xff]   ;;  %v6068_v11 = vld [vmem:[#allocation2 + $0x1cc] ss:$36 sps:$4 sm:$0xff]  }
0x104f   :  { %3870 = vmatprep.subr.bf16.mxu1 %v6037_v54  ;;  %v6069_v54 = vld [vmem:[#allocation2 + $0x404] ss:$36 sps:$4 sm:$0xff]  }
0x1051   :  { %3805 = vmatpush1.bf16.msra.mxu0 %v6038_v60  ;;  %v6070_v60 = vld [vmem:[#allocation2 + $0x1c8] ss:$36 sps:$4 sm:$0xff]  }
0x1052   :  { %3871 = vmatpush1.bf16.msra.mxu1 %v6039_v36  ;;  %3806 = vmatprep.subr.bf16.mxu0 %v6040_v28  ;;  %v6071_v36 = vld [vmem:[#allocation2 + $0x400] ss:$36 sps:$4 sm:$0xff]   ;;  %v6072_v28 = vld [vmem:[#allocation2 + $0x214] ss:$36 sps:$4 sm:$0xff]  }
0x1053   :  { %3872 = vmatprep.subr.bf16.mxu1 %v6041_v31  ;;  %v6073_v31 = vld [vmem:[#allocation2 + $0x44c] ss:$36 sps:$4 sm:$0xff]  }
0x1055   :  { %3807 = vmatpush1.bf16.msra.mxu0 %v6042_v35  ;;  %v6074_v35 = vld [vmem:[#allocation2 + $0x210] ss:$36 sps:$4 sm:$0xff]  }
0x1056   :  { %3873 = vmatpush1.bf16.msra.mxu1 %v6043_v2  ;;  %3940 = vmatprep.subr.bf16.mxu0 %v6044_v37  ;;  %v6075_v2 = vld [vmem:[#allocation2 + $0x448] ss:$36 sps:$4 sm:$0xff]   ;;  %v6076_v37 = vld [vmem:[#allocation2 + $0x25c] ss:$36 sps:$4 sm:$0xff]  }
0x1057   :  { %3874 = vmatprep.subr.bf16.mxu1 %v6045_v40  ;;  %v6077_v40 = vld [vmem:[#allocation2 + $0x494] ss:$36 sps:$4 sm:$0xff]  }
0x1058   :  { %3809 = vmatmul.mubr.bf16.vlgmr.msra.gmra.mrb[56].mxu0 %v6853_v46 }
0x1059   :  { %3941 = vmatpush1.bf16.msra.mxu0 %v6046_v48  ;;  %3972 = vmatprep.mubr.bf16.mxu0 %v6845_v44  ;;  %v6078_v48 = vld [vmem:[#allocation2 + $0x258] ss:$36 sps:$4 sm:$0xff]  }
0x105a   :  { %3875 = vmatpush1.bf16.msra.mxu1 %v6047_v51  ;;  %3942 = vmatprep.subr.bf16.mxu0 %v6048_v52  ;;  %v6079_v51 = vld [vmem:[#allocation2 + $0x490] ss:$36 sps:$4 sm:$0xff]   ;;  %v6080_v52 = vld [vmem:[#allocation2 + $0x2a4] ss:$36 sps:$4 sm:$0xff]  }
0x105b   :  { %3876 = vmatprep.subr.bf16.mxu1 %v6049_v38  ;;  %v6081_v38 = vld [vmem:[#allocation2 + $0x4dc] ss:$36 sps:$4 sm:$0xff]  }
0x105d   :  { %3943 = vmatpush1.bf16.msra.mxu0 %v6050_v4  ;;  %v6082_v4 = vld [vmem:[#allocation2 + $0x2a0] ss:$36 sps:$4 sm:$0xff]  }
0x105e   :  { %3877 = vmatpush1.bf16.msra.mxu1 %v6051_v5  ;;  %3944 = vmatprep.subr.bf16.mxu0 %v6052_v13  ;;  %v6083_v5 = vld [vmem:[#allocation2 + $0x4d8] ss:$36 sps:$4 sm:$0xff]   ;;  %v6084_v13 = vld [vmem:[#allocation2 + $0x2ec] ss:$36 sps:$4 sm:$0xff]  }
0x105f   :  { %3878 = vmatprep.subr.bf16.mxu1 %v6053_v29  ;;  %v6085_v29 = vld [vmem:[#allocation2 + $0x524] ss:$36 sps:$4 sm:$0xff]  }
0x1061   :  { %3945 = vmatpush1.bf16.msra.mxu0 %v6054_v20  ;;  %v6086_v20 = vld [vmem:[#allocation2 + $0x2e8] ss:$36 sps:$4 sm:$0xff]  }
0x1062   :  { %3879 = vmatpush1.bf16.msra.mxu1 %v6055_v24  ;;  %3946 = vmatprep.subr.bf16.mxu0 %v6056_v21  ;;  %v6087_v24 = vld [vmem:[#allocation2 + $0x520] ss:$36 sps:$4 sm:$0xff]   ;;  %v6088_v21 = vld [vmem:[#allocation2 + $0x334] ss:$36 sps:$4 sm:$0xff]  }
0x1063   :  { %3880 = vmatprep.subr.bf16.mxu1 %v6057_v23  ;;  %v6089_v23 = vld [vmem:[#allocation2 + $0x56c] ss:$36 sps:$4 sm:$0xff]  }
0x1065   :  { %3947 = vmatpush1.bf16.msra.mxu0 %v6058_v47  ;;  %v6090_v47 = vld [vmem:[#allocation2 + $0x330] ss:$36 sps:$4 sm:$0xff]  }
0x1066   :  { %3881 = vmatpush1.bf16.msra.mxu1 %v6059_v25  ;;  %3948 = vmatprep.subr.bf16.mxu0 %v6060_v27  ;;  %v6091_v25 = vld [vmem:[#allocation2 + $0x568] ss:$36 sps:$4 sm:$0xff]   ;;  %v6092_v27 = vld [vmem:[#allocation2 + $0x37c] ss:$36 sps:$4 sm:$0xff]  }
0x1067   :  { %3882 = vmatprep.subr.bf16.mxu1 %v6061_v53  ;;  %v6093_v53 = vld [vmem:[#allocation2 + $0x5b4] ss:$36 sps:$4 sm:$0xff]  }
0x1069   :  { %3949 = vmatpush1.bf16.msra.mxu0 %v6062_v34  ;;  %v6094_v34 = vld [vmem:[#allocation2 + $0x378] ss:$36 sps:$4 sm:$0xff]  }
0x106a   :  { %3883 = vmatpush1.bf16.msra.mxu1 %v6063_v39  ;;  %3950 = vmatprep.subr.bf16.mxu0 %v6064_v22  ;;  %v6095_v39 = vld [vmem:[#allocation2 + $0x5b0] ss:$36 sps:$4 sm:$0xff]   ;;  %v6096_v22 = vld [vmem:[#allocation2 + $0x3c4] ss:$36 sps:$4 sm:$0xff]  }
0x106b   :  { %3884 = vmatprep.subr.bf16.mxu1 %v6065_v56  ;;  %v6097_v56 = vld [vmem:[#allocation2 + $0x5fc] ss:$36 sps:$4 sm:$0xff]  }
0x106d   :  { %3951 = vmatpush1.bf16.msra.mxu0 %v6066_v59  ;;  %v6098_v59 = vld [vmem:[#allocation2 + $0x3c0] ss:$36 sps:$4 sm:$0xff]  }
0x106e   :  { %3885 = vmatpush1.bf16.msra.mxu1 %v6067_v0  ;;  %3952 = vmatprep.subr.bf16.mxu0 %v6068_v11  ;;  %v6099_v0 = vld [vmem:[#allocation2 + $0x5f8] ss:$36 sps:$4 sm:$0xff]   ;;  %v6100_v11 = vld [vmem:[#allocation2 + $0x40c] ss:$36 sps:$4 sm:$0xff]  }
0x106f   :  { %3886 = vmatprep.subr.bf16.mxu1 %v6069_v54  ;;  %v6101_v54 = vld [vmem:[#allocation2 + $0x644] ss:$36 sps:$4 sm:$0xff]  }
0x1071   :  { %3953 = vmatpush1.bf16.msra.mxu0 %v6070_v60  ;;  %v6102_v60 = vld [vmem:[#allocation2 + $0x408] ss:$36 sps:$4 sm:$0xff]  }
0x1072   :  { %3887 = vmatpush1.bf16.msra.mxu1 %v6071_v36  ;;  %3954 = vmatprep.subr.bf16.mxu0 %v6072_v28  ;;  %v6103_v36 = vld [vmem:[#allocation2 + $0x640] ss:$36 sps:$4 sm:$0xff]   ;;  %v6104_v28 = vld [vmem:[#allocation2 + $0x454] ss:$36 sps:$4 sm:$0xff]  }
0x1073   :  { %3888 = vmatprep.subr.bf16.mxu1 %v6073_v31  ;;  %v6105_v31 = vld [vmem:[#allocation2 + $0x68c] ss:$36 sps:$4 sm:$0xff]  }
0x1075   :  { %3955 = vmatpush1.bf16.msra.mxu0 %v6074_v35  ;;  %v6106_v35 = vld [vmem:[#allocation2 + $0x450] ss:$36 sps:$4 sm:$0xff]  }
0x1076   :  { %3889 = vmatpush1.bf16.msra.mxu1 %v6075_v2  ;;  %3956 = vmatprep.subr.bf16.mxu0 %v6076_v37  ;;  %v6107_v2 = vld [vmem:[#allocation2 + $0x688] ss:$36 sps:$4 sm:$0xff]   ;;  %v6108_v37 = vld [vmem:[#allocation2 + $0x49c] ss:$36 sps:$4 sm:$0xff]  }
0x1077   :  { %3899 = vmatprep.subr.bf16.mxu1 %v6077_v40  ;;  %v6109_v40 = vld [vmem:[#allocation2 + $0x260] ss:$36 sps:$4 sm:$0xff]  }
0x1079   :  { %3891 = vmatmul.mubr.bf16.vlgmr.msra.gmra.mrb[84].mxu1 %v6853_v46  ;;  %3957 = vmatpush1.bf16.msra.mxu0 %v6078_v48  ;;  %v6110_v48 = vld [vmem:[#allocation2 + $0x498] ss:$36 sps:$4 sm:$0xff]  }
0x107a   :  { %3900 = vmatpush1.bf16.msra.mxu1 %v6079_v51  ;;  %3958 = vmatprep.subr.bf16.mxu0 %v6080_v52  ;;  %v6111_v51 = vld [vmem:[#allocation2 + $0x20] ss:$36 sps:$4 sm:$0xff]  }
0x107b   :  { %3901 = vmatprep.subr.bf16.mxu1 %v6081_v38  ;;  %3931 = vmatprep.mubr.bf16.mxu1 %v6980_v18  ;;  %v6112_v52 = vld [vmem:[#allocation2 + $0x4e4] ss:$36 sps:$4 sm:$0xff]  }
0x107c   :  { %v6113_v38 = vld [vmem:[#allocation2 + $0x2a8] ss:$36 sps:$4 sm:$0xff]  }
0x107d   :  { %3959 = vmatpush1.bf16.msra.mxu0 %v6082_v4  ;;  %v6114_v4 = vld [vmem:[#allocation2 + $0x4e0] ss:$36 sps:$4 sm:$0xff]  }
0x107e   :  { %3902 = vmatpush1.bf16.msra.mxu1 %v6083_v5  ;;  %3960 = vmatprep.subr.bf16.mxu0 %v6084_v13  ;;  %v6115_v5 = vld [vmem:[#allocation2 + $0x68] ss:$36 sps:$4 sm:$0xff]  }
0x107f   :  { %3903 = vmatprep.subr.bf16.mxu1 %v6085_v29  ;;  %v6116_v13 = vld [vmem:[#allocation2 + $0x52c] ss:$36 sps:$4 sm:$0xff]  }
0x1080   :  { %v6117_v29 = vld [vmem:[#allocation2 + $0x2f0] ss:$36 sps:$4 sm:$0xff]  }
0x1081   :  { %3961 = vmatpush1.bf16.msra.mxu0 %v6086_v20  ;;  %v6118_v20 = vld [vmem:[#allocation2 + $0x528] ss:$36 sps:$4 sm:$0xff]  }
0x1082   :  { %3904 = vmatpush1.bf16.msra.mxu1 %v6087_v24  ;;  %3962 = vmatprep.subr.bf16.mxu0 %v6088_v21  ;;  %v6119_v24 = vld [vmem:[#allocation2 + $0xb0] ss:$36 sps:$4 sm:$0xff]  }
0x1083   :  { %3905 = vmatprep.subr.bf16.mxu1 %v6089_v23  ;;  %v6120_v21 = vld [vmem:[#allocation2 + $0x574] ss:$36 sps:$4 sm:$0xff]  }
0x1084   :  { %v6122_v23 = vld [vmem:[#allocation2 + $0x570] ss:$36 sps:$4 sm:$0xff]  }
0x1085   :  { %3963 = vmatpush1.bf16.msra.mxu0 %v6090_v47  ;;  %v6123_v47 = vld [vmem:[#allocation2 + $0xf8] ss:$36 sps:$4 sm:$0xff]  }
0x1086   :  { %3906 = vmatpush1.bf16.msra.mxu1 %v6091_v25  ;;  %3964 = vmatprep.subr.bf16.mxu0 %v6092_v27  ;;  %v6124_v25 = vld [vmem:[#allocation2 + $0x5bc] ss:$36 sps:$4 sm:$0xff]  }
0x1087   :  { %3907 = vmatprep.subr.bf16.mxu1 %v6093_v53  ;;  %v6125_v27 = vld [vmem:[#allocation2 + $0x380] ss:$36 sps:$4 sm:$0xff]   ;;  %v6126_v53 = vld [vmem:[#allocation2 + $0x5b8] ss:$36 sps:$4 sm:$0xff]  }
0x1089   :  { %3965 = vmatpush1.bf16.msra.mxu0 %v6094_v34  ;;  %v6127_v34 = vld [vmem:[#allocation2 + $0x140] ss:$36 sps:$4 sm:$0xff]  }
0x108a   :  { %3908 = vmatpush1.bf16.msra.mxu1 %v6095_v39  ;;  %3966 = vmatprep.subr.bf16.mxu0 %v6096_v22  ;;  %v6128_v39 = vld [vmem:[#allocation2 + $0x604] ss:$36 sps:$4 sm:$0xff]  }
0x108b   :  { %3909 = vmatprep.subr.bf16.mxu1 %v6097_v56  ;;  %v6129_v22 = vld [vmem:[#allocation2 + $0x3c8] ss:$36 sps:$4 sm:$0xff]   ;;  %v6130_v56 = vld [vmem:[#allocation2 + $0x600] ss:$36 sps:$4 sm:$0xff]  }
0x108d   :  { %3967 = vmatpush1.bf16.msra.mxu0 %v6098_v59  ;;  %v6131_v59 = vld [vmem:[#allocation2 + $0x188] ss:$36 sps:$4 sm:$0xff]  }
0x108e   :  { %3910 = vmatpush1.bf16.msra.mxu1 %v6099_v0  ;;  %3968 = vmatprep.subr.bf16.mxu0 %v6100_v11  ;;  %v6132_v0 = vld [vmem:[#allocation2 + $0x64c] ss:$36 sps:$4 sm:$0xff]  }
0x108f   :  { %3911 = vmatprep.subr.bf16.mxu1 %v6101_v54  ;;  %v6133_v11 = vld [vmem:[#allocation2 + $0x410] ss:$36 sps:$4 sm:$0xff]   ;;  %v6134_v54 = vld [vmem:[#allocation2 + $0x648] ss:$36 sps:$4 sm:$0xff]  }
0x1091   :  { %3969 = vmatpush1.bf16.msra.mxu0 %v6102_v60  ;;  %v6135_v60 = vld [vmem:[#allocation2 + $0x1d0] ss:$36 sps:$4 sm:$0xff]  }
0x1092   :  { %3912 = vmatpush1.bf16.msra.mxu1 %v6103_v36  ;;  %3970 = vmatprep.subr.bf16.mxu0 %v6104_v28  ;;  %v6136_v36 = vld [vmem:[#allocation2 + $0x694] ss:$36 sps:$4 sm:$0xff]  }
0x1093   :  { %3913 = vmatprep.subr.bf16.mxu1 %v6105_v31  ;;  %v6137_v28 = vld [vmem:[#allocation2 + $0x458] ss:$36 sps:$4 sm:$0xff]   ;;  %v6138_v31 = vld [vmem:[#allocation2 + $0x690] ss:$36 sps:$4 sm:$0xff]  }
0x1095   :  { %3971 = vmatpush1.bf16.msra.mxu0 %v6106_v35  ;;  %v6139_v35 = vld [vmem:[#allocation2 + $0x218] ss:$36 sps:$4 sm:$0xff]  }
0x1096   :  { %3914 = vmatpush1.bf16.msra.mxu1 %v6107_v2  ;;  %3981 = vmatprep.subr.bf16.mxu0 %v6108_v37  ;;  %v6140_v2 = vld [vmem:[#allocation2 + $0x4a0] ss:$36 sps:$4 sm:$0xff]   ;;  %v6141_v37 = vld [vmem:[#allocation2 + $0x4e8] ss:$36 sps:$4 sm:$0xff]  }
0x1097   :  { %4978 = vmatprep.subr.bf16.mxu1 %v6109_v40  ;;  %v6142_v40 = vld [vmem:[#allocation2 + $0x530] ss:$36 sps:$4 sm:$0xff]  }
0x1098   :  { %3973 = vmatmul.mubr.bf16.vlgmr.msra.gmra.mrb[60].mxu0 %v6853_v46 }
0x1099   :  { %3932 = vmatmul.mubr.bf16.vlgmr.msra.gmra.mrb[84].mxu1 %v6849_v45  ;;  %3982 = vmatpush1.bf16.msra.mxu0 %v6110_v48  ;;  %v6143_v48 = vld [vmem:[#allocation2 + $0x578] ss:$36 sps:$4 sm:$0xff]  }
0x109a   :  { %4979 = vmatpush3.bf16.msra.mxu1 %v6111_v51  ;;  %4054 = vmatprep.mubr.bf16.mxu1 %v6845_v44  ;;  %v6121_v44 = vld [vmem:[#allocation2 + $0x338] ss:$36 sps:$4 sm:$0xff]   ;;  %v6145_v51 = vld [vmem:[#allocation2 + $0x608] ss:$36 sps:$4 sm:$0xff]  }
0x109b   :  { %3983 = vmatprep.subr.bf16.mxu0 %v6112_v52  ;;  %4980 = vmatprep.subr.bf16.mxu1 %v6113_v38  ;;  %v6146_v52 = vld [vmem:[#allocation2 + $0x650] ss:$36 sps:$4 sm:$0xff]   ;;  %v6147_v38 = vld [vmem:[#allocation2 + $0x698] ss:$36 sps:$4 sm:$0xff]  }
0x109c   :  { %4013 = vmatprep.mubr.bf16.mxu0 %v6980_v18 }
0x109d   :  { %3984 = vmatpush1.bf16.msra.mxu0 %v6114_v4  ;;  %v6148_v4 = vld [vmem:[#allocation5 + $0x4] ss:$12 sps:$4 sm:$0xff]  }
0x109e   :  { %4981 = vmatpush3.bf16.msra.mxu1 %v6115_v5  ;;  %3985 = vmatprep.subr.bf16.mxu0 %v6116_v13  ;;  %v6149_v5 = vld [vmem:[#allocation5] ss:$12 sps:$4 sm:$0xff]   ;;  %v6150_v13 = vld [vmem:[#allocation5 + $0x1c] ss:$12 sps:$4 sm:$0xff]  }
0x109f   :  { %4982 = vmatprep.subr.bf16.mxu1 %v6117_v29  ;;  %v6151_v29 = vld [vmem:[#allocation5 + $0x18] ss:$12 sps:$4 sm:$0xff]  }
0x10a1   :  { %3986 = vmatpush1.bf16.msra.mxu0 %v6118_v20  ;;  %v6152_v20 = vld [vmem:[#allocation5 + $0x34] ss:$12 sps:$4 sm:$0xff]  }
0x10a2   :  { %4983 = vmatpush3.bf16.msra.mxu1 %v6119_v24  ;;  %3987 = vmatprep.subr.bf16.mxu0 %v6120_v21  ;;  %v6153_v24 = vld [vmem:[#allocation5 + $0x30] ss:$12 sps:$4 sm:$0xff]   ;;  %v6154_v21 = vld [vmem:[#allocation5 + $0x4c] ss:$12 sps:$4 sm:$0xff]  }
0x10a3   :  { %4984 = vmatprep.subr.bf16.mxu1 %v6121_v44  ;;  %v6155_v44 = vld [vmem:[#allocation5 + $0x48] ss:$12 sps:$4 sm:$0xff]  }
0x10a5   :  { %3988 = vmatpush1.bf16.msra.mxu0 %v6122_v23  ;;  %v6156_v23 = vld [vmem:[#allocation5 + $0x64] ss:$12 sps:$4 sm:$0xff]  }
0x10a6   :  { %4985 = vmatpush3.bf16.msra.mxu1 %v6123_v47  ;;  %3989 = vmatprep.subr.bf16.mxu0 %v6124_v25  ;;  %v6157_v47 = vld [vmem:[#allocation5 + $0x60] ss:$12 sps:$4 sm:$0xff]   ;;  %v6158_v25 = vld [vmem:[#allocation5 + $0x7c] ss:$12 sps:$4 sm:$0xff]  }
0x10a7   :  { %4986 = vmatprep.subr.bf16.mxu1 %v6125_v27 }
0x10a9   :  { %3990 = vmatpush1.bf16.msra.mxu0 %v6126_v53 }
0x10aa   :  { %4987 = vmatpush3.bf16.msra.mxu1 %v6127_v34  ;;  %3991 = vmatprep.subr.bf16.mxu0 %v6128_v39 }
0x10ab   :  { %4988 = vmatprep.subr.bf16.mxu1 %v6129_v22 }
0x10ad   :  { %3992 = vmatpush1.bf16.msra.mxu0 %v6130_v56  ;;  %v6159_v56 = vld [vmem:[#allocation5 + $0x78] ss:$12 sps:$4 sm:$0xff]  }
0x10ae   :  { %4989 = vmatpush3.bf16.msra.mxu1 %v6131_v59  ;;  %3993 = vmatprep.subr.bf16.mxu0 %v6132_v0 }
0x10af   :  { %4990 = vmatprep.subr.bf16.mxu1 %v6133_v11 }
0x10b1   :  { %3994 = vmatpush1.bf16.msra.mxu0 %v6134_v54  ;;  %v6160_v54 = vld [vmem:[#allocation5 + $0x94] ss:$12 sps:$4 sm:$0xff]  }
0x10b2   :  { %4991 = vmatpush3.bf16.msra.mxu1 %v6135_v60  ;;  %3995 = vmatprep.subr.bf16.mxu0 %v6136_v36 }
0x10b3   :  { %4992 = vmatprep.subr.bf16.mxu1 %v6137_v28  ;;  %v6161_v28 = vld [vmem:[#allocation5 + $0x90] ss:$12 sps:$4 sm:$0xff]  }
0x10b5   :  { %3996 = vmatpush1.bf16.msra.mxu0 %v6138_v31 }
0x10b6   :  { %4993 = vmatpush3.bf16.msra.mxu1 %v6139_v35  ;;  %5148 = vmatprep.subr.bf16.mxu0 %v6981_v55  ;;  %v6162_v35 = vld [vmem:[#allocation5 + $0xac] ss:$12 sps:$4 sm:$0xff]  }
0x10b8   :  { %4014 = vmatmul.mubr.bf16.vlgmr.msra.gmra.mrb[64].mxu0 %v6849_v45 }
0x10b9   :  { %4055 = vmatmul.mubr.bf16.vlgmr.msra.gmra.mrb[88].mxu1 %v6853_v46  ;;  %5149 = vmatpush3.bf16.msra.mxu0 %v6140_v2  ;;  %v6144_v46 = vld [vmem:[#allocation2 + $0x5c0] ss:$36 sps:$4 sm:$0xff]   ;;  %v6163_v2 = vld [vmem:[#allocation5 + $0xa8] ss:$12 sps:$4 sm:$0xff]  }
0x10ba   :  { %5150 = vmatprep.subr.bf16.mxu0 %v6981_v55  ;;  %5164 = vmatprep.mubr.msk.bf16.mxu0 %vm6300_vm0, %v6981_v55 }
0x10bd   :  { %5151 = vmatpush3.bf16.msra.mxu0 %v6141_v37  ;;  %v6164_v37 = vld [vmem:[#allocation5 + $0xc4] ss:$12 sps:$4 sm:$0xff]  }
0x10be   :  { %5152 = vmatprep.subr.bf16.mxu0 %v6981_v55 }
0x10c1   :  { %5153 = vmatpush3.bf16.msra.mxu0 %v6142_v40  ;;  %v6165_v40 = vld [vmem:[#allocation5 + $0xc0] ss:$12 sps:$4 sm:$0xff]  }
0x10c2   :  { %5154 = vmatprep.subr.bf16.mxu0 %v6981_v55 }
0x10c5   :  { %5155 = vmatpush3.bf16.msra.mxu0 %v6143_v48  ;;  %v6166_v48 = vld [vmem:[#allocation5 + $0xdc] ss:$12 sps:$4 sm:$0xff]  }
0x10c6   :  { %5156 = vmatprep.subr.bf16.mxu0 %v6981_v55 }
0x10c9   :  { %5157 = vmatpush3.bf16.msra.mxu0 %v6144_v46  ;;  %v6167_v46 = vld [vmem:[#allocation5 + $0xd8] ss:$12 sps:$4 sm:$0xff]  }
0x10ca   :  { %5158 = vmatprep.subr.bf16.mxu0 %v6981_v55 }
0x10cd   :  { %5159 = vmatpush3.bf16.msra.mxu0 %v6145_v51  ;;  %v6168_v51 = vld [vmem:[#allocation5 + $0xf4] ss:$12 sps:$4 sm:$0xff]  }
0x10ce   :  { %5160 = vmatprep.subr.bf16.mxu0 %v6981_v55 }
0x10d1   :  { %5161 = vmatpush3.bf16.msra.mxu0 %v6146_v52  ;;  %v6169_v52 = vld [vmem:[#allocation5 + $0xf0] ss:$12 sps:$4 sm:$0xff]  }
0x10d2   :  { %5162 = vmatprep.subr.bf16.mxu0 %v6981_v55 }
0x10d5   :  { %5163 = vmatpush3.bf16.msra.mxu0 %v6147_v38  ;;  %v6171_v38 = vld [vmem:[#allocation5 + $0x108] ss:$12 sps:$4 sm:$0xff]  }
0x10d6   :  { %4335 = vmatprep.subr.bf16.mxu0 %v6148_v4  ;;  %v6172_v4 = vld [vmem:[#allocation5 + $0x124] ss:$12 sps:$4 sm:$0xff]  }
0x10d8   :  { %5165 = vmatmul.mubr.bf16.vlgmr.msra.gmra.mrb[68].mxu0 %v6849_v45 }
0x10d9   :  { %4336 = vmatpush1.bf16.msra.mxu0 %v6149_v5  ;;  %v6173_v5 = vld [vmem:[#allocation5 + $0x120] ss:$12 sps:$4 sm:$0xff]  }
0x10da   :  { %4337 = vmatprep.subr.bf16.mxu0 %v6150_v13  ;;  %v6174_v13 = vld [vmem:[#allocation5 + $0x13c] ss:$12 sps:$4 sm:$0xff]  }
0x10dd   :  { %4338 = vmatpush1.bf16.msra.mxu0 %v6151_v29 }
0x10de   :  { %4339 = vmatprep.subr.bf16.mxu0 %v6152_v20 }
0x10e1   :  { %4340 = vmatpush1.bf16.msra.mxu0 %v6153_v24  ;;  %v6175_v24 = vld [vmem:[#allocation5 + $0x138] ss:$12 sps:$4 sm:$0xff]  }
0x10e2   :  { %4341 = vmatprep.subr.bf16.mxu0 %v6154_v21 }
0x10e5   :  { %4342 = vmatpush1.bf16.msra.mxu0 %v6155_v44  ;;  %v6176_v44 = vld [vmem:[#allocation5 + $0x154] ss:$12 sps:$4 sm:$0xff]  }
0x10e6   :  { %4343 = vmatprep.subr.bf16.mxu0 %v6156_v23 }
0x10e9   :  { %4344 = vmatpush1.bf16.msra.mxu0 %v6157_v47  ;;  %v6177_v47 = vld [vmem:[#allocation5 + $0x150] ss:$12 sps:$4 sm:$0xff]  }
0x10ea   :  { %4345 = vmatprep.subr.bf16.mxu0 %v6158_v25  ;;  %v6178_v25 = vld [vmem:[#allocation5 + $0x16c] ss:$12 sps:$4 sm:$0xff]  }
0x10eb   :  { %v3769_v45 = vpop.f32.mrb[52].mxu0 }
0x10ec   :  { %v3728_v27 = vpop.f32.mrb[76].mxu1  ;;  %v3771_v53 = vpop.f32.mrb[53].mxu0 }
0x10ed   :  { %v6883_v34 = vadd.f32 %v3769_v45, %v3728_v27  ;;  %v3730_v39 = vpop.f32.mrb[77].mxu1  ;;  %v3773_v22 = vpop.f32.mrb[54].mxu0  ;;  %4346 = vmatpush1.bf16.msra.mxu0 %v6159_v56  ;;  %v6179_v45 = vld [vmem:[#allocation5 + $0x168] ss:$12 sps:$4 sm:$0xff]  }
0x10ee   :  { %v3772_v59 = vadd.f32 %v3771_v53, %v3730_v39  ;;  %v3732_v0 = vpop.f32.mrb[78].mxu1  ;;  %v3774_v11 = vpop.f32.mrb[55].mxu0  ;;  %4347 = vmatprep.subr.bf16.mxu0 %v6160_v54 }
0x10ef   :  { %v3733_v60 = vpop.f32.mrb[79].mxu1 }
0x10f0   :  { %v4103_v36 = vadd.f32 %v3772_v59, %v6431_v50  ;;  %v6170_v50 = vld [vmem:[#allocation5 + $0x10c] ss:$12 sps:$4 sm:$0xff]  }
0x10f1   :  { %4348 = vmatpush1.bf16.msra.mxu0 %v6161_v28 }
0x10f2   :  { %v4109_v31 = vpack.c.bf16 %v4103_v36, %v4103_v36  ;;  %4349 = vmatprep.subr.bf16.mxu0 %v6162_v35 }
0x10f4   :  { %4146 = vmatprep.mubr.bf16.mxu1 %v4109_v31 }
0x10f5   :  { %4350 = vmatpush1.bf16.msra.mxu0 %v6163_v2 }
0x10f6   :  { %4351 = vmatprep.subr.bf16.mxu0 %v6164_v37 }
0x10f9   :  { %4352 = vmatpush1.bf16.msra.mxu0 %v6165_v40  ;;  %v4102_v40 = vadd.f32 %v6883_v34, %v6442_v12 }
0x10fa   :  { %4353 = vmatprep.subr.bf16.mxu0 %v6166_v48 }
0x10fb   :  { %v4108_v48 = vpack.c.bf16 %v4102_v40, %v4102_v40 }
0x10fd   :  { %4354 = vmatpush1.bf16.msra.mxu0 %v6167_v46 }
0x10fe   :  { %4355 = vmatprep.subr.bf16.mxu0 %v6168_v51 }
0x1101   :  { %4356 = vmatpush1.bf16.msra.mxu0 %v6169_v52 }
0x1102   :  { %4357 = vmatprep.subr.bf16.mxu0 %v6170_v50 }
0x1105   :  { %4358 = vmatpush1.bf16.msra.mxu0 %v6171_v38 }
0x1106   :  { %4359 = vmatprep.subr.bf16.mxu0 %v6172_v4 }
0x1109   :  { %4360 = vmatpush1.bf16.msra.mxu0 %v6173_v5 }
0x110a   :  { %4361 = vmatprep.subr.bf16.mxu0 %v6174_v13 }
0x110c   :  { %v3851_v29 = vpop.f32.mrb[80].mxu1 }
0x110d   :  { %v3853_v20 = vpop.f32.mrb[81].mxu1  ;;  %4362 = vmatpush1.bf16.msra.mxu0 %v6175_v24 }
0x110e   :  { %v3855_v21 = vpop.f32.mrb[82].mxu1  ;;  %4363 = vmatprep.subr.bf16.mxu0 %v6176_v44 }
0x110f   :  { %v3856_v23 = vpop.f32.mrb[83].mxu1 }
0x1111   :  { %4364 = vmatpush1.bf16.msra.mxu0 %v6177_v47 }
0x1112   :  { %4365 = vmatprep.subr.bf16.mxu0 %v6178_v25 }
0x1115   :  { %4366 = vmatpush1.bf16.msra.mxu0 %v6179_v45 }
0x1116   :  { %5180 = vmatprep.subr.bf16.mxu0 %v6981_v55 }
0x112b   :  { %v3810_v27 = vpop.f32.mrb[56].mxu0 }
0x112c   :  { %v3852_v53 = vadd.f32 %v3851_v29, %v3810_v27  ;;  %v3812_v39 = vpop.f32.mrb[57].mxu0 }
0x112d   :  { %v3854_v22 = vadd.f32 %v3853_v20, %v3812_v39  ;;  %v3814_v56 = vpop.f32.mrb[58].mxu0 }
0x112e   :  { %v3815_v59 = vpop.f32.mrb[59].mxu0  ;;  %v4104_v51 = vadd.f32 %v3852_v53, %v6460_v32 }
0x112f   :  { %v4111_v31 = vpack.c.bf16 %v3854_v22, %v3854_v22 }
0x1130   :  { %v4110_v52 = vpack.c.bf16 %v4104_v51, %v4104_v51  ;;  %v6180_v51 = vld [vmem:[#allocation5 + $0x184] ss:$12 sps:$4 sm:$0xff]  }
0x116b   :  { %v3974_v0 = vpop.f32.mrb[60].mxu0 }
0x116c   :  { %v3933_v11 = vpop.f32.mrb[84].mxu1  ;;  %v3976_v54 = vpop.f32.mrb[61].mxu0 }
0x116d   :  { %v4112_v60 = vpack.c.bf16 %v3933_v11, %v3933_v11  ;;  %v3935_v36 = vpop.f32.mrb[85].mxu1  ;;  %v3978_v28 = vpop.f32.mrb[62].mxu0 }
0x116e   :  { %v3937_v35 = vpop.f32.mrb[86].mxu1  ;;  %v3979_v2 = vpop.f32.mrb[63].mxu0  ;;  %v4113_v46 = vpack.c.bf16 %v3935_v36, %v3935_v36 }
0x116f   :  { %v3938_v37 = vpop.f32.mrb[87].mxu1  ;;  %4114 = vmatprep.subr.bf16.mxu1 %v4112_v60 }
0x1170   :  { %4115 = vmatpush1.bf16.xpose.msra.mxu1 %v4111_v31 }
0x1171   :  { %5168 = vmatprep.subr.bf16.mxu1 %v6981_v55 }
0x1177   :  { %4147 = vmatmul.mubr.bf16.vlgmr.msra.gmra.mrb[92].mxu1 %v4108_v48 }
0x1178   :  { %5169 = vmatpush3.bf16.xpose.msra.mxu1 %v4113_v46  ;;  %5170 = vmatprep.mubr.msk.bf16.mxu1 %vm6300_vm0, %v6981_v55 }
0x1183   :  { %5171 = vmatmul.mubr.bf16.vlgmr.msra.gmra.mrb[92].mxu1 %v4110_v52  ;;  %v6181_v52 = vld [vmem:[#allocation5 + $0x180] ss:$12 sps:$4 sm:$0xff]  }
0x1184   :  { %4253 = vmatprep.mubr.bf16.mxu1 %v6980_v18 }
0x118b   :  { %v4015_v50 = vpop.f32.mrb[64].mxu0 }
0x118c   :  { %v4016_v38 = vadd.f32 %v4015_v50, %v3974_v0  ;;  %v4017_v4 = vpop.f32.mrb[65].mxu0  ;;  %v4994_v5 = vpop.f32.mrb[88].mxu1  ;;  %v6183_v50 = vld [vmem:[#allocation5 + $0x198] ss:$12 sps:$4 sm:$0xff]  }
0x118d   :  { %v4018_v12 = vadd.f32 %v4017_v4, %v3976_v54  ;;  %v4019_v34 = vpop.f32.mrb[66].mxu0  ;;  %v4995_v13 = vpop.f32.mrb[89].mxu1  ;;  %v6185_v4 = vld [vmem:[#allocation5 + $0x1b0] ss:$12 sps:$4 sm:$0xff]  }
0x118e   :  { %v4105_v29 = vadd.f32 %v4016_v38, %v6455_v30  ;;  %v4996_v20 = vadd.f32 %v4995_v13, %v4994_v5  ;;  %v4020_v24 = vpop.f32.mrb[67].mxu0  ;;  %v4997_v21 = vpop.f32.mrb[90].mxu1  ;;  %v6184_v38 = vld [vmem:[#allocation5 + $0x1b4] ss:$12 sps:$4 sm:$0xff]   ;;  %v6186_v5 = vld [vmem:[#allocation5 + $0x1cc] ss:$12 sps:$4 sm:$0xff]  }
0x118f   :  { %v4106_v44 = vadd.f32 %v4018_v12, %v6446_v16  ;;  %v4998_v23 = vpop.f32.mrb[91].mxu1  ;;  %v6187_v12 = vld [vmem:[#allocation5 + $0x1c8] ss:$12 sps:$4 sm:$0xff]   ;;  %v6188_v34 = vld [vmem:[#allocation5 + $0x1e4] ss:$12 sps:$4 sm:$0xff]  }
0x1190   :  { %v4206_v32 = vpack.c.bf16 %v4105_v29, %v4105_v29  ;;  %v6189_v13 = vld [vmem:[#allocation5 + $0x1e0] ss:$12 sps:$4 sm:$0xff]   ;;  %v6190_v29 = vld [vmem:[#allocation5 + $0x1fc] ss:$12 sps:$4 sm:$0xff]  }
0x1191   :  { %v4207_v47 = vpack.c.bf16 %v4106_v44, %v4106_v44  ;;  %v6193_v24 = vld [vmem:[#allocation5 + $0x210] ss:$12 sps:$4 sm:$0xff]   ;;  %v6194_v21 = vld [vmem:[#allocation5 + $0x22c] ss:$12 sps:$4 sm:$0xff]   ;;  %v6195_v44 = vld [vmem:[#allocation5 + $0x228] ss:$12 sps:$4 sm:$0xff]  }
0x1192   :  { %v4213_v25 = vsel %vm2069_vm1, %v4206_v32, 0  ;;  %v6196_v23 = vld [vmem:[#allocation5 + $0xc8] ss:$12 sps:$4 sm:$0xff]  }
0x1193   :  { %4843 = vmatprep.subr.msk.bf16.mxu1 %vm2069_vm1, %v4207_v47 }
0x1194   :  { %4222 = vmatpush1.bf16.msra.mxu1 %v4213_v25 }
0x1195   :  { %5174 = vmatprep.subr.bf16.mxu1 %v6981_v55 }
0x11ab   :  { %v4096_v45 = vpop.f32.mrb[68].mxu0 }
0x11ac   :  { %v4097_v27 = vadd.f32 %v4996_v20, %v4096_v45  ;;  %v5166_v53 = vpop.f32.mrb[69].mxu0  ;;  %v6191_v20 = vld [vmem:[#allocation5 + $0x1f8] ss:$12 sps:$4 sm:$0xff]  }
0x11ad   :  { %v4099_v39 = vpop.f32.mrb[70].mxu0 }
0x11ae   :  { %v5167_v30 = vpop.f32.mrb[71].mxu0  ;;  %v4107_v35 = vadd.f32 %v4097_v27, %v6472_v61  ;;  %v6182_v61 = vld [vmem:[#allocation5 + $0x19c] ss:$12 sps:$4 sm:$0xff]  }
0x11b0   :  { %v4208_v37 = vpack.c.bf16 %v4107_v35, %v4107_v35 }
0x11b2   :  { %v4219_v46 = vsel %vm2069_vm1, %v4208_v37, 0 }
0x1256   :  { %v4188_v22 = vpop.f32.mrb[92].mxu1 }
0x1257   :  { %v5172_v56 = vpop.f32.mrb[93].mxu1  ;;  %v4194_v59 = vsel %vm2050_vm2, %v4188_v22, -inf }
0x1258   :  { %4195 = vmax.xlane.f32.xlu0 %v4194_v59  ;;  %v4191_v16 = vpop.f32.mrb[94].mxu1 }
0x1259   :  { %v5173_v0 = vpop.f32.mrb[95].mxu1 }
0x12e5   :  { %v4196_v11 = vpop.xlane.xlu0 %4195 }
0x12e6   :  { %v4197_v54 = vsub.f32 %v4188_v22, %v4196_v11 }
0x12e8   :  { %v4198_v60 = vmul.f32 1.442695, %v4197_v54 }
0x12ea   :  { %5658 = vpow2.f32 %v4198_v60 }
0x12f4   :  { %v5659_v36 = vpop.eup %5658 }
0x12f5   :  { %v4200_v28 = vsel %vm2050_vm2, %v5659_v36, 0.0 }
0x12f6   :  { %4201 = vadd.xlane.f32.xlu1 %v4200_v28 }
0x1383   :  { %v4202_v31 = vpop.xlane.xlu1 %4201 }
0x1384   :  { %5660 = vrcp.f32 %v4202_v31 }
0x138e   :  { %v5661_v2 = vpop.eup %5660 }
0x138f   :  { %v4204_v40 = vmul.f32 %v5661_v2, %v5659_v36 }
0x1391   :  { %v4205_v48 = vpack.c.bf16 %v4204_v40, %v4204_v40 }
0x1393   :  { %4844 = vmatmul.mubr.msk.bf16.vlgmr.msra.gmra.mrb[96].mxu1 %vm2050_vm2, %v4205_v48 }
0x1394   :  { %5175 = vmatpush3.bf16.msra.mxu1 %v4219_v46  ;;  %5176 = vmatprep.mubr.msk.bf16.mxu1 %vm6300_vm0, %v6981_v55 }
0x1395   :  { %4376 = vmatprep.subr.bf16.mxu1 %v6180_v51 }
0x139b   :  { %5177 = vmatmul.mubr.msk.bf16.vlgmr.msra.gmra.mrb[100].mxu1 %vm2050_vm2, %v4205_v48 }
0x139c   :  { %4377 = vmatpush1.bf16.msra.mxu1 %v6181_v52  ;;  %4408 = vmatprep.mubr.bf16.mxu1 %v6980_v18  ;;  %v6192_v18 = vld [vmem:[#allocation5 + $0x214] ss:$12 sps:$4 sm:$0xff]  }
0x139d   :  { %4378 = vmatprep.subr.bf16.mxu1 %v6182_v61 }
0x13a0   :  { %4379 = vmatpush1.bf16.msra.mxu1 %v6183_v50 }
0x13a1   :  { %4380 = vmatprep.subr.bf16.mxu1 %v6184_v38 }
0x13a4   :  { %4381 = vmatpush1.bf16.msra.mxu1 %v6185_v4 }
0x13a5   :  { %4382 = vmatprep.subr.bf16.mxu1 %v6186_v5 }
0x13a8   :  { %4383 = vmatpush1.bf16.msra.mxu1 %v6187_v12 }
0x13a9   :  { %4384 = vmatprep.subr.bf16.mxu1 %v6188_v34 }
0x13ac   :  { %4385 = vmatpush1.bf16.msra.mxu1 %v6189_v13 }
0x13ad   :  { %4386 = vmatprep.subr.bf16.mxu1 %v6190_v29 }
0x13b0   :  { %4387 = vmatpush1.bf16.msra.mxu1 %v6191_v20 }
0x13b1   :  { %4388 = vmatprep.subr.bf16.mxu1 %v6192_v18 }
0x13b4   :  { %4389 = vmatpush1.bf16.msra.mxu1 %v6193_v24 }
0x13b5   :  { %4390 = vmatprep.subr.bf16.mxu1 %v6194_v21  ;;  %v6197_v21 = vld [vmem:[#allocation5 + $0x8] ss:$12 sps:$4 sm:$0xff]  }
0x13b8   :  { %4391 = vmatpush1.bf16.msra.mxu1 %v6195_v44  ;;  %v6204_v44 = vld [vmem:[#allocation5 + $0x1b8] ss:$12 sps:$4 sm:$0xff]  }
0x13b9   :  { %5013 = vmatprep.subr.bf16.mxu1 %v6196_v23  ;;  %v6205_v23 = vld [vmem:[#allocation5 + $0x110] ss:$12 sps:$4 sm:$0xff]  }
0x1466   :  { %v4255_v32 = vpop.f32.mrb[96].mxu1 }
0x1467   :  { %v4257_v47 = vpop.f32.mrb[97].mxu1  ;;  %v4256_v27 = vadd.f32 %v4255_v32, %v6841_v43  ;;  %v6206_v32 = vld [vmem:[#allocation5 + $0x50] ss:$12 sps:$4 sm:$0xff]  }
0x1468   :  { %v4259_v25 = vpop.f32.mrb[98].mxu1  ;;  %v4258_v53 = vadd.f32 %v4257_v47, %v6835_v41  ;;  %v6207_v47 = vld [vmem:[#allocation5 + $0x1d0] ss:$12 sps:$4 sm:$0xff]  }
0x1469   :  { %v4260_v45 = vpop.f32.mrb[99].mxu1  ;;  %v6208_v25 = vld [vmem:[#allocation5 + $0x128] ss:$12 sps:$4 sm:$0xff]  }
0x146a   :  { %v4302_v30 = vadd.f32 %v4258_v53, %v4256_v27  ;;  %v6209_v45 = vld [vmem:[#allocation5 + $0x68] ss:$12 sps:$4 sm:$0xff]  }
0x146e   :  { %v4296_v39 = vpop.f32.mrb[100].mxu1 }
0x146f   :  { %v4297_v22 = vadd.f32 %v4296_v39, %v6838_v42  ;;  %v5178_v56 = vpop.f32.mrb[101].mxu1  ;;  %v6212_v39 = vld [vmem:[#allocation5 + $0x80] ss:$12 sps:$4 sm:$0xff]  }
0x1470   :  { %v4299_v59 = vpop.f32.mrb[102].mxu1  ;;  %v6215_v56 = vld [vmem:[#allocation5 + $0x98] ss:$12 sps:$4 sm:$0xff]  }
0x1471   :  { %v5179_v16 = vpop.f32.mrb[103].mxu1  ;;  %v4303_v0 = vadd.f32 %v4302_v30, %v4297_v22  ;;  %v6213_v30 = vld [vmem:[#allocation5 + $0x200] ss:$12 sps:$4 sm:$0xff]   ;;  %v6216_v59 = vld [vmem:[#allocation5 + $0x218] ss:$12 sps:$4 sm:$0xff]  }
0x1472   :  { %v6217_v16 = vld [vmem:[#allocation5 + $0x170] ss:$12 sps:$4 sm:$0xff]  }
0x1473   :  { %4304 = vadd.xlane.f32.xlu0 %v4303_v0  ;;  %v6218_v0 = vld [vmem:[#allocation5 + $0xb0] ss:$12 sps:$4 sm:$0xff]  }
0x1500   :  { %v4305_v11 = vpop.xlane.xlu0 %4304 }
0x1501   :  { %v4306_v54 = vmul.f32 0.0033333334, %v4305_v11  ;;  %v6219_v11 = vld [vmem:[#allocation5 + $0x230] ss:$12 sps:$4 sm:$0xff]  }
0x1503   :  { %v4307_v60 = vsub.f32 %v4256_v27, %v4306_v54  ;;  %v4308_v36 = vsub.f32 %v4258_v53, %v4306_v54  ;;  %v4309_v28 = vsub.f32 %v4297_v22, %v4306_v54  ;;  %v4317_v41 = vmul.f32 84.0, %v4306_v54  ;;  %v6210_v27 = vld [vmem:[#allocation5 + $0x1e8] ss:$12 sps:$4 sm:$0xff]   ;;  %v6211_v53 = vld [vmem:[#allocation5 + $0x140] ss:$12 sps:$4 sm:$0xff]  }
0x1504   :  { %v6214_v22 = vld [vmem:[#allocation5 + $0x158] ss:$12 sps:$4 sm:$0xff]  }
0x1505   :  { %v4310_v31 = vmul.f32 %v4307_v60, %v4307_v60  ;;  %v4311_v35 = vmul.f32 %v4308_v36, %v4308_v36  ;;  %v4312_v2 = vmul.f32 %v4309_v28, %v4309_v28  ;;  %v4318_v40 = vmul.f32 %v4317_v41, %v4306_v54 }
0x1507   :  { %v4313_v43 = vadd.f32 %v4311_v35, %v4310_v31 }
0x1509   :  { %v4314_v37 = vadd.f32 %v4313_v43, %v4312_v2 }
0x150b   :  { %4315 = vadd.xlane.f32.xlu1 %v4314_v37 }
0x1598   :  { %v4316_v48 = vpop.xlane.xlu1 %4315 }
0x1599   :  { %v4319_v42 = vsub.f32 %v4316_v48, %v4318_v40 }
0x159b   :  { %v4320_v46 = vmul.f32 0.0033333334, %v4319_v42 }
0x159d   :  { %v4321_v51 = vadd.f32 1e-05, %v4320_v46 }
0x159f   :  { %5662 = vrsqrt.f32 %v4321_v51 }
0x15a9   :  { %v5663_v52 = vpop.eup %5662 }
0x15aa   :  { %v4324_v61 = vmul.f32 %v5663_v52, %v4308_v36  ;;  %v4325_v50 = vmul.f32 %v5663_v52, %v4309_v28  ;;  %v4323_v38 = vmul.f32 %v5663_v52, %v4307_v60 }
0x15ac   :  { %v4327_v4 = vmul.f32 %v4324_v61, %v6603_v7  ;;  %v4328_v5 = vmul.f32 %v4325_v50, %v6982_v58  ;;  %v4326_v12 = vmul.f32 %v4323_v38, %v6983_v15  ;;  %v6198_v7 = vld [vmem:[#allocation5 + $0x188] ss:$12 sps:$4 sm:$0xff]   ;;  %v6199_v58 = vld [vmem:[#allocation5 + $0xe0] ss:$12 sps:$4 sm:$0xff]  }
0x15ad   :  { %v6200_v15 = vld [vmem:[#allocation5 + $0x20] ss:$12 sps:$4 sm:$0xff]  }
0x15ae   :  { %v4330_v34 = vadd.f32 %v4327_v4, %v6984_v62  ;;  %v4331_v13 = vadd.f32 %v4328_v5, %v6985_v8  ;;  %v4329_v29 = vadd.f32 %v4326_v12, %v6986_v14  ;;  %v6201_v62 = vld [vmem:[#allocation5 + $0x1a0] ss:$12 sps:$4 sm:$0xff]   ;;  %v6202_v8 = vld [vmem:[#allocation5 + $0xf8] ss:$12 sps:$4 sm:$0xff]  }
0x15af   :  { %v6203_v14 = vld [vmem:[#allocation5 + $0x38] ss:$12 sps:$4 sm:$0xff]  }
0x15b0   :  { %v4333_v20 = vpack.c.bf16 %v4330_v34, %v4330_v34  ;;  %v4334_v18 = vpack.c.bf16 %v4331_v13, %v4331_v13  ;;  %v4332_v24 = vpack.c.bf16 %v4329_v29, %v4329_v29 }
0x15b2   :  { %4367 = vmatprep.mubr.bf16.mxu0 %v4333_v20  ;;  %4409 = vmatmul.mubr.bf16.vlgmr.msra.gmra.mrb[104].mxu1 %v4334_v18 }
0x15b3   :  { %5014 = vmatpush3.bf16.msra.mxu1 %v6197_v21  ;;  %4368 = vmatmul.mubr.bf16.vlgmr.msra.gmra.mrb[72].mxu0 %v4332_v24 }
0x15b4   :  { %4449 = vmatprep.mubr.bf16.mxu1 %v4333_v20  ;;  %5181 = vmatpush3.bf16.msra.mxu0 %v6198_v7 }
0x15b5   :  { %5015 = vmatprep.subr.bf16.mxu1 %v6199_v58  ;;  %5182 = vmatprep.subr.bf16.mxu0 %v6981_v55 }
0x15b6   :  { %5196 = vmatprep.mubr.msk.bf16.mxu0 %vm6300_vm0, %v6981_v55 }
0x15b7   :  { %5016 = vmatpush3.bf16.msra.mxu1 %v6200_v15 }
0x15b8   :  { %5183 = vmatpush3.bf16.msra.mxu0 %v6201_v62  ;;  %5017 = vmatprep.subr.bf16.mxu1 %v6202_v8 }
0x15b9   :  { %5184 = vmatprep.subr.bf16.mxu0 %v6981_v55 }
0x15bb   :  { %5018 = vmatpush3.bf16.msra.mxu1 %v6203_v14 }
0x15bc   :  { %5185 = vmatpush3.bf16.msra.mxu0 %v6204_v44  ;;  %5019 = vmatprep.subr.bf16.mxu1 %v6205_v23 }
0x15bd   :  { %5186 = vmatprep.subr.bf16.mxu0 %v6981_v55 }
0x15bf   :  { %5020 = vmatpush3.bf16.msra.mxu1 %v6206_v32 }
0x15c0   :  { %5187 = vmatpush3.bf16.msra.mxu0 %v6207_v47  ;;  %5021 = vmatprep.subr.bf16.mxu1 %v6208_v25 }
0x15c1   :  { %5188 = vmatprep.subr.bf16.mxu0 %v6981_v55 }
0x15c3   :  { %5022 = vmatpush3.bf16.msra.mxu1 %v6209_v45 }
0x15c4   :  { %5189 = vmatpush3.bf16.msra.mxu0 %v6210_v27  ;;  %5023 = vmatprep.subr.bf16.mxu1 %v6211_v53 }
0x15c5   :  { %5190 = vmatprep.subr.bf16.mxu0 %v6981_v55 }
0x15c7   :  { %5024 = vmatpush3.bf16.msra.mxu1 %v6212_v39 }
0x15c8   :  { %5191 = vmatpush3.bf16.msra.mxu0 %v6213_v30  ;;  %5025 = vmatprep.subr.bf16.mxu1 %v6214_v22 }
0x15c9   :  { %5192 = vmatprep.subr.bf16.mxu0 %v6981_v55 }
0x15cb   :  { %5026 = vmatpush3.bf16.msra.mxu1 %v6215_v56 }
0x15cc   :  { %5193 = vmatpush3.bf16.msra.mxu0 %v6216_v59  ;;  %5027 = vmatprep.subr.bf16.mxu1 %v6217_v16 }
0x15cd   :  { %5194 = vmatprep.subr.bf16.mxu0 %v6981_v55 }
0x15cf   :  { %5028 = vmatpush3.bf16.msra.mxu1 %v6218_v0 }
0x15d0   :  { %5195 = vmatpush3.bf16.msra.mxu0 %v6219_v11 }
0x15d2   :  { %4450 = vmatmul.mubr.bf16.vlgmr.msra.gmra.mrb[108].mxu1 %v4332_v24 }
0x15d3   :  { %5197 = vmatmul.mubr.bf16.vlgmr.msra.gmra.mrb[76].mxu0 %v4334_v18 }
0x1685   :  { %v4410_v54 = vpop.f32.mrb[104].mxu1 }
0x1686   :  { %v4369_v60 = vpop.f32.mrb[72].mxu0  ;;  %v4412_v36 = vpop.f32.mrb[105].mxu1 }
0x1687   :  { %v4370_v28 = vadd.f32 %v4369_v60, %v6647_v1  ;;  %v4371_v31 = vpop.f32.mrb[73].mxu0  ;;  %v4414_v35 = vpop.f32.mrb[106].mxu1 }
0x1688   :  { %v4372_v2 = vadd.f32 %v4371_v31, %v6650_v57  ;;  %v4373_v43 = vpop.f32.mrb[74].mxu0  ;;  %v4415_v37 = vpop.f32.mrb[107].mxu1 }
0x1689   :  { %v4411_v41 = vadd.f32 %v4410_v54, %v4370_v28  ;;  %v4374_v40 = vpop.f32.mrb[75].mxu0 }
0x168a   :  { %v4413_v55 = vadd.f32 %v4412_v36, %v4372_v2 }
0x168b   :  { %v4497_v4 = vadd.f32 %v6815_v49, %v4411_v41 }
0x168c   :  { %v4498_v1 = vadd.f32 %v6821_v9, %v4413_v55 }
0x168e   :  { %v4500_v13 = vadd.f32 %v4498_v1, %v4497_v4 }
0x16a5   :  { %v5029_v48 = vpop.f32.mrb[108].mxu1 }
0x16a6   :  { %v5030_v42 = vpop.f32.mrb[109].mxu1  ;;  %v4491_v46 = vpop.f32.mrb[76].mxu0 }
0x16a7   :  { %v5031_v51 = vadd.f32 %v5030_v42, %v5029_v48  ;;  %v5032_v52 = vpop.f32.mrb[110].mxu1  ;;  %v5198_v61 = vpop.f32.mrb[77].mxu0 }
0x16a8   :  { %v5033_v50 = vpop.f32.mrb[111].mxu1  ;;  %v4494_v38 = vpop.f32.mrb[78].mxu0 }
0x16a9   :  { %v4452_v5 = vadd.f32 %v5031_v51, %v6655_v19  ;;  %v5199_v57 = vpop.f32.mrb[79].mxu0 }
0x16ab   :  { %v4492_v12 = vadd.f32 %v4491_v46, %v4452_v5 }
0x16ad   :  { %v4499_v34 = vadd.f32 %v6828_v10, %v4492_v12 }
0x16af   :  { %v4501_v29 = vadd.f32 %v4500_v13, %v4499_v34 }
0x16b1   :  { %4502 = vadd.xlane.f32.xlu0 %v4501_v29 }
0x173e   :  { %v4503_v20 = vpop.xlane.xlu0 %4502 }
0x173f   :  { %v4504_v18 = vmul.f32 0.0033333334, %v4503_v20 }
0x1741   :  { %v4505_v24 = vsub.f32 %v4497_v4, %v4504_v18  ;;  %v4506_v21 = vsub.f32 %v4498_v1, %v4504_v18  ;;  %v4507_v7 = vsub.f32 %v4499_v34, %v4504_v18  ;;  %v4515_v9 = vmul.f32 84.0, %v4504_v18 }
0x1743   :  { %v4508_v58 = vmul.f32 %v4505_v24, %v4505_v24  ;;  %v4509_v15 = vmul.f32 %v4506_v21, %v4506_v21  ;;  %v4510_v62 = vmul.f32 %v4507_v7, %v4507_v7  ;;  %v4516_v19 = vmul.f32 %v4515_v9, %v4504_v18 }
0x1745   :  { %v4511_v49 = vadd.f32 %v4509_v15, %v4508_v58 }
0x1747   :  { %v4512_v8 = vadd.f32 %v4511_v49, %v4510_v62 }
0x1749   :  { %4513 = vadd.xlane.f32.xlu1 %v4512_v8 }
0x17d6   :  { %v4514_v14 = vpop.xlane.xlu1 %4513 }
0x17d7   :  { %v4517_v44 = vsub.f32 %v4514_v14, %v4516_v19 }
0x17d9   :  { %v4518_v23 = vmul.f32 0.0033333334, %v4517_v44 }
0x17db   :  { %v4519_v10 = vadd.f32 1e-05, %v4518_v23 }
0x17dd   :  { %5664 = vrsqrt.f32 %v4519_v10 }
0x17e7   :  { %v5665_v32 = vpop.eup %5664 }
0x17e8   :  { %v4521_v47 = vmul.f32 %v5665_v32, %v4505_v24  ;;  %v4522_v25 = vmul.f32 %v5665_v32, %v4506_v21  ;;  %v4523_v45 = vmul.f32 %v5665_v32, %v4507_v7 }
0x17ea   :  { %v4524_v27 = vmul.f32 %v4521_v47, %v6674_v6  ;;  %v4525_v53 = vmul.f32 %v4522_v25, %v6668_v26  ;;  %v4526_v39 = vmul.f32 %v4523_v45, %v6671_v17 }
0x17ec   :  { %v4527_v30 = vadd.f32 %v4524_v27, %v6683_v3  ;;  %v4528_v22 = vadd.f32 %v4525_v53, %v6677_v63  ;;  %v4529_v56 = vadd.f32 %v4526_v39, %v6680_v33 }
0x17ee   :  { %4530 = vst [vmem:[#allocation7] sm:$0xff] %v4527_v30  ;;  %4531 = vst [vmem:[#allocation7 + $0x8] sm:$0xff] %v4528_v22 }
0x17ef   :  { %4532 = vst [vmem:[#allocation7 + $0x10] sm:$0xff] %v4529_v56 }
0x17f0   :  { %6275 = shalt.err (!%p6272_p6)
}
0x17f1   :  { %s6276_s26 = scalar_lea.hbm %s6960_s10, 384 }
0x17f2   :  { %p6277_p7 = scmp.ne.s32.totalorder %s6960_s10, %s6276_s26  ;;  %p6280_p8 = scmp.lt.u32.totalorder %s6276_s26, %s6960_s10 }
0x17f4   :  { %p6282_p9 = pnand %p6280_p8, %p6277_p7 }
0x17f6   :  { %6285 = shalt.err (!%p6282_p9)
}
0x17f7   :  { %4542 = dma.vmem_to_hbm [thread:$0]  %s4540_s22, 384, %s6960_s10, [#allocation4]  }
0x17f8   :  { %6290 = dma.done.wait [#allocation4], 384  }
0x17f9   :  { %6291 = vsyncadd [#allocation4], 4294966912 }
0x17fa   :  { %4546 = vsyncpa [#allocation3], 1 }
0x17fb   :  { %4547 = vsyncpa [#allocation6], 1 }
0x17fc   :  { %4548 = vsyncpa [#allocation4], 1 }

</bundles_post_ra>
